<compile_context>
chip_gen: v7x
topology: tpu7x:2x2x1
jax: 0.10.0
libtpu: 0.0.40
codegen_flags: <defaults>
</compile_context>

<pallas_src>
import jax
import jax.numpy as jnp
from jax.experimental import pallas as pl
from jax.experimental.pallas import tpu as pltpu

# KANLinear hyper-parameters (defaults of KAN_Convolutional_Layer / KANLinear)
GRID_SIZE = 5
SPLINE_ORDER = 3
NUM_COEF = GRID_SIZE + SPLINE_ORDER          # 8 spline coefficients per input feature
K2 = 4                                       # (2,2) kernel -> 4 taps per patch
NUM_FEAT = K2 * (1 + NUM_COEF)               # 36 = 4 SiLU features + 32 spline features
NC_PAD = 8                                   # n_convs (<=6) padded to one sublane tile
H_KNOT = 2.0 / GRID_SIZE                     # grid_range = [-1, 1]
KNOTS = tuple(-1.0 + H_KNOT * t
              for t in range(-SPLINE_ORDER, GRID_SIZE + SPLINE_ORDER + 1))  # 12 knots
LANE_CHUNK = 256                             # lanes processed per grid step


def _kan_conv_kernel(x_ref, w_ref, out_ref):
    """Fused KANLinear over one lane-chunk of unfolded patches.

    x_ref   : (K2, L)            4 kernel taps on sublanes, patch positions on lanes
    w_ref   : (NC_PAD, NUM_FEAT) packed weights: cols 0..3 = base_weight (per tap),
                                 col 4 + 4*j + t = scaled_spline_weight[:, t, j]
    out_ref : (NC_PAD, L)        rows >= n_convs are zero (sliced off in wrapper)
    """
    x = x_ref[...]                                           # (4, L) f32
    silu = x * jax.nn.sigmoid(x)                             # base branch activation

    # Cox-de-Boor recursion up to degree 3 (matches efficient-kan, uniform knots).
    g = KNOTS
    bases = [jnp.where((x >= g[j]) & (x < g[j + 1]), 1.0, 0.0).astype(jnp.float32)
             for j in range(len(g) - 1)]                     # degree-0 indicators
    for k in range(1, SPLINE_ORDER + 1):
        nxt = []
        for j in range(len(g) - 1 - k):
            inv_l = 1.0 / (g[j + k] - g[j])                  # trace-time reciprocals:
            inv_r = 1.0 / (g[j + k + 1] - g[j + 1])          # no runtime divides
            nxt.append((x - g[j]) * inv_l * bases[j]
                       + (g[j + k + 1] - x) * inv_r * bases[j + 1])
        bases = nxt                                          # NUM_COEF arrays (4, L)

    # Fused contraction: out[c, :] = sum_f w[c, f] * feature_f[:]
    # realised as 36 VPU broadcast-FMAs (no MXU push/pop, no concat).
    w = w_ref[...]                                           # (NC_PAD, NUM_FEAT)
    groups = [silu] + bases                                  # 9 groups x 4 taps
    acc = w[:, 0:1] * groups[0][0:1, :]                      # first FMA initialises acc
    for gi, grp in enumerate(groups):
        for t in range(K2):
            f = gi * K2 + t
            if f == 0:
                continue
            acc = acc + w[:, f:f + 1] * grp[t:t + 1, :]      # (8,1)*(1,L) -> (8,L)
    out_ref[...] = acc


def _pack_weights(base_w, spline_w, spline_scaler):
    """(n_convs, 4), (n_convs, 4, 8), (n_convs, 4) -> (NC_PAD, NUM_FEAT) f32."""
    n_convs = base_w.shape[0]
    scaled = spline_w * spline_scaler[..., None]             # (n_convs, 4, 8)
    spline_flat = scaled.transpose(0, 2, 1).reshape(n_convs, NUM_COEF * K2)  # j-major, tap-minor
    w = jnp.concatenate([base_w, spline_flat], axis=1).astype(jnp.float32)   # (n_convs, 36)
    return jnp.pad(w, ((0, NC_PAD - n_convs), (0, 0)))


def kan_conv_layer(x, base_w, spline_w, spline_scaler):
    """One KAN_Convolutional_Layer: kernel (2,2), stride 1, padding (1,1).

    x: (B, C, H, W) -> (B, C * n_convs, H+1, W+1); output channel = c*n_convs + k.
    """
    B, C, H, W = x.shape
    n_convs = base_w.shape[0]
    assert n_convs <= NC_PAD
    Hout, Wout = H + 1, W + 1
    N = Hout * Wout
    BC = B * C
    N_pad = ((N + 127) // 128) * 128                         # lane-pad each slice

    # unfold (same tap ordering as torch.nn.Unfold: row-major (di, dj))
    xp = jnp.pad(x, ((0, 0), (0, 0), (1, 1), (1, 1)))
    taps = [xp[:, :, di:di + Hout, dj:dj + Wout] for di in range(2) for dj in range(2)]
    patches = jnp.stack(taps, axis=2)                        # (B, C, 4, Hout, Wout)
    patches = patches.reshape(BC, K2, N)
    patches = jnp.pad(patches, ((0, 0), (0, 0), (0, N_pad - N)))
    # lane-major 2D layout: (K2, BC * N_pad) -- slices concatenated on the lane axis
    patches2d = patches.transpose(1, 0, 2).reshape(K2, BC * N_pad).astype(jnp.float32)

    total = BC * N_pad
    total_pad = ((total + LANE_CHUNK - 1) // LANE_CHUNK) * LANE_CHUNK
    if total_pad != total:
        patches2d = jnp.pad(patches2d, ((0, 0), (0, total_pad - total)))
    n_chunks = total_pad // LANE_CHUNK                       # >= 2 for all layers here

    w_packed = _pack_weights(base_w, spline_w, spline_scaler)  # (NC_PAD, NUM_FEAT)

    out2d = pl.pallas_call(
        _kan_conv_kernel,
        out_shape=jax.ShapeDtypeStruct((NC_PAD, total_pad), jnp.float32),
        grid_spec=pltpu.PrefetchScalarGridSpec(
            num_scalar_prefetch=0,
            grid=(n_chunks,),
            in_specs=[
                pl.BlockSpec((K2, LANE_CHUNK), lambda i: (0, i)),
                pl.BlockSpec((NC_PAD, NUM_FEAT), lambda i: (0, 0)),
            ],
            out_specs=pl.BlockSpec((NC_PAD, LANE_CHUNK), lambda i: (0, i)),
        ),
        compiler_params=pltpu.CompilerParams(dimension_semantics=("parallel",)),
    )(patches2d, w_packed)

    # un-pad + layout plumbing back to NCHW (cheap wrapper-side reshapes)
    out = out2d[:n_convs, :total].reshape(n_convs, B, C, N_pad)[:, :, :, :N]
    out = out.reshape(n_convs, B, C, Hout, Wout)
    out = out.transpose(1, 2, 0, 3, 4).reshape(B, C * n_convs, Hout, Wout)
    return out


def batch_norm_train(x, eps=1e-5):
    # nn.BatchNorm2d in training mode: batch statistics, biased var, gamma=1, beta=0
    mean = x.mean(axis=(0, 2, 3), keepdims=True)
    var = x.var(axis=(0, 2, 3), keepdims=True)
    return (x - mean) * jax.lax.rsqrt(var + eps)


def avg_pool_2x2(x):
    # nn.AvgPool2d(kernel_size=(2,2)): stride 2, floor mode (odd edge cropped)
    B, C, H, W = x.shape
    H2, W2 = H // 2, W // 2
    x = x[:, :, :H2 * 2, :W2 * 2]
    return x.reshape(B, C, H2, 2, W2, 2).mean(axis=(3, 5))


def make_params(key, num_layers=(2, 4, 6)):
    """Deterministic synthetic KANLinear params (base_weight, spline_weight, spline_scaler)."""
    params = []
    for n_convs in num_layers:
        key, k1, k2, k3 = jax.random.split(key, 4)
        base_w = 0.5 * jax.random.normal(k1, (n_convs, K2), jnp.float32)
        spline_w = 0.1 * jax.random.normal(k2, (n_convs, K2, NUM_COEF), jnp.float32)
        scaler = 1.0 + 0.1 * jax.random.normal(k3, (n_convs, K2), jnp.float32)
        params.append((base_w, spline_w, scaler))
    return params


def kan_conv_forward(params, x, mask):
    """KanConv.forward: 3 x (KAN conv -> BatchNorm2d -> AvgPool2d(2)); mask stride-2^3."""
    for base_w, spline_w, scaler in params:
        x = kan_conv_layer(x, base_w, spline_w, scaler)
        x = batch_norm_train(x)
        x = avg_pool_2x2(x)
    mask = mask[:, 0::2, 0::2][:, 0::2, 0::2][:, 0::2, 0::2]
    return x, mask


if __name__ == "__main__":
    key = jax.random.PRNGKey(0)
    kx, km, kp = jax.random.split(key, 3)

    # BatchNorm2d(n1) right after the first layer forces C_in = 1 (grayscale images)
    B, C_in, H, W = 2, 1, 16, 16
    n1, n2, n3 = 2, 4, 6
    x = jax.random.normal(kx, (B, C_in, H, W), jnp.float32)
    mask = jax.random.uniform(km, (B, H, W)) > 0.5
    params = make_params(kp, (n1, n2, n3))

    out, out_mask = jax.jit(kan_conv_forward)(params, x, mask)
    jax.block_until_ready((out, out_mask))

    assert out.shape == (B, n1 * n2 * n3, 2, 2), out.shape
    assert out_mask.shape == (B, 2, 2), out_mask.shape
    assert bool(jnp.all(jnp.isfinite(out)))
    print("KERNEL_OK")
</pallas_src>

<mosaic_0001>
module attributes {stable_mosaic.version = 11 : i64} {
  func.func @_kan_conv_kernel(%arg0: i32, %arg1: memref<4x256xf32, #tpu.memory_space<vmem>>, %arg2: memref<8x36xf32, #tpu.memory_space<vmem>>, %arg3: memref<8x256xf32, #tpu.memory_space<vmem>>) attributes {dimension_semantics = [#tpu.dimension_semantics<parallel>], iteration_bounds = array<i64: 3>, scalar_prefetch = 0 : i64, scratch_operands = 0 : i64, tpu.core_type = #tpu.core_type<tc>, window_params = [{transform_indices = @transform_0, window_bounds = array<i64: 4, 256>}, {pipeline_mode = #tpu.pipeline_mode<synchronous>, transform_indices = @transform_1, window_bounds = array<i64: 8, 36>}, {transform_indices = @transform_2, window_bounds = array<i64: 8, 256>}]} {
    %c0 = arith.constant 0 : index
    %c0_0 = arith.constant 0 : index
    %0 = vector.load %arg1[%c0, %c0_0] : memref<4x256xf32, #tpu.memory_space<vmem>>, vector<4x256xf32>
    %1 = arith.negf %0 : vector<4x256xf32>
    %2 = math.exp %1 : vector<4x256xf32>
    %cst = arith.constant 1.000000e+00 : f32
    %3 = vector.broadcast %cst : f32 to vector<4x256xf32>
    %4 = arith.addf %3, %2 : vector<4x256xf32>
    %5 = arith.divf %3, %4 : vector<4x256xf32>
    %6 = arith.mulf %0, %5 : vector<4x256xf32>
    %cst_1 = arith.constant -2.200000e+00 : f32
    %7 = vector.broadcast %cst_1 : f32 to vector<4x256xf32>
    %8 = arith.cmpf oge, %0, %7 : vector<4x256xf32>
    %cst_2 = arith.constant -1.800000e+00 : f32
    %9 = vector.broadcast %cst_2 : f32 to vector<4x256xf32>
    %10 = arith.cmpf olt, %0, %9 : vector<4x256xf32>
    %11 = arith.andi %8, %10 : vector<4x256xi1>
    %cst_3 = arith.constant 1.000000e+00 : f32
    %cst_4 = arith.constant 0.000000e+00 : f32
    %12 = vector.broadcast %cst_3 : f32 to vector<4x256xf32>
    %13 = vector.broadcast %cst_4 : f32 to vector<4x256xf32>
    %14 = arith.select %11, %12, %13 : vector<4x256xi1>, vector<4x256xf32>
    %cst_5 = arith.constant -1.800000e+00 : f32
    %15 = vector.broadcast %cst_5 : f32 to vector<4x256xf32>
    %16 = arith.cmpf oge, %0, %15 : vector<4x256xf32>
    %cst_6 = arith.constant -1.400000e+00 : f32
    %17 = vector.broadcast %cst_6 : f32 to vector<4x256xf32>
    %18 = arith.cmpf olt, %0, %17 : vector<4x256xf32>
    %19 = arith.andi %16, %18 : vector<4x256xi1>
    %cst_7 = arith.constant 1.000000e+00 : f32
    %cst_8 = arith.constant 0.000000e+00 : f32
    %20 = vector.broadcast %cst_7 : f32 to vector<4x256xf32>
    %21 = vector.broadcast %cst_8 : f32 to vector<4x256xf32>
    %22 = arith.select %19, %20, %21 : vector<4x256xi1>, vector<4x256xf32>
    %cst_9 = arith.constant -1.400000e+00 : f32
    %23 = vector.broadcast %cst_9 : f32 to vector<4x256xf32>
    %24 = arith.cmpf oge, %0, %23 : vector<4x256xf32>
    %cst_10 = arith.constant -1.000000e+00 : f32
    %25 = vector.broadcast %cst_10 : f32 to vector<4x256xf32>
    %26 = arith.cmpf olt, %0, %25 : vector<4x256xf32>
    %27 = arith.andi %24, %26 : vector<4x256xi1>
    %cst_11 = arith.constant 1.000000e+00 : f32
    %cst_12 = arith.constant 0.000000e+00 : f32
    %28 = vector.broadcast %cst_11 : f32 to vector<4x256xf32>
    %29 = vector.broadcast %cst_12 : f32 to vector<4x256xf32>
    %30 = arith.select %27, %28, %29 : vector<4x256xi1>, vector<4x256xf32>
    %cst_13 = arith.constant -1.000000e+00 : f32
    %31 = vector.broadcast %cst_13 : f32 to vector<4x256xf32>
    %32 = arith.cmpf oge, %0, %31 : vector<4x256xf32>
    %cst_14 = arith.constant -6.000000e-01 : f32
    %33 = vector.broadcast %cst_14 : f32 to vector<4x256xf32>
    %34 = arith.cmpf olt, %0, %33 : vector<4x256xf32>
    %35 = arith.andi %32, %34 : vector<4x256xi1>
    %cst_15 = arith.constant 1.000000e+00 : f32
    %cst_16 = arith.constant 0.000000e+00 : f32
    %36 = vector.broadcast %cst_15 : f32 to vector<4x256xf32>
    %37 = vector.broadcast %cst_16 : f32 to vector<4x256xf32>
    %38 = arith.select %35, %36, %37 : vector<4x256xi1>, vector<4x256xf32>
    %cst_17 = arith.constant -6.000000e-01 : f32
    %39 = vector.broadcast %cst_17 : f32 to vector<4x256xf32>
    %40 = arith.cmpf oge, %0, %39 : vector<4x256xf32>
    %cst_18 = arith.constant -2.000000e-01 : f32
    %41 = vector.broadcast %cst_18 : f32 to vector<4x256xf32>
    %42 = arith.cmpf olt, %0, %41 : vector<4x256xf32>
    %43 = arith.andi %40, %42 : vector<4x256xi1>
    %cst_19 = arith.constant 1.000000e+00 : f32
    %cst_20 = arith.constant 0.000000e+00 : f32
    %44 = vector.broadcast %cst_19 : f32 to vector<4x256xf32>
    %45 = vector.broadcast %cst_20 : f32 to vector<4x256xf32>
    %46 = arith.select %43, %44, %45 : vector<4x256xi1>, vector<4x256xf32>
    %cst_21 = arith.constant -2.000000e-01 : f32
    %47 = vector.broadcast %cst_21 : f32 to vector<4x256xf32>
    %48 = arith.cmpf oge, %0, %47 : vector<4x256xf32>
    %cst_22 = arith.constant 2.000000e-01 : f32
    %49 = vector.broadcast %cst_22 : f32 to vector<4x256xf32>
    %50 = arith.cmpf olt, %0, %49 : vector<4x256xf32>
    %51 = arith.andi %48, %50 : vector<4x256xi1>
    %cst_23 = arith.constant 1.000000e+00 : f32
    %cst_24 = arith.constant 0.000000e+00 : f32
    %52 = vector.broadcast %cst_23 : f32 to vector<4x256xf32>
    %53 = vector.broadcast %cst_24 : f32 to vector<4x256xf32>
    %54 = arith.select %51, %52, %53 : vector<4x256xi1>, vector<4x256xf32>
    %cst_25 = arith.constant 2.000000e-01 : f32
    %55 = vector.broadcast %cst_25 : f32 to vector<4x256xf32>
    %56 = arith.cmpf oge, %0, %55 : vector<4x256xf32>
    %cst_26 = arith.constant 6.000000e-01 : f32
    %57 = vector.broadcast %cst_26 : f32 to vector<4x256xf32>
    %58 = arith.cmpf olt, %0, %57 : vector<4x256xf32>
    %59 = arith.andi %56, %58 : vector<4x256xi1>
    %cst_27 = arith.constant 1.000000e+00 : f32
    %cst_28 = arith.constant 0.000000e+00 : f32
    %60 = vector.broadcast %cst_27 : f32 to vector<4x256xf32>
    %61 = vector.broadcast %cst_28 : f32 to vector<4x256xf32>
    %62 = arith.select %59, %60, %61 : vector<4x256xi1>, vector<4x256xf32>
    %cst_29 = arith.constant 6.000000e-01 : f32
    %63 = vector.broadcast %cst_29 : f32 to vector<4x256xf32>
    %64 = arith.cmpf oge, %0, %63 : vector<4x256xf32>
    %cst_30 = arith.constant 1.000000e+00 : f32
    %65 = vector.broadcast %cst_30 : f32 to vector<4x256xf32>
    %66 = arith.cmpf olt, %0, %65 : vector<4x256xf32>
    %67 = arith.andi %64, %66 : vector<4x256xi1>
    %cst_31 = arith.constant 1.000000e+00 : f32
    %cst_32 = arith.constant 0.000000e+00 : f32
    %68 = vector.broadcast %cst_31 : f32 to vector<4x256xf32>
    %69 = vector.broadcast %cst_32 : f32 to vector<4x256xf32>
    %70 = arith.select %67, %68, %69 : vector<4x256xi1>, vector<4x256xf32>
    %cst_33 = arith.constant 1.000000e+00 : f32
    %71 = vector.broadcast %cst_33 : f32 to vector<4x256xf32>
    %72 = arith.cmpf oge, %0, %71 : vector<4x256xf32>
    %cst_34 = arith.constant 1.400000e+00 : f32
    %73 = vector.broadcast %cst_34 : f32 to vector<4x256xf32>
    %74 = arith.cmpf olt, %0, %73 : vector<4x256xf32>
    %75 = arith.andi %72, %74 : vector<4x256xi1>
    %cst_35 = arith.constant 1.000000e+00 : f32
    %cst_36 = arith.constant 0.000000e+00 : f32
    %76 = vector.broadcast %cst_35 : f32 to vector<4x256xf32>
    %77 = vector.broadcast %cst_36 : f32 to vector<4x256xf32>
    %78 = arith.select %75, %76, %77 : vector<4x256xi1>, vector<4x256xf32>
    %cst_37 = arith.constant 1.400000e+00 : f32
    %79 = vector.broadcast %cst_37 : f32 to vector<4x256xf32>
    %80 = arith.cmpf oge, %0, %79 : vector<4x256xf32>
    %cst_38 = arith.constant 1.800000e+00 : f32
    %81 = vector.broadcast %cst_38 : f32 to vector<4x256xf32>
    %82 = arith.cmpf olt, %0, %81 : vector<4x256xf32>
    %83 = arith.andi %80, %82 : vector<4x256xi1>
    %cst_39 = arith.constant 1.000000e+00 : f32
    %cst_40 = arith.constant 0.000000e+00 : f32
    %84 = vector.broadcast %cst_39 : f32 to vector<4x256xf32>
    %85 = vector.broadcast %cst_40 : f32 to vector<4x256xf32>
    %86 = arith.select %83, %84, %85 : vector<4x256xi1>, vector<4x256xf32>
    %cst_41 = arith.constant 1.800000e+00 : f32
    %87 = vector.broadcast %cst_41 : f32 to vector<4x256xf32>
    %88 = arith.cmpf oge, %0, %87 : vector<4x256xf32>
    %cst_42 = arith.constant 2.200000e+00 : f32
    %89 = vector.broadcast %cst_42 : f32 to vector<4x256xf32>
    %90 = arith.cmpf olt, %0, %89 : vector<4x256xf32>
    %91 = arith.andi %88, %90 : vector<4x256xi1>
    %cst_43 = arith.constant 1.000000e+00 : f32
    %cst_44 = arith.constant 0.000000e+00 : f32
    %92 = vector.broadcast %cst_43 : f32 to vector<4x256xf32>
    %93 = vector.broadcast %cst_44 : f32 to vector<4x256xf32>
    %94 = arith.select %91, %92, %93 : vector<4x256xi1>, vector<4x256xf32>
    %cst_45 = arith.constant -2.200000e+00 : f32
    %95 = vector.broadcast %cst_45 : f32 to vector<4x256xf32>
    %96 = arith.subf %0, %95 : vector<4x256xf32>
    %cst_46 = arith.constant 2.500000e+00 : f32
    %97 = vector.broadcast %cst_46 : f32 to vector<4x256xf32>
    %98 = arith.mulf %96, %97 : vector<4x256xf32>
    %99 = arith.mulf %98, %14 : vector<4x256xf32>
    %cst_47 = arith.constant -1.400000e+00 : f32
    %100 = vector.broadcast %cst_47 : f32 to vector<4x256xf32>
    %101 = arith.subf %100, %0 : vector<4x256xf32>
    %cst_48 = arith.constant 2.500000e+00 : f32
    %102 = vector.broadcast %cst_48 : f32 to vector<4x256xf32>
    %103 = arith.mulf %101, %102 : vector<4x256xf32>
    %104 = arith.mulf %103, %22 : vector<4x256xf32>
    %105 = arith.addf %99, %104 : vector<4x256xf32>
    %cst_49 = arith.constant -1.800000e+00 : f32
    %106 = vector.broadcast %cst_49 : f32 to vector<4x256xf32>
    %107 = arith.subf %0, %106 : vector<4x256xf32>
    %cst_50 = arith.constant 2.500000e+00 : f32
    %108 = vector.broadcast %cst_50 : f32 to vector<4x256xf32>
    %109 = arith.mulf %107, %108 : vector<4x256xf32>
    %110 = arith.mulf %109, %22 : vector<4x256xf32>
    %cst_51 = arith.constant -1.000000e+00 : f32
    %111 = vector.broadcast %cst_51 : f32 to vector<4x256xf32>
    %112 = arith.subf %111, %0 : vector<4x256xf32>
    %cst_52 = arith.constant 2.500000e+00 : f32
    %113 = vector.broadcast %cst_52 : f32 to vector<4x256xf32>
    %114 = arith.mulf %112, %113 : vector<4x256xf32>
    %115 = arith.mulf %114, %30 : vector<4x256xf32>
    %116 = arith.addf %110, %115 : vector<4x256xf32>
    %cst_53 = arith.constant -1.400000e+00 : f32
    %117 = vector.broadcast %cst_53 : f32 to vector<4x256xf32>
    %118 = arith.subf %0, %117 : vector<4x256xf32>
    %cst_54 = arith.constant 2.500000e+00 : f32
    %119 = vector.broadcast %cst_54 : f32 to vector<4x256xf32>
    %120 = arith.mulf %118, %119 : vector<4x256xf32>
    %121 = arith.mulf %120, %30 : vector<4x256xf32>
    %cst_55 = arith.constant -6.000000e-01 : f32
    %122 = vector.broadcast %cst_55 : f32 to vector<4x256xf32>
    %123 = arith.subf %122, %0 : vector<4x256xf32>
    %cst_56 = arith.constant 2.500000e+00 : f32
    %124 = vector.broadcast %cst_56 : f32 to vector<4x256xf32>
    %125 = arith.mulf %123, %124 : vector<4x256xf32>
    %126 = arith.mulf %125, %38 : vector<4x256xf32>
    %127 = arith.addf %121, %126 : vector<4x256xf32>
    %cst_57 = arith.constant -1.000000e+00 : f32
    %128 = vector.broadcast %cst_57 : f32 to vector<4x256xf32>
    %129 = arith.subf %0, %128 : vector<4x256xf32>
    %cst_58 = arith.constant 2.500000e+00 : f32
    %130 = vector.broadcast %cst_58 : f32 to vector<4x256xf32>
    %131 = arith.mulf %129, %130 : vector<4x256xf32>
    %132 = arith.mulf %131, %38 : vector<4x256xf32>
    %cst_59 = arith.constant -2.000000e-01 : f32
    %133 = vector.broadcast %cst_59 : f32 to vector<4x256xf32>
    %134 = arith.subf %133, %0 : vector<4x256xf32>
    %cst_60 = arith.constant 2.500000e+00 : f32
    %135 = vector.broadcast %cst_60 : f32 to vector<4x256xf32>
    %136 = arith.mulf %134, %135 : vector<4x256xf32>
    %137 = arith.mulf %136, %46 : vector<4x256xf32>
    %138 = arith.addf %132, %137 : vector<4x256xf32>
    %cst_61 = arith.constant -6.000000e-01 : f32
    %139 = vector.broadcast %cst_61 : f32 to vector<4x256xf32>
    %140 = arith.subf %0, %139 : vector<4x256xf32>
    %cst_62 = arith.constant 2.500000e+00 : f32
    %141 = vector.broadcast %cst_62 : f32 to vector<4x256xf32>
    %142 = arith.mulf %140, %141 : vector<4x256xf32>
    %143 = arith.mulf %142, %46 : vector<4x256xf32>
    %cst_63 = arith.constant 2.000000e-01 : f32
    %144 = vector.broadcast %cst_63 : f32 to vector<4x256xf32>
    %145 = arith.subf %144, %0 : vector<4x256xf32>
    %cst_64 = arith.constant 2.500000e+00 : f32
    %146 = vector.broadcast %cst_64 : f32 to vector<4x256xf32>
    %147 = arith.mulf %145, %146 : vector<4x256xf32>
    %148 = arith.mulf %147, %54 : vector<4x256xf32>
    %149 = arith.addf %143, %148 : vector<4x256xf32>
    %cst_65 = arith.constant -2.000000e-01 : f32
    %150 = vector.broadcast %cst_65 : f32 to vector<4x256xf32>
    %151 = arith.subf %0, %150 : vector<4x256xf32>
    %cst_66 = arith.constant 2.500000e+00 : f32
    %152 = vector.broadcast %cst_66 : f32 to vector<4x256xf32>
    %153 = arith.mulf %151, %152 : vector<4x256xf32>
    %154 = arith.mulf %153, %54 : vector<4x256xf32>
    %cst_67 = arith.constant 6.000000e-01 : f32
    %155 = vector.broadcast %cst_67 : f32 to vector<4x256xf32>
    %156 = arith.subf %155, %0 : vector<4x256xf32>
    %cst_68 = arith.constant 2.500000e+00 : f32
    %157 = vector.broadcast %cst_68 : f32 to vector<4x256xf32>
    %158 = arith.mulf %156, %157 : vector<4x256xf32>
    %159 = arith.mulf %158, %62 : vector<4x256xf32>
    %160 = arith.addf %154, %159 : vector<4x256xf32>
    %cst_69 = arith.constant 2.000000e-01 : f32
    %161 = vector.broadcast %cst_69 : f32 to vector<4x256xf32>
    %162 = arith.subf %0, %161 : vector<4x256xf32>
    %cst_70 = arith.constant 2.500000e+00 : f32
    %163 = vector.broadcast %cst_70 : f32 to vector<4x256xf32>
    %164 = arith.mulf %162, %163 : vector<4x256xf32>
    %165 = arith.mulf %164, %62 : vector<4x256xf32>
    %cst_71 = arith.constant 1.000000e+00 : f32
    %166 = vector.broadcast %cst_71 : f32 to vector<4x256xf32>
    %167 = arith.subf %166, %0 : vector<4x256xf32>
    %cst_72 = arith.constant 2.500000e+00 : f32
    %168 = vector.broadcast %cst_72 : f32 to vector<4x256xf32>
    %169 = arith.mulf %167, %168 : vector<4x256xf32>
    %170 = arith.mulf %169, %70 : vector<4x256xf32>
    %171 = arith.addf %165, %170 : vector<4x256xf32>
    %cst_73 = arith.constant 6.000000e-01 : f32
    %172 = vector.broadcast %cst_73 : f32 to vector<4x256xf32>
    %173 = arith.subf %0, %172 : vector<4x256xf32>
    %cst_74 = arith.constant 2.500000e+00 : f32
    %174 = vector.broadcast %cst_74 : f32 to vector<4x256xf32>
    %175 = arith.mulf %173, %174 : vector<4x256xf32>
    %176 = arith.mulf %175, %70 : vector<4x256xf32>
    %cst_75 = arith.constant 1.400000e+00 : f32
    %177 = vector.broadcast %cst_75 : f32 to vector<4x256xf32>
    %178 = arith.subf %177, %0 : vector<4x256xf32>
    %cst_76 = arith.constant 2.500000e+00 : f32
    %179 = vector.broadcast %cst_76 : f32 to vector<4x256xf32>
    %180 = arith.mulf %178, %179 : vector<4x256xf32>
    %181 = arith.mulf %180, %78 : vector<4x256xf32>
    %182 = arith.addf %176, %181 : vector<4x256xf32>
    %cst_77 = arith.constant 1.000000e+00 : f32
    %183 = vector.broadcast %cst_77 : f32 to vector<4x256xf32>
    %184 = arith.subf %0, %183 : vector<4x256xf32>
    %cst_78 = arith.constant 2.500000e+00 : f32
    %185 = vector.broadcast %cst_78 : f32 to vector<4x256xf32>
    %186 = arith.mulf %184, %185 : vector<4x256xf32>
    %187 = arith.mulf %186, %78 : vector<4x256xf32>
    %cst_79 = arith.constant 1.800000e+00 : f32
    %188 = vector.broadcast %cst_79 : f32 to vector<4x256xf32>
    %189 = arith.subf %188, %0 : vector<4x256xf32>
    %cst_80 = arith.constant 2.500000e+00 : f32
    %190 = vector.broadcast %cst_80 : f32 to vector<4x256xf32>
    %191 = arith.mulf %189, %190 : vector<4x256xf32>
    %192 = arith.mulf %191, %86 : vector<4x256xf32>
    %193 = arith.addf %187, %192 : vector<4x256xf32>
    %cst_81 = arith.constant 1.400000e+00 : f32
    %194 = vector.broadcast %cst_81 : f32 to vector<4x256xf32>
    %195 = arith.subf %0, %194 : vector<4x256xf32>
    %cst_82 = arith.constant 2.500000e+00 : f32
    %196 = vector.broadcast %cst_82 : f32 to vector<4x256xf32>
    %197 = arith.mulf %195, %196 : vector<4x256xf32>
    %198 = arith.mulf %197, %86 : vector<4x256xf32>
    %cst_83 = arith.constant 2.200000e+00 : f32
    %199 = vector.broadcast %cst_83 : f32 to vector<4x256xf32>
    %200 = arith.subf %199, %0 : vector<4x256xf32>
    %cst_84 = arith.constant 2.500000e+00 : f32
    %201 = vector.broadcast %cst_84 : f32 to vector<4x256xf32>
    %202 = arith.mulf %200, %201 : vector<4x256xf32>
    %203 = arith.mulf %202, %94 : vector<4x256xf32>
    %204 = arith.addf %198, %203 : vector<4x256xf32>
    %cst_85 = arith.constant -2.200000e+00 : f32
    %205 = vector.broadcast %cst_85 : f32 to vector<4x256xf32>
    %206 = arith.subf %0, %205 : vector<4x256xf32>
    %cst_86 = arith.constant 1.250000e+00 : f32
    %207 = vector.broadcast %cst_86 : f32 to vector<4x256xf32>
    %208 = arith.mulf %206, %207 : vector<4x256xf32>
    %209 = arith.mulf %208, %105 : vector<4x256xf32>
    %cst_87 = arith.constant -1.000000e+00 : f32
    %210 = vector.broadcast %cst_87 : f32 to vector<4x256xf32>
    %211 = arith.subf %210, %0 : vector<4x256xf32>
    %cst_88 = arith.constant 1.250000e+00 : f32
    %212 = vector.broadcast %cst_88 : f32 to vector<4x256xf32>
    %213 = arith.mulf %211, %212 : vector<4x256xf32>
    %214 = arith.mulf %213, %116 : vector<4x256xf32>
    %215 = arith.addf %209, %214 : vector<4x256xf32>
    %cst_89 = arith.constant -1.800000e+00 : f32
    %216 = vector.broadcast %cst_89 : f32 to vector<4x256xf32>
    %217 = arith.subf %0, %216 : vector<4x256xf32>
    %cst_90 = arith.constant 1.250000e+00 : f32
    %218 = vector.broadcast %cst_90 : f32 to vector<4x256xf32>
    %219 = arith.mulf %217, %218 : vector<4x256xf32>
    %220 = arith.mulf %219, %116 : vector<4x256xf32>
    %cst_91 = arith.constant -6.000000e-01 : f32
    %221 = vector.broadcast %cst_91 : f32 to vector<4x256xf32>
    %222 = arith.subf %221, %0 : vector<4x256xf32>
    %cst_92 = arith.constant 1.250000e+00 : f32
    %223 = vector.broadcast %cst_92 : f32 to vector<4x256xf32>
    %224 = arith.mulf %222, %223 : vector<4x256xf32>
    %225 = arith.mulf %224, %127 : vector<4x256xf32>
    %226 = arith.addf %220, %225 : vector<4x256xf32>
    %cst_93 = arith.constant -1.400000e+00 : f32
    %227 = vector.broadcast %cst_93 : f32 to vector<4x256xf32>
    %228 = arith.subf %0, %227 : vector<4x256xf32>
    %cst_94 = arith.constant 1.250000e+00 : f32
    %229 = vector.broadcast %cst_94 : f32 to vector<4x256xf32>
    %230 = arith.mulf %228, %229 : vector<4x256xf32>
    %231 = arith.mulf %230, %127 : vector<4x256xf32>
    %cst_95 = arith.constant -2.000000e-01 : f32
    %232 = vector.broadcast %cst_95 : f32 to vector<4x256xf32>
    %233 = arith.subf %232, %0 : vector<4x256xf32>
    %cst_96 = arith.constant 1.250000e+00 : f32
    %234 = vector.broadcast %cst_96 : f32 to vector<4x256xf32>
    %235 = arith.mulf %233, %234 : vector<4x256xf32>
    %236 = arith.mulf %235, %138 : vector<4x256xf32>
    %237 = arith.addf %231, %236 : vector<4x256xf32>
    %cst_97 = arith.constant -1.000000e+00 : f32
    %238 = vector.broadcast %cst_97 : f32 to vector<4x256xf32>
    %239 = arith.subf %0, %238 : vector<4x256xf32>
    %cst_98 = arith.constant 1.250000e+00 : f32
    %240 = vector.broadcast %cst_98 : f32 to vector<4x256xf32>
    %241 = arith.mulf %239, %240 : vector<4x256xf32>
    %242 = arith.mulf %241, %138 : vector<4x256xf32>
    %cst_99 = arith.constant 2.000000e-01 : f32
    %243 = vector.broadcast %cst_99 : f32 to vector<4x256xf32>
    %244 = arith.subf %243, %0 : vector<4x256xf32>
    %cst_100 = arith.constant 1.250000e+00 : f32
    %245 = vector.broadcast %cst_100 : f32 to vector<4x256xf32>
    %246 = arith.mulf %244, %245 : vector<4x256xf32>
    %247 = arith.mulf %246, %149 : vector<4x256xf32>
    %248 = arith.addf %242, %247 : vector<4x256xf32>
    %cst_101 = arith.constant -6.000000e-01 : f32
    %249 = vector.broadcast %cst_101 : f32 to vector<4x256xf32>
    %250 = arith.subf %0, %249 : vector<4x256xf32>
    %cst_102 = arith.constant 1.250000e+00 : f32
    %251 = vector.broadcast %cst_102 : f32 to vector<4x256xf32>
    %252 = arith.mulf %250, %251 : vector<4x256xf32>
    %253 = arith.mulf %252, %149 : vector<4x256xf32>
    %cst_103 = arith.constant 6.000000e-01 : f32
    %254 = vector.broadcast %cst_103 : f32 to vector<4x256xf32>
    %255 = arith.subf %254, %0 : vector<4x256xf32>
    %cst_104 = arith.constant 1.250000e+00 : f32
    %256 = vector.broadcast %cst_104 : f32 to vector<4x256xf32>
    %257 = arith.mulf %255, %256 : vector<4x256xf32>
    %258 = arith.mulf %257, %160 : vector<4x256xf32>
    %259 = arith.addf %253, %258 : vector<4x256xf32>
    %cst_105 = arith.constant -2.000000e-01 : f32
    %260 = vector.broadcast %cst_105 : f32 to vector<4x256xf32>
    %261 = arith.subf %0, %260 : vector<4x256xf32>
    %cst_106 = arith.constant 1.250000e+00 : f32
    %262 = vector.broadcast %cst_106 : f32 to vector<4x256xf32>
    %263 = arith.mulf %261, %262 : vector<4x256xf32>
    %264 = arith.mulf %263, %160 : vector<4x256xf32>
    %cst_107 = arith.constant 1.000000e+00 : f32
    %265 = vector.broadcast %cst_107 : f32 to vector<4x256xf32>
    %266 = arith.subf %265, %0 : vector<4x256xf32>
    %cst_108 = arith.constant 1.250000e+00 : f32
    %267 = vector.broadcast %cst_108 : f32 to vector<4x256xf32>
    %268 = arith.mulf %266, %267 : vector<4x256xf32>
    %269 = arith.mulf %268, %171 : vector<4x256xf32>
    %270 = arith.addf %264, %269 : vector<4x256xf32>
    %cst_109 = arith.constant 2.000000e-01 : f32
    %271 = vector.broadcast %cst_109 : f32 to vector<4x256xf32>
    %272 = arith.subf %0, %271 : vector<4x256xf32>
    %cst_110 = arith.constant 1.250000e+00 : f32
    %273 = vector.broadcast %cst_110 : f32 to vector<4x256xf32>
    %274 = arith.mulf %272, %273 : vector<4x256xf32>
    %275 = arith.mulf %274, %171 : vector<4x256xf32>
    %cst_111 = arith.constant 1.400000e+00 : f32
    %276 = vector.broadcast %cst_111 : f32 to vector<4x256xf32>
    %277 = arith.subf %276, %0 : vector<4x256xf32>
    %cst_112 = arith.constant 1.250000e+00 : f32
    %278 = vector.broadcast %cst_112 : f32 to vector<4x256xf32>
    %279 = arith.mulf %277, %278 : vector<4x256xf32>
    %280 = arith.mulf %279, %182 : vector<4x256xf32>
    %281 = arith.addf %275, %280 : vector<4x256xf32>
    %cst_113 = arith.constant 6.000000e-01 : f32
    %282 = vector.broadcast %cst_113 : f32 to vector<4x256xf32>
    %283 = arith.subf %0, %282 : vector<4x256xf32>
    %cst_114 = arith.constant 1.250000e+00 : f32
    %284 = vector.broadcast %cst_114 : f32 to vector<4x256xf32>
    %285 = arith.mulf %283, %284 : vector<4x256xf32>
    %286 = arith.mulf %285, %182 : vector<4x256xf32>
    %cst_115 = arith.constant 1.800000e+00 : f32
    %287 = vector.broadcast %cst_115 : f32 to vector<4x256xf32>
    %288 = arith.subf %287, %0 : vector<4x256xf32>
    %cst_116 = arith.constant 1.250000e+00 : f32
    %289 = vector.broadcast %cst_116 : f32 to vector<4x256xf32>
    %290 = arith.mulf %288, %289 : vector<4x256xf32>
    %291 = arith.mulf %290, %193 : vector<4x256xf32>
    %292 = arith.addf %286, %291 : vector<4x256xf32>
    %cst_117 = arith.constant 1.000000e+00 : f32
    %293 = vector.broadcast %cst_117 : f32 to vector<4x256xf32>
    %294 = arith.subf %0, %293 : vector<4x256xf32>
    %cst_118 = arith.constant 1.250000e+00 : f32
    %295 = vector.broadcast %cst_118 : f32 to vector<4x256xf32>
    %296 = arith.mulf %294, %295 : vector<4x256xf32>
    %297 = arith.mulf %296, %193 : vector<4x256xf32>
    %cst_119 = arith.constant 2.200000e+00 : f32
    %298 = vector.broadcast %cst_119 : f32 to vector<4x256xf32>
    %299 = arith.subf %298, %0 : vector<4x256xf32>
    %cst_120 = arith.constant 1.250000e+00 : f32
    %300 = vector.broadcast %cst_120 : f32 to vector<4x256xf32>
    %301 = arith.mulf %299, %300 : vector<4x256xf32>
    %302 = arith.mulf %301, %204 : vector<4x256xf32>
    %303 = arith.addf %297, %302 : vector<4x256xf32>
    %cst_121 = arith.constant -2.200000e+00 : f32
    %304 = vector.broadcast %cst_121 : f32 to vector<4x256xf32>
    %305 = arith.subf %0, %304 : vector<4x256xf32>
    %cst_122 = arith.constant 0.833333313 : f32
    %306 = vector.broadcast %cst_122 : f32 to vector<4x256xf32>
    %307 = arith.mulf %305, %306 : vector<4x256xf32>
    %308 = arith.mulf %307, %215 : vector<4x256xf32>
    %cst_123 = arith.constant -6.000000e-01 : f32
    %309 = vector.broadcast %cst_123 : f32 to vector<4x256xf32>
    %310 = arith.subf %309, %0 : vector<4x256xf32>
    %cst_124 = arith.constant 0.833333313 : f32
    %311 = vector.broadcast %cst_124 : f32 to vector<4x256xf32>
    %312 = arith.mulf %310, %311 : vector<4x256xf32>
    %313 = arith.mulf %312, %226 : vector<4x256xf32>
    %314 = arith.addf %308, %313 : vector<4x256xf32>
    %cst_125 = arith.constant -1.800000e+00 : f32
    %315 = vector.broadcast %cst_125 : f32 to vector<4x256xf32>
    %316 = arith.subf %0, %315 : vector<4x256xf32>
    %cst_126 = arith.constant 0.833333313 : f32
    %317 = vector.broadcast %cst_126 : f32 to vector<4x256xf32>
    %318 = arith.mulf %316, %317 : vector<4x256xf32>
    %319 = arith.mulf %318, %226 : vector<4x256xf32>
    %cst_127 = arith.constant -2.000000e-01 : f32
    %320 = vector.broadcast %cst_127 : f32 to vector<4x256xf32>
    %321 = arith.subf %320, %0 : vector<4x256xf32>
    %cst_128 = arith.constant 0.833333313 : f32
    %322 = vector.broadcast %cst_128 : f32 to vector<4x256xf32>
    %323 = arith.mulf %321, %322 : vector<4x256xf32>
    %324 = arith.mulf %323, %237 : vector<4x256xf32>
    %325 = arith.addf %319, %324 : vector<4x256xf32>
    %cst_129 = arith.constant -1.400000e+00 : f32
    %326 = vector.broadcast %cst_129 : f32 to vector<4x256xf32>
    %327 = arith.subf %0, %326 : vector<4x256xf32>
    %cst_130 = arith.constant 0.833333313 : f32
    %328 = vector.broadcast %cst_130 : f32 to vector<4x256xf32>
    %329 = arith.mulf %327, %328 : vector<4x256xf32>
    %330 = arith.mulf %329, %237 : vector<4x256xf32>
    %cst_131 = arith.constant 2.000000e-01 : f32
    %331 = vector.broadcast %cst_131 : f32 to vector<4x256xf32>
    %332 = arith.subf %331, %0 : vector<4x256xf32>
    %cst_132 = arith.constant 0.833333313 : f32
    %333 = vector.broadcast %cst_132 : f32 to vector<4x256xf32>
    %334 = arith.mulf %332, %333 : vector<4x256xf32>
    %335 = arith.mulf %334, %248 : vector<4x256xf32>
    %336 = arith.addf %330, %335 : vector<4x256xf32>
    %cst_133 = arith.constant -1.000000e+00 : f32
    %337 = vector.broadcast %cst_133 : f32 to vector<4x256xf32>
    %338 = arith.subf %0, %337 : vector<4x256xf32>
    %cst_134 = arith.constant 0.833333313 : f32
    %339 = vector.broadcast %cst_134 : f32 to vector<4x256xf32>
    %340 = arith.mulf %338, %339 : vector<4x256xf32>
    %341 = arith.mulf %340, %248 : vector<4x256xf32>
    %cst_135 = arith.constant 6.000000e-01 : f32
    %342 = vector.broadcast %cst_135 : f32 to vector<4x256xf32>
    %343 = arith.subf %342, %0 : vector<4x256xf32>
    %cst_136 = arith.constant 0.833333313 : f32
    %344 = vector.broadcast %cst_136 : f32 to vector<4x256xf32>
    %345 = arith.mulf %343, %344 : vector<4x256xf32>
    %346 = arith.mulf %345, %259 : vector<4x256xf32>
    %347 = arith.addf %341, %346 : vector<4x256xf32>
    %cst_137 = arith.constant -6.000000e-01 : f32
    %348 = vector.broadcast %cst_137 : f32 to vector<4x256xf32>
    %349 = arith.subf %0, %348 : vector<4x256xf32>
    %cst_138 = arith.constant 0.833333313 : f32
    %350 = vector.broadcast %cst_138 : f32 to vector<4x256xf32>
    %351 = arith.mulf %349, %350 : vector<4x256xf32>
    %352 = arith.mulf %351, %259 : vector<4x256xf32>
    %cst_139 = arith.constant 1.000000e+00 : f32
    %353 = vector.broadcast %cst_139 : f32 to vector<4x256xf32>
    %354 = arith.subf %353, %0 : vector<4x256xf32>
    %cst_140 = arith.constant 0.833333313 : f32
    %355 = vector.broadcast %cst_140 : f32 to vector<4x256xf32>
    %356 = arith.mulf %354, %355 : vector<4x256xf32>
    %357 = arith.mulf %356, %270 : vector<4x256xf32>
    %358 = arith.addf %352, %357 : vector<4x256xf32>
    %cst_141 = arith.constant -2.000000e-01 : f32
    %359 = vector.broadcast %cst_141 : f32 to vector<4x256xf32>
    %360 = arith.subf %0, %359 : vector<4x256xf32>
    %cst_142 = arith.constant 0.833333313 : f32
    %361 = vector.broadcast %cst_142 : f32 to vector<4x256xf32>
    %362 = arith.mulf %360, %361 : vector<4x256xf32>
    %363 = arith.mulf %362, %270 : vector<4x256xf32>
    %cst_143 = arith.constant 1.400000e+00 : f32
    %364 = vector.broadcast %cst_143 : f32 to vector<4x256xf32>
    %365 = arith.subf %364, %0 : vector<4x256xf32>
    %cst_144 = arith.constant 0.833333313 : f32
    %366 = vector.broadcast %cst_144 : f32 to vector<4x256xf32>
    %367 = arith.mulf %365, %366 : vector<4x256xf32>
    %368 = arith.mulf %367, %281 : vector<4x256xf32>
    %369 = arith.addf %363, %368 : vector<4x256xf32>
    %cst_145 = arith.constant 2.000000e-01 : f32
    %370 = vector.broadcast %cst_145 : f32 to vector<4x256xf32>
    %371 = arith.subf %0, %370 : vector<4x256xf32>
    %cst_146 = arith.constant 0.833333313 : f32
    %372 = vector.broadcast %cst_146 : f32 to vector<4x256xf32>
    %373 = arith.mulf %371, %372 : vector<4x256xf32>
    %374 = arith.mulf %373, %281 : vector<4x256xf32>
    %cst_147 = arith.constant 1.800000e+00 : f32
    %375 = vector.broadcast %cst_147 : f32 to vector<4x256xf32>
    %376 = arith.subf %375, %0 : vector<4x256xf32>
    %cst_148 = arith.constant 0.833333313 : f32
    %377 = vector.broadcast %cst_148 : f32 to vector<4x256xf32>
    %378 = arith.mulf %376, %377 : vector<4x256xf32>
    %379 = arith.mulf %378, %292 : vector<4x256xf32>
    %380 = arith.addf %374, %379 : vector<4x256xf32>
    %cst_149 = arith.constant 6.000000e-01 : f32
    %381 = vector.broadcast %cst_149 : f32 to vector<4x256xf32>
    %382 = arith.subf %0, %381 : vector<4x256xf32>
    %cst_150 = arith.constant 0.833333313 : f32
    %383 = vector.broadcast %cst_150 : f32 to vector<4x256xf32>
    %384 = arith.mulf %382, %383 : vector<4x256xf32>
    %385 = arith.mulf %384, %292 : vector<4x256xf32>
    %cst_151 = arith.constant 2.200000e+00 : f32
    %386 = vector.broadcast %cst_151 : f32 to vector<4x256xf32>
    %387 = arith.subf %386, %0 : vector<4x256xf32>
    %cst_152 = arith.constant 0.833333313 : f32
    %388 = vector.broadcast %cst_152 : f32 to vector<4x256xf32>
    %389 = arith.mulf %387, %388 : vector<4x256xf32>
    %390 = arith.mulf %389, %303 : vector<4x256xf32>
    %391 = arith.addf %385, %390 : vector<4x256xf32>
    %c0_153 = arith.constant 0 : index
    %c0_154 = arith.constant 0 : index
    %392 = vector.load %arg2[%c0_153, %c0_154] : memref<8x36xf32, #tpu.memory_space<vmem>>, vector<8x36xf32>
    %393 = vector.extract_strided_slice %392 {offsets = [0, 0], sizes = [8, 1], strides = [1, 1]} : vector<8x36xf32> to vector<8x1xf32>
    %394 = vector.extract_strided_slice %6 {offsets = [0, 0], sizes = [1, 256], strides = [1, 1]} : vector<4x256xf32> to vector<1x256xf32>
    %395 = vector.broadcast %393 : vector<8x1xf32> to vector<8x256xf32>
    %396 = vector.broadcast %394 : vector<1x256xf32> to vector<8x256xf32>
    %397 = arith.mulf %395, %396 : vector<8x256xf32>
    %398 = vector.extract_strided_slice %392 {offsets = [0, 1], sizes = [8, 1], strides = [1, 1]} : vector<8x36xf32> to vector<8x1xf32>
    %399 = vector.extract_strided_slice %6 {offsets = [1, 0], sizes = [1, 256], strides = [1, 1]} : vector<4x256xf32> to vector<1x256xf32>
    %400 = vector.broadcast %398 : vector<8x1xf32> to vector<8x256xf32>
    %401 = vector.broadcast %399 : vector<1x256xf32> to vector<8x256xf32>
    %402 = arith.mulf %400, %401 : vector<8x256xf32>
    %403 = arith.addf %397, %402 : vector<8x256xf32>
    %404 = vector.extract_strided_slice %392 {offsets = [0, 2], sizes = [8, 1], strides = [1, 1]} : vector<8x36xf32> to vector<8x1xf32>
    %405 = vector.extract_strided_slice %6 {offsets = [2, 0], sizes = [1, 256], strides = [1, 1]} : vector<4x256xf32> to vector<1x256xf32>
    %406 = vector.broadcast %404 : vector<8x1xf32> to vector<8x256xf32>
    %407 = vector.broadcast %405 : vector<1x256xf32> to vector<8x256xf32>
    %408 = arith.mulf %406, %407 : vector<8x256xf32>
    %409 = arith.addf %403, %408 : vector<8x256xf32>
    %410 = vector.extract_strided_slice %392 {offsets = [0, 3], sizes = [8, 1], strides = [1, 1]} : vector<8x36xf32> to vector<8x1xf32>
    %411 = vector.extract_strided_slice %6 {offsets = [3, 0], sizes = [1, 256], strides = [1, 1]} : vector<4x256xf32> to vector<1x256xf32>
    %412 = vector.broadcast %410 : vector<8x1xf32> to vector<8x256xf32>
    %413 = vector.broadcast %411 : vector<1x256xf32> to vector<8x256xf32>
    %414 = arith.mulf %412, %413 : vector<8x256xf32>
    %415 = arith.addf %409, %414 : vector<8x256xf32>
    %416 = vector.extract_strided_slice %392 {offsets = [0, 4], sizes = [8, 1], strides = [1, 1]} : vector<8x36xf32> to vector<8x1xf32>
    %417 = vector.extract_strided_slice %314 {offsets = [0, 0], sizes = [1, 256], strides = [1, 1]} : vector<4x256xf32> to vector<1x256xf32>
    %418 = vector.broadcast %416 : vector<8x1xf32> to vector<8x256xf32>
    %419 = vector.broadcast %417 : vector<1x256xf32> to vector<8x256xf32>
    %420 = arith.mulf %418, %419 : vector<8x256xf32>
    %421 = arith.addf %415, %420 : vector<8x256xf32>
    %422 = vector.extract_strided_slice %392 {offsets = [0, 5], sizes = [8, 1], strides = [1, 1]} : vector<8x36xf32> to vector<8x1xf32>
    %423 = vector.extract_strided_slice %314 {offsets = [1, 0], sizes = [1, 256], strides = [1, 1]} : vector<4x256xf32> to vector<1x256xf32>
    %424 = vector.broadcast %422 : vector<8x1xf32> to vector<8x256xf32>
    %425 = vector.broadcast %423 : vector<1x256xf32> to vector<8x256xf32>
    %426 = arith.mulf %424, %425 : vector<8x256xf32>
    %427 = arith.addf %421, %426 : vector<8x256xf32>
    %428 = vector.extract_strided_slice %392 {offsets = [0, 6], sizes = [8, 1], strides = [1, 1]} : vector<8x36xf32> to vector<8x1xf32>
    %429 = vector.extract_strided_slice %314 {offsets = [2, 0], sizes = [1, 256], strides = [1, 1]} : vector<4x256xf32> to vector<1x256xf32>
    %430 = vector.broadcast %428 : vector<8x1xf32> to vector<8x256xf32>
    %431 = vector.broadcast %429 : vector<1x256xf32> to vector<8x256xf32>
    %432 = arith.mulf %430, %431 : vector<8x256xf32>
    %433 = arith.addf %427, %432 : vector<8x256xf32>
    %434 = vector.extract_strided_slice %392 {offsets = [0, 7], sizes = [8, 1], strides = [1, 1]} : vector<8x36xf32> to vector<8x1xf32>
    %435 = vector.extract_strided_slice %314 {offsets = [3, 0], sizes = [1, 256], strides = [1, 1]} : vector<4x256xf32> to vector<1x256xf32>
    %436 = vector.broadcast %434 : vector<8x1xf32> to vector<8x256xf32>
    %437 = vector.broadcast %435 : vector<1x256xf32> to vector<8x256xf32>
    %438 = arith.mulf %436, %437 : vector<8x256xf32>
    %439 = arith.addf %433, %438 : vector<8x256xf32>
    %440 = vector.extract_strided_slice %392 {offsets = [0, 8], sizes = [8, 1], strides = [1, 1]} : vector<8x36xf32> to vector<8x1xf32>
    %441 = vector.extract_strided_slice %325 {offsets = [0, 0], sizes = [1, 256], strides = [1, 1]} : vector<4x256xf32> to vector<1x256xf32>
    %442 = vector.broadcast %440 : vector<8x1xf32> to vector<8x256xf32>
    %443 = vector.broadcast %441 : vector<1x256xf32> to vector<8x256xf32>
    %444 = arith.mulf %442, %443 : vector<8x256xf32>
    %445 = arith.addf %439, %444 : vector<8x256xf32>
    %446 = vector.extract_strided_slice %392 {offsets = [0, 9], sizes = [8, 1], strides = [1, 1]} : vector<8x36xf32> to vector<8x1xf32>
    %447 = vector.extract_strided_slice %325 {offsets = [1, 0], sizes = [1, 256], strides = [1, 1]} : vector<4x256xf32> to vector<1x256xf32>
    %448 = vector.broadcast %446 : vector<8x1xf32> to vector<8x256xf32>
    %449 = vector.broadcast %447 : vector<1x256xf32> to vector<8x256xf32>
    %450 = arith.mulf %448, %449 : vector<8x256xf32>
    %451 = arith.addf %445, %450 : vector<8x256xf32>
    %452 = vector.extract_strided_slice %392 {offsets = [0, 10], sizes = [8, 1], strides = [1, 1]} : vector<8x36xf32> to vector<8x1xf32>
    %453 = vector.extract_strided_slice %325 {offsets = [2, 0], sizes = [1, 256], strides = [1, 1]} : vector<4x256xf32> to vector<1x256xf32>
    %454 = vector.broadcast %452 : vector<8x1xf32> to vector<8x256xf32>
    %455 = vector.broadcast %453 : vector<1x256xf32> to vector<8x256xf32>
    %456 = arith.mulf %454, %455 : vector<8x256xf32>
    %457 = arith.addf %451, %456 : vector<8x256xf32>
    %458 = vector.extract_strided_slice %392 {offsets = [0, 11], sizes = [8, 1], strides = [1, 1]} : vector<8x36xf32> to vector<8x1xf32>
    %459 = vector.extract_strided_slice %325 {offsets = [3, 0], sizes = [1, 256], strides = [1, 1]} : vector<4x256xf32> to vector<1x256xf32>
    %460 = vector.broadcast %458 : vector<8x1xf32> to vector<8x256xf32>
    %461 = vector.broadcast %459 : vector<1x256xf32> to vector<8x256xf32>
    %462 = arith.mulf %460, %461 : vector<8x256xf32>
    %463 = arith.addf %457, %462 : vector<8x256xf32>
    %464 = vector.extract_strided_slice %392 {offsets = [0, 12], sizes = [8, 1], strides = [1, 1]} : vector<8x36xf32> to vector<8x1xf32>
    %465 = vector.extract_strided_slice %336 {offsets = [0, 0], sizes = [1, 256], strides = [1, 1]} : vector<4x256xf32> to vector<1x256xf32>
    %466 = vector.broadcast %464 : vector<8x1xf32> to vector<8x256xf32>
    %467 = vector.broadcast %465 : vector<1x256xf32> to vector<8x256xf32>
    %468 = arith.mulf %466, %467 : vector<8x256xf32>
    %469 = arith.addf %463, %468 : vector<8x256xf32>
    %470 = vector.extract_strided_slice %392 {offsets = [0, 13], sizes = [8, 1], strides = [1, 1]} : vector<8x36xf32> to vector<8x1xf32>
    %471 = vector.extract_strided_slice %336 {offsets = [1, 0], sizes = [1, 256], strides = [1, 1]} : vector<4x256xf32> to vector<1x256xf32>
    %472 = vector.broadcast %470 : vector<8x1xf32> to vector<8x256xf32>
    %473 = vector.broadcast %471 : vector<1x256xf32> to vector<8x256xf32>
    %474 = arith.mulf %472, %473 : vector<8x256xf32>
    %475 = arith.addf %469, %474 : vector<8x256xf32>
    %476 = vector.extract_strided_slice %392 {offsets = [0, 14], sizes = [8, 1], strides = [1, 1]} : vector<8x36xf32> to vector<8x1xf32>
    %477 = vector.extract_strided_slice %336 {offsets = [2, 0], sizes = [1, 256], strides = [1, 1]} : vector<4x256xf32> to vector<1x256xf32>
    %478 = vector.broadcast %476 : vector<8x1xf32> to vector<8x256xf32>
    %479 = vector.broadcast %477 : vector<1x256xf32> to vector<8x256xf32>
    %480 = arith.mulf %478, %479 : vector<8x256xf32>
    %481 = arith.addf %475, %480 : vector<8x256xf32>
    %482 = vector.extract_strided_slice %392 {offsets = [0, 15], sizes = [8, 1], strides = [1, 1]} : vector<8x36xf32> to vector<8x1xf32>
    %483 = vector.extract_strided_slice %336 {offsets = [3, 0], sizes = [1, 256], strides = [1, 1]} : vector<4x256xf32> to vector<1x256xf32>
    %484 = vector.broadcast %482 : vector<8x1xf32> to vector<8x256xf32>
    %485 = vector.broadcast %483 : vector<1x256xf32> to vector<8x256xf32>
    %486 = arith.mulf %484, %485 : vector<8x256xf32>
    %487 = arith.addf %481, %486 : vector<8x256xf32>
    %488 = vector.extract_strided_slice %392 {offsets = [0, 16], sizes = [8, 1], strides = [1, 1]} : vector<8x36xf32> to vector<8x1xf32>
    %489 = vector.extract_strided_slice %347 {offsets = [0, 0], sizes = [1, 256], strides = [1, 1]} : vector<4x256xf32> to vector<1x256xf32>
    %490 = vector.broadcast %488 : vector<8x1xf32> to vector<8x256xf32>
    %491 = vector.broadcast %489 : vector<1x256xf32> to vector<8x256xf32>
    %492 = arith.mulf %490, %491 : vector<8x256xf32>
    %493 = arith.addf %487, %492 : vector<8x256xf32>
    %494 = vector.extract_strided_slice %392 {offsets = [0, 17], sizes = [8, 1], strides = [1, 1]} : vector<8x36xf32> to vector<8x1xf32>
    %495 = vector.extract_strided_slice %347 {offsets = [1, 0], sizes = [1, 256], strides = [1, 1]} : vector<4x256xf32> to vector<1x256xf32>
    %496 = vector.broadcast %494 : vector<8x1xf32> to vector<8x256xf32>
    %497 = vector.broadcast %495 : vector<1x256xf32> to vector<8x256xf32>
    %498 = arith.mulf %496, %497 : vector<8x256xf32>
    %499 = arith.addf %493, %498 : vector<8x256xf32>
    %500 = vector.extract_strided_slice %392 {offsets = [0, 18], sizes = [8, 1], strides = [1, 1]} : vector<8x36xf32> to vector<8x1xf32>
    %501 = vector.extract_strided_slice %347 {offsets = [2, 0], sizes = [1, 256], strides = [1, 1]} : vector<4x256xf32> to vector<1x256xf32>
    %502 = vector.broadcast %500 : vector<8x1xf32> to vector<8x256xf32>
    %503 = vector.broadcast %501 : vector<1x256xf32> to vector<8x256xf32>
    %504 = arith.mulf %502, %503 : vector<8x256xf32>
    %505 = arith.addf %499, %504 : vector<8x256xf32>
    %506 = vector.extract_strided_slice %392 {offsets = [0, 19], sizes = [8, 1], strides = [1, 1]} : vector<8x36xf32> to vector<8x1xf32>
    %507 = vector.extract_strided_slice %347 {offsets = [3, 0], sizes = [1, 256], strides = [1, 1]} : vector<4x256xf32> to vector<1x256xf32>
    %508 = vector.broadcast %506 : vector<8x1xf32> to vector<8x256xf32>
    %509 = vector.broadcast %507 : vector<1x256xf32> to vector<8x256xf32>
    %510 = arith.mulf %508, %509 : vector<8x256xf32>
    %511 = arith.addf %505, %510 : vector<8x256xf32>
    %512 = vector.extract_strided_slice %392 {offsets = [0, 20], sizes = [8, 1], strides = [1, 1]} : vector<8x36xf32> to vector<8x1xf32>
    %513 = vector.extract_strided_slice %358 {offsets = [0, 0], sizes = [1, 256], strides = [1, 1]} : vector<4x256xf32> to vector<1x256xf32>
    %514 = vector.broadcast %512 : vector<8x1xf32> to vector<8x256xf32>
    %515 = vector.broadcast %513 : vector<1x256xf32> to vector<8x256xf32>
    %516 = arith.mulf %514, %515 : vector<8x256xf32>
    %517 = arith.addf %511, %516 : vector<8x256xf32>
    %518 = vector.extract_strided_slice %392 {offsets = [0, 21], sizes = [8, 1], strides = [1, 1]} : vector<8x36xf32> to vector<8x1xf32>
    %519 = vector.extract_strided_slice %358 {offsets = [1, 0], sizes = [1, 256], strides = [1, 1]} : vector<4x256xf32> to vector<1x256xf32>
    %520 = vector.broadcast %518 : vector<8x1xf32> to vector<8x256xf32>
    %521 = vector.broadcast %519 : vector<1x256xf32> to vector<8x256xf32>
    %522 = arith.mulf %520, %521 : vector<8x256xf32>
    %523 = arith.addf %517, %522 : vector<8x256xf32>
    %524 = vector.extract_strided_slice %392 {offsets = [0, 22], sizes = [8, 1], strides = [1, 1]} : vector<8x36xf32> to vector<8x1xf32>
    %525 = vector.extract_strided_slice %358 {offsets = [2, 0], sizes = [1, 256], strides = [1, 1]} : vector<4x256xf32> to vector<1x256xf32>
    %526 = vector.broadcast %524 : vector<8x1xf32> to vector<8x256xf32>
    %527 = vector.broadcast %525 : vector<1x256xf32> to vector<8x256xf32>
    %528 = arith.mulf %526, %527 : vector<8x256xf32>
    %529 = arith.addf %523, %528 : vector<8x256xf32>
    %530 = vector.extract_strided_slice %392 {offsets = [0, 23], sizes = [8, 1], strides = [1, 1]} : vector<8x36xf32> to vector<8x1xf32>
    %531 = vector.extract_strided_slice %358 {offsets = [3, 0], sizes = [1, 256], strides = [1, 1]} : vector<4x256xf32> to vector<1x256xf32>
    %532 = vector.broadcast %530 : vector<8x1xf32> to vector<8x256xf32>
    %533 = vector.broadcast %531 : vector<1x256xf32> to vector<8x256xf32>
    %534 = arith.mulf %532, %533 : vector<8x256xf32>
    %535 = arith.addf %529, %534 : vector<8x256xf32>
    %536 = vector.extract_strided_slice %392 {offsets = [0, 24], sizes = [8, 1], strides = [1, 1]} : vector<8x36xf32> to vector<8x1xf32>
    %537 = vector.extract_strided_slice %369 {offsets = [0, 0], sizes = [1, 256], strides = [1, 1]} : vector<4x256xf32> to vector<1x256xf32>
    %538 = vector.broadcast %536 : vector<8x1xf32> to vector<8x256xf32>
    %539 = vector.broadcast %537 : vector<1x256xf32> to vector<8x256xf32>
    %540 = arith.mulf %538, %539 : vector<8x256xf32>
    %541 = arith.addf %535, %540 : vector<8x256xf32>
    %542 = vector.extract_strided_slice %392 {offsets = [0, 25], sizes = [8, 1], strides = [1, 1]} : vector<8x36xf32> to vector<8x1xf32>
    %543 = vector.extract_strided_slice %369 {offsets = [1, 0], sizes = [1, 256], strides = [1, 1]} : vector<4x256xf32> to vector<1x256xf32>
    %544 = vector.broadcast %542 : vector<8x1xf32> to vector<8x256xf32>
    %545 = vector.broadcast %543 : vector<1x256xf32> to vector<8x256xf32>
    %546 = arith.mulf %544, %545 : vector<8x256xf32>
    %547 = arith.addf %541, %546 : vector<8x256xf32>
    %548 = vector.extract_strided_slice %392 {offsets = [0, 26], sizes = [8, 1], strides = [1, 1]} : vector<8x36xf32> to vector<8x1xf32>
    %549 = vector.extract_strided_slice %369 {offsets = [2, 0], sizes = [1, 256], strides = [1, 1]} : vector<4x256xf32> to vector<1x256xf32>
    %550 = vector.broadcast %548 : vector<8x1xf32> to vector<8x256xf32>
    %551 = vector.broadcast %549 : vector<1x256xf32> to vector<8x256xf32>
    %552 = arith.mulf %550, %551 : vector<8x256xf32>
    %553 = arith.addf %547, %552 : vector<8x256xf32>
    %554 = vector.extract_strided_slice %392 {offsets = [0, 27], sizes = [8, 1], strides = [1, 1]} : vector<8x36xf32> to vector<8x1xf32>
    %555 = vector.extract_strided_slice %369 {offsets = [3, 0], sizes = [1, 256], strides = [1, 1]} : vector<4x256xf32> to vector<1x256xf32>
    %556 = vector.broadcast %554 : vector<8x1xf32> to vector<8x256xf32>
    %557 = vector.broadcast %555 : vector<1x256xf32> to vector<8x256xf32>
    %558 = arith.mulf %556, %557 : vector<8x256xf32>
    %559 = arith.addf %553, %558 : vector<8x256xf32>
    %560 = vector.extract_strided_slice %392 {offsets = [0, 28], sizes = [8, 1], strides = [1, 1]} : vector<8x36xf32> to vector<8x1xf32>
    %561 = vector.extract_strided_slice %380 {offsets = [0, 0], sizes = [1, 256], strides = [1, 1]} : vector<4x256xf32> to vector<1x256xf32>
    %562 = vector.broadcast %560 : vector<8x1xf32> to vector<8x256xf32>
    %563 = vector.broadcast %561 : vector<1x256xf32> to vector<8x256xf32>
    %564 = arith.mulf %562, %563 : vector<8x256xf32>
    %565 = arith.addf %559, %564 : vector<8x256xf32>
    %566 = vector.extract_strided_slice %392 {offsets = [0, 29], sizes = [8, 1], strides = [1, 1]} : vector<8x36xf32> to vector<8x1xf32>
    %567 = vector.extract_strided_slice %380 {offsets = [1, 0], sizes = [1, 256], strides = [1, 1]} : vector<4x256xf32> to vector<1x256xf32>
    %568 = vector.broadcast %566 : vector<8x1xf32> to vector<8x256xf32>
    %569 = vector.broadcast %567 : vector<1x256xf32> to vector<8x256xf32>
    %570 = arith.mulf %568, %569 : vector<8x256xf32>
    %571 = arith.addf %565, %570 : vector<8x256xf32>
    %572 = vector.extract_strided_slice %392 {offsets = [0, 30], sizes = [8, 1], strides = [1, 1]} : vector<8x36xf32> to vector<8x1xf32>
    %573 = vector.extract_strided_slice %380 {offsets = [2, 0], sizes = [1, 256], strides = [1, 1]} : vector<4x256xf32> to vector<1x256xf32>
    %574 = vector.broadcast %572 : vector<8x1xf32> to vector<8x256xf32>
    %575 = vector.broadcast %573 : vector<1x256xf32> to vector<8x256xf32>
    %576 = arith.mulf %574, %575 : vector<8x256xf32>
    %577 = arith.addf %571, %576 : vector<8x256xf32>
    %578 = vector.extract_strided_slice %392 {offsets = [0, 31], sizes = [8, 1], strides = [1, 1]} : vector<8x36xf32> to vector<8x1xf32>
    %579 = vector.extract_strided_slice %380 {offsets = [3, 0], sizes = [1, 256], strides = [1, 1]} : vector<4x256xf32> to vector<1x256xf32>
    %580 = vector.broadcast %578 : vector<8x1xf32> to vector<8x256xf32>
    %581 = vector.broadcast %579 : vector<1x256xf32> to vector<8x256xf32>
    %582 = arith.mulf %580, %581 : vector<8x256xf32>
    %583 = arith.addf %577, %582 : vector<8x256xf32>
    %584 = vector.extract_strided_slice %392 {offsets = [0, 32], sizes = [8, 1], strides = [1, 1]} : vector<8x36xf32> to vector<8x1xf32>
    %585 = vector.extract_strided_slice %391 {offsets = [0, 0], sizes = [1, 256], strides = [1, 1]} : vector<4x256xf32> to vector<1x256xf32>
    %586 = vector.broadcast %584 : vector<8x1xf32> to vector<8x256xf32>
    %587 = vector.broadcast %585 : vector<1x256xf32> to vector<8x256xf32>
    %588 = arith.mulf %586, %587 : vector<8x256xf32>
    %589 = arith.addf %583, %588 : vector<8x256xf32>
    %590 = vector.extract_strided_slice %392 {offsets = [0, 33], sizes = [8, 1], strides = [1, 1]} : vector<8x36xf32> to vector<8x1xf32>
    %591 = vector.extract_strided_slice %391 {offsets = [1, 0], sizes = [1, 256], strides = [1, 1]} : vector<4x256xf32> to vector<1x256xf32>
    %592 = vector.broadcast %590 : vector<8x1xf32> to vector<8x256xf32>
    %593 = vector.broadcast %591 : vector<1x256xf32> to vector<8x256xf32>
    %594 = arith.mulf %592, %593 : vector<8x256xf32>
    %595 = arith.addf %589, %594 : vector<8x256xf32>
    %596 = vector.extract_strided_slice %392 {offsets = [0, 34], sizes = [8, 1], strides = [1, 1]} : vector<8x36xf32> to vector<8x1xf32>
    %597 = vector.extract_strided_slice %391 {offsets = [2, 0], sizes = [1, 256], strides = [1, 1]} : vector<4x256xf32> to vector<1x256xf32>
    %598 = vector.broadcast %596 : vector<8x1xf32> to vector<8x256xf32>
    %599 = vector.broadcast %597 : vector<1x256xf32> to vector<8x256xf32>
    %600 = arith.mulf %598, %599 : vector<8x256xf32>
    %601 = arith.addf %595, %600 : vector<8x256xf32>
    %602 = vector.extract_strided_slice %392 {offsets = [0, 35], sizes = [8, 1], strides = [1, 1]} : vector<8x36xf32> to vector<8x1xf32>
    %603 = vector.extract_strided_slice %391 {offsets = [3, 0], sizes = [1, 256], strides = [1, 1]} : vector<4x256xf32> to vector<1x256xf32>
    %604 = vector.broadcast %602 : vector<8x1xf32> to vector<8x256xf32>
    %605 = vector.broadcast %603 : vector<1x256xf32> to vector<8x256xf32>
    %606 = arith.mulf %604, %605 : vector<8x256xf32>
    %607 = arith.addf %601, %606 : vector<8x256xf32>
    %c0_155 = arith.constant 0 : index
    %c0_156 = arith.constant 0 : index
    %608 = vector.load %arg3[%c0_155, %c0_156] : memref<8x256xf32, #tpu.memory_space<vmem>>, vector<8x256xf32>
    tpu.vector_store %arg3[%c0_155, %c0_156], %607 {strides = array<i32>} : memref<8x256xf32, #tpu.memory_space<vmem>>, vector<8x256xf32>,
    return
  }
  func.func @transform_0(%arg0: i32) -> (i32, i32) {
    %c0_i32 = arith.constant 0 : i32
    %c0_i32_0 = arith.constant 0 : i32
    return %c0_i32, %arg0 : i32, i32
  }
  func.func @transform_1(%arg0: i32) -> (i32, i32) {
    %c0_i32 = arith.constant 0 : i32
    %c0_i32_0 = arith.constant 0 : i32
    %c0_i32_1 = arith.constant 0 : i32
    return %c0_i32, %c0_i32_0 : i32, i32
  }
  func.func @transform_2(%arg0: i32) -> (i32, i32) {
    %c0_i32 = arith.constant 0 : i32
    %c0_i32_0 = arith.constant 0 : i32
    return %c0_i32, %arg0 : i32, i32
  }
}

module attributes {stable_mosaic.version = 11 : i64} {
  func.func @_kan_conv_kernel(%arg0: i32, %arg1: memref<4x256xf32, #tpu.memory_space<vmem>>, %arg2: memref<8x36xf32, #tpu.memory_space<vmem>>, %arg3: memref<8x256xf32, #tpu.memory_space<vmem>>) attributes {dimension_semantics = [#tpu.dimension_semantics<parallel>], iteration_bounds = array<i64: 2>, scalar_prefetch = 0 : i64, scratch_operands = 0 : i64, tpu.core_type = #tpu.core_type<tc>, window_params = [{transform_indices = @transform_0, window_bounds = array<i64: 4, 256>}, {pipeline_mode = #tpu.pipeline_mode<synchronous>, transform_indices = @transform_1, window_bounds = array<i64: 8, 36>}, {transform_indices = @transform_2, window_bounds = array<i64: 8, 256>}]} {
    %c0 = arith.constant 0 : index
    %c0_0 = arith.constant 0 : index
    %0 = vector.load %arg1[%c0, %c0_0] : memref<4x256xf32, #tpu.memory_space<vmem>>, vector<4x256xf32>
    %1 = arith.negf %0 : vector<4x256xf32>
    %2 = math.exp %1 : vector<4x256xf32>
    %cst = arith.constant 1.000000e+00 : f32
    %3 = vector.broadcast %cst : f32 to vector<4x256xf32>
    %4 = arith.addf %3, %2 : vector<4x256xf32>
    %5 = arith.divf %3, %4 : vector<4x256xf32>
    %6 = arith.mulf %0, %5 : vector<4x256xf32>
    %cst_1 = arith.constant -2.200000e+00 : f32
    %7 = vector.broadcast %cst_1 : f32 to vector<4x256xf32>
    %8 = arith.cmpf oge, %0, %7 : vector<4x256xf32>
    %cst_2 = arith.constant -1.800000e+00 : f32
    %9 = vector.broadcast %cst_2 : f32 to vector<4x256xf32>
    %10 = arith.cmpf olt, %0, %9 : vector<4x256xf32>
    %11 = arith.andi %8, %10 : vector<4x256xi1>
    %cst_3 = arith.constant 1.000000e+00 : f32
    %cst_4 = arith.constant 0.000000e+00 : f32
    %12 = vector.broadcast %cst_3 : f32 to vector<4x256xf32>
    %13 = vector.broadcast %cst_4 : f32 to vector<4x256xf32>
    %14 = arith.select %11, %12, %13 : vector<4x256xi1>, vector<4x256xf32>
    %cst_5 = arith.constant -1.800000e+00 : f32
    %15 = vector.broadcast %cst_5 : f32 to vector<4x256xf32>
    %16 = arith.cmpf oge, %0, %15 : vector<4x256xf32>
    %cst_6 = arith.constant -1.400000e+00 : f32
    %17 = vector.broadcast %cst_6 : f32 to vector<4x256xf32>
    %18 = arith.cmpf olt, %0, %17 : vector<4x256xf32>
    %19 = arith.andi %16, %18 : vector<4x256xi1>
    %cst_7 = arith.constant 1.000000e+00 : f32
    %cst_8 = arith.constant 0.000000e+00 : f32
    %20 = vector.broadcast %cst_7 : f32 to vector<4x256xf32>
    %21 = vector.broadcast %cst_8 : f32 to vector<4x256xf32>
    %22 = arith.select %19, %20, %21 : vector<4x256xi1>, vector<4x256xf32>
    %cst_9 = arith.constant -1.400000e+00 : f32
    %23 = vector.broadcast %cst_9 : f32 to vector<4x256xf32>
    %24 = arith.cmpf oge, %0, %23 : vector<4x256xf32>
    %cst_10 = arith.constant -1.000000e+00 : f32
    %25 = vector.broadcast %cst_10 : f32 to vector<4x256xf32>
    %26 = arith.cmpf olt, %0, %25 : vector<4x256xf32>
    %27 = arith.andi %24, %26 : vector<4x256xi1>
    %cst_11 = arith.constant 1.000000e+00 : f32
    %cst_12 = arith.constant 0.000000e+00 : f32
    %28 = vector.broadcast %cst_11 : f32 to vector<4x256xf32>
    %29 = vector.broadcast %cst_12 : f32 to vector<4x256xf32>
    %30 = arith.select %27, %28, %29 : vector<4x256xi1>, vector<4x256xf32>
    %cst_13 = arith.constant -1.000000e+00 : f32
    %31 = vector.broadcast %cst_13 : f32 to vector<4x256xf32>
    %32 = arith.cmpf oge, %0, %31 : vector<4x256xf32>
    %cst_14 = arith.constant -6.000000e-01 : f32
    %33 = vector.broadcast %cst_14 : f32 to vector<4x256xf32>
    %34 = arith.cmpf olt, %0, %33 : vector<4x256xf32>
    %35 = arith.andi %32, %34 : vector<4x256xi1>
    %cst_15 = arith.constant 1.000000e+00 : f32
    %cst_16 = arith.constant 0.000000e+00 : f32
    %36 = vector.broadcast %cst_15 : f32 to vector<4x256xf32>
    %37 = vector.broadcast %cst_16 : f32 to vector<4x256xf32>
    %38 = arith.select %35, %36, %37 : vector<4x256xi1>, vector<4x256xf32>
    %cst_17 = arith.constant -6.000000e-01 : f32
    %39 = vector.broadcast %cst_17 : f32 to vector<4x256xf32>
    %40 = arith.cmpf oge, %0, %39 : vector<4x256xf32>
    %cst_18 = arith.constant -2.000000e-01 : f32
    %41 = vector.broadcast %cst_18 : f32 to vector<4x256xf32>
    %42 = arith.cmpf olt, %0, %41 : vector<4x256xf32>
    %43 = arith.andi %40, %42 : vector<4x256xi1>
    %cst_19 = arith.constant 1.000000e+00 : f32
    %cst_20 = arith.constant 0.000000e+00 : f32
    %44 = vector.broadcast %cst_19 : f32 to vector<4x256xf32>
    %45 = vector.broadcast %cst_20 : f32 to vector<4x256xf32>
    %46 = arith.select %43, %44, %45 : vector<4x256xi1>, vector<4x256xf32>
    %cst_21 = arith.constant -2.000000e-01 : f32
    %47 = vector.broadcast %cst_21 : f32 to vector<4x256xf32>
    %48 = arith.cmpf oge, %0, %47 : vector<4x256xf32>
    %cst_22 = arith.constant 2.000000e-01 : f32
    %49 = vector.broadcast %cst_22 : f32 to vector<4x256xf32>
    %50 = arith.cmpf olt, %0, %49 : vector<4x256xf32>
    %51 = arith.andi %48, %50 : vector<4x256xi1>
    %cst_23 = arith.constant 1.000000e+00 : f32
    %cst_24 = arith.constant 0.000000e+00 : f32
    %52 = vector.broadcast %cst_23 : f32 to vector<4x256xf32>
    %53 = vector.broadcast %cst_24 : f32 to vector<4x256xf32>
    %54 = arith.select %51, %52, %53 : vector<4x256xi1>, vector<4x256xf32>
    %cst_25 = arith.constant 2.000000e-01 : f32
    %55 = vector.broadcast %cst_25 : f32 to vector<4x256xf32>
    %56 = arith.cmpf oge, %0, %55 : vector<4x256xf32>
    %cst_26 = arith.constant 6.000000e-01 : f32
    %57 = vector.broadcast %cst_26 : f32 to vector<4x256xf32>
    %58 = arith.cmpf olt, %0, %57 : vector<4x256xf32>
    %59 = arith.andi %56, %58 : vector<4x256xi1>
    %cst_27 = arith.constant 1.000000e+00 : f32
    %cst_28 = arith.constant 0.000000e+00 : f32
    %60 = vector.broadcast %cst_27 : f32 to vector<4x256xf32>
    %61 = vector.broadcast %cst_28 : f32 to vector<4x256xf32>
    %62 = arith.select %59, %60, %61 : vector<4x256xi1>, vector<4x256xf32>
    %cst_29 = arith.constant 6.000000e-01 : f32
    %63 = vector.broadcast %cst_29 : f32 to vector<4x256xf32>
    %64 = arith.cmpf oge, %0, %63 : vector<4x256xf32>
    %cst_30 = arith.constant 1.000000e+00 : f32
    %65 = vector.broadcast %cst_30 : f32 to vector<4x256xf32>
    %66 = arith.cmpf olt, %0, %65 : vector<4x256xf32>
    %67 = arith.andi %64, %66 : vector<4x256xi1>
    %cst_31 = arith.constant 1.000000e+00 : f32
    %cst_32 = arith.constant 0.000000e+00 : f32
    %68 = vector.broadcast %cst_31 : f32 to vector<4x256xf32>
    %69 = vector.broadcast %cst_32 : f32 to vector<4x256xf32>
    %70 = arith.select %67, %68, %69 : vector<4x256xi1>, vector<4x256xf32>
    %cst_33 = arith.constant 1.000000e+00 : f32
    %71 = vector.broadcast %cst_33 : f32 to vector<4x256xf32>
    %72 = arith.cmpf oge, %0, %71 : vector<4x256xf32>
    %cst_34 = arith.constant 1.400000e+00 : f32
    %73 = vector.broadcast %cst_34 : f32 to vector<4x256xf32>
    %74 = arith.cmpf olt, %0, %73 : vector<4x256xf32>
    %75 = arith.andi %72, %74 : vector<4x256xi1>
    %cst_35 = arith.constant 1.000000e+00 : f32
    %cst_36 = arith.constant 0.000000e+00 : f32
    %76 = vector.broadcast %cst_35 : f32 to vector<4x256xf32>
    %77 = vector.broadcast %cst_36 : f32 to vector<4x256xf32>
    %78 = arith.select %75, %76, %77 : vector<4x256xi1>, vector<4x256xf32>
    %cst_37 = arith.constant 1.400000e+00 : f32
    %79 = vector.broadcast %cst_37 : f32 to vector<4x256xf32>
    %80 = arith.cmpf oge, %0, %79 : vector<4x256xf32>
    %cst_38 = arith.constant 1.800000e+00 : f32
    %81 = vector.broadcast %cst_38 : f32 to vector<4x256xf32>
    %82 = arith.cmpf olt, %0, %81 : vector<4x256xf32>
    %83 = arith.andi %80, %82 : vector<4x256xi1>
    %cst_39 = arith.constant 1.000000e+00 : f32
    %cst_40 = arith.constant 0.000000e+00 : f32
    %84 = vector.broadcast %cst_39 : f32 to vector<4x256xf32>
    %85 = vector.broadcast %cst_40 : f32 to vector<4x256xf32>
    %86 = arith.select %83, %84, %85 : vector<4x256xi1>, vector<4x256xf32>
    %cst_41 = arith.constant 1.800000e+00 : f32
    %87 = vector.broadcast %cst_41 : f32 to vector<4x256xf32>
    %88 = arith.cmpf oge, %0, %87 : vector<4x256xf32>
    %cst_42 = arith.constant 2.200000e+00 : f32
    %89 = vector.broadcast %cst_42 : f32 to vector<4x256xf32>
    %90 = arith.cmpf olt, %0, %89 : vector<4x256xf32>
    %91 = arith.andi %88, %90 : vector<4x256xi1>
    %cst_43 = arith.constant 1.000000e+00 : f32
    %cst_44 = arith.constant 0.000000e+00 : f32
    %92 = vector.broadcast %cst_43 : f32 to vector<4x256xf32>
    %93 = vector.broadcast %cst_44 : f32 to vector<4x256xf32>
    %94 = arith.select %91, %92, %93 : vector<4x256xi1>, vector<4x256xf32>
    %cst_45 = arith.constant -2.200000e+00 : f32
    %95 = vector.broadcast %cst_45 : f32 to vector<4x256xf32>
    %96 = arith.subf %0, %95 : vector<4x256xf32>
    %cst_46 = arith.constant 2.500000e+00 : f32
    %97 = vector.broadcast %cst_46 : f32 to vector<4x256xf32>
    %98 = arith.mulf %96, %97 : vector<4x256xf32>
    %99 = arith.mulf %98, %14 : vector<4x256xf32>
    %cst_47 = arith.constant -1.400000e+00 : f32
    %100 = vector.broadcast %cst_47 : f32 to vector<4x256xf32>
    %101 = arith.subf %100, %0 : vector<4x256xf32>
    %cst_48 = arith.constant 2.500000e+00 : f32
    %102 = vector.broadcast %cst_48 : f32 to vector<4x256xf32>
    %103 = arith.mulf %101, %102 : vector<4x256xf32>
    %104 = arith.mulf %103, %22 : vector<4x256xf32>
    %105 = arith.addf %99, %104 : vector<4x256xf32>
    %cst_49 = arith.constant -1.800000e+00 : f32
    %106 = vector.broadcast %cst_49 : f32 to vector<4x256xf32>
    %107 = arith.subf %0, %106 : vector<4x256xf32>
    %cst_50 = arith.constant 2.500000e+00 : f32
    %108 = vector.broadcast %cst_50 : f32 to vector<4x256xf32>
    %109 = arith.mulf %107, %108 : vector<4x256xf32>
    %110 = arith.mulf %109, %22 : vector<4x256xf32>
    %cst_51 = arith.constant -1.000000e+00 : f32
    %111 = vector.broadcast %cst_51 : f32 to vector<4x256xf32>
    %112 = arith.subf %111, %0 : vector<4x256xf32>
    %cst_52 = arith.constant 2.500000e+00 : f32
    %113 = vector.broadcast %cst_52 : f32 to vector<4x256xf32>
    %114 = arith.mulf %112, %113 : vector<4x256xf32>
    %115 = arith.mulf %114, %30 : vector<4x256xf32>
    %116 = arith.addf %110, %115 : vector<4x256xf32>
    %cst_53 = arith.constant -1.400000e+00 : f32
    %117 = vector.broadcast %cst_53 : f32 to vector<4x256xf32>
    %118 = arith.subf %0, %117 : vector<4x256xf32>
    %cst_54 = arith.constant 2.500000e+00 : f32
    %119 = vector.broadcast %cst_54 : f32 to vector<4x256xf32>
    %120 = arith.mulf %118, %119 : vector<4x256xf32>
    %121 = arith.mulf %120, %30 : vector<4x256xf32>
    %cst_55 = arith.constant -6.000000e-01 : f32
    %122 = vector.broadcast %cst_55 : f32 to vector<4x256xf32>
    %123 = arith.subf %122, %0 : vector<4x256xf32>
    %cst_56 = arith.constant 2.500000e+00 : f32
    %124 = vector.broadcast %cst_56 : f32 to vector<4x256xf32>
    %125 = arith.mulf %123, %124 : vector<4x256xf32>
    %126 = arith.mulf %125, %38 : vector<4x256xf32>
    %127 = arith.addf %121, %126 : vector<4x256xf32>
    %cst_57 = arith.constant -1.000000e+00 : f32
    %128 = vector.broadcast %cst_57 : f32 to vector<4x256xf32>
    %129 = arith.subf %0, %128 : vector<4x256xf32>
    %cst_58 = arith.constant 2.500000e+00 : f32
    %130 = vector.broadcast %cst_58 : f32 to vector<4x256xf32>
    %131 = arith.mulf %129, %130 : vector<4x256xf32>
    %132 = arith.mulf %131, %38 : vector<4x256xf32>
    %cst_59 = arith.constant -2.000000e-01 : f32
    %133 = vector.broadcast %cst_59 : f32 to vector<4x256xf32>
    %134 = arith.subf %133, %0 : vector<4x256xf32>
    %cst_60 = arith.constant 2.500000e+00 : f32
    %135 = vector.broadcast %cst_60 : f32 to vector<4x256xf32>
    %136 = arith.mulf %134, %135 : vector<4x256xf32>
    %137 = arith.mulf %136, %46 : vector<4x256xf32>
    %138 = arith.addf %132, %137 : vector<4x256xf32>
    %cst_61 = arith.constant -6.000000e-01 : f32
    %139 = vector.broadcast %cst_61 : f32 to vector<4x256xf32>
    %140 = arith.subf %0, %139 : vector<4x256xf32>
    %cst_62 = arith.constant 2.500000e+00 : f32
    %141 = vector.broadcast %cst_62 : f32 to vector<4x256xf32>
    %142 = arith.mulf %140, %141 : vector<4x256xf32>
    %143 = arith.mulf %142, %46 : vector<4x256xf32>
    %cst_63 = arith.constant 2.000000e-01 : f32
    %144 = vector.broadcast %cst_63 : f32 to vector<4x256xf32>
    %145 = arith.subf %144, %0 : vector<4x256xf32>
    %cst_64 = arith.constant 2.500000e+00 : f32
    %146 = vector.broadcast %cst_64 : f32 to vector<4x256xf32>
    %147 = arith.mulf %145, %146 : vector<4x256xf32>
    %148 = arith.mulf %147, %54 : vector<4x256xf32>
    %149 = arith.addf %143, %148 : vector<4x256xf32>
    %cst_65 = arith.constant -2.000000e-01 : f32
    %150 = vector.broadcast %cst_65 : f32 to vector<4x256xf32>
    %151 = arith.subf %0, %150 : vector<4x256xf32>
    %cst_66 = arith.constant 2.500000e+00 : f32
    %152 = vector.broadcast %cst_66 : f32 to vector<4x256xf32>
    %153 = arith.mulf %151, %152 : vector<4x256xf32>
    %154 = arith.mulf %153, %54 : vector<4x256xf32>
    %cst_67 = arith.constant 6.000000e-01 : f32
    %155 = vector.broadcast %cst_67 : f32 to vector<4x256xf32>
    %156 = arith.subf %155, %0 : vector<4x256xf32>
    %cst_68 = arith.constant 2.500000e+00 : f32
    %157 = vector.broadcast %cst_68 : f32 to vector<4x256xf32>
    %158 = arith.mulf %156, %157 : vector<4x256xf32>
    %159 = arith.mulf %158, %62 : vector<4x256xf32>
    %160 = arith.addf %154, %159 : vector<4x256xf32>
    %cst_69 = arith.constant 2.000000e-01 : f32
    %161 = vector.broadcast %cst_69 : f32 to vector<4x256xf32>
    %162 = arith.subf %0, %161 : vector<4x256xf32>
    %cst_70 = arith.constant 2.500000e+00 : f32
    %163 = vector.broadcast %cst_70 : f32 to vector<4x256xf32>
    %164 = arith.mulf %162, %163 : vector<4x256xf32>
    %165 = arith.mulf %164, %62 : vector<4x256xf32>
    %cst_71 = arith.constant 1.000000e+00 : f32
    %166 = vector.broadcast %cst_71 : f32 to vector<4x256xf32>
    %167 = arith.subf %166, %0 : vector<4x256xf32>
    %cst_72 = arith.constant 2.500000e+00 : f32
    %168 = vector.broadcast %cst_72 : f32 to vector<4x256xf32>
    %169 = arith.mulf %167, %168 : vector<4x256xf32>
    %170 = arith.mulf %169, %70 : vector<4x256xf32>
    %171 = arith.addf %165, %170 : vector<4x256xf32>
    %cst_73 = arith.constant 6.000000e-01 : f32
    %172 = vector.broadcast %cst_73 : f32 to vector<4x256xf32>
    %173 = arith.subf %0, %172 : vector<4x256xf32>
    %cst_74 = arith.constant 2.500000e+00 : f32
    %174 = vector.broadcast %cst_74 : f32 to vector<4x256xf32>
    %175 = arith.mulf %173, %174 : vector<4x256xf32>
    %176 = arith.mulf %175, %70 : vector<4x256xf32>
    %cst_75 = arith.constant 1.400000e+00 : f32
    %177 = vector.broadcast %cst_75 : f32 to vector<4x256xf32>
    %178 = arith.subf %177, %0 : vector<4x256xf32>
    %cst_76 = arith.constant 2.500000e+00 : f32
    %179 = vector.broadcast %cst_76 : f32 to vector<4x256xf32>
    %180 = arith.mulf %178, %179 : vector<4x256xf32>
    %181 = arith.mulf %180, %78 : vector<4x256xf32>
    %182 = arith.addf %176, %181 : vector<4x256xf32>
    %cst_77 = arith.constant 1.000000e+00 : f32
    %183 = vector.broadcast %cst_77 : f32 to vector<4x256xf32>
    %184 = arith.subf %0, %183 : vector<4x256xf32>
    %cst_78 = arith.constant 2.500000e+00 : f32
    %185 = vector.broadcast %cst_78 : f32 to vector<4x256xf32>
    %186 = arith.mulf %184, %185 : vector<4x256xf32>
    %187 = arith.mulf %186, %78 : vector<4x256xf32>
    %cst_79 = arith.constant 1.800000e+00 : f32
    %188 = vector.broadcast %cst_79 : f32 to vector<4x256xf32>
    %189 = arith.subf %188, %0 : vector<4x256xf32>
    %cst_80 = arith.constant 2.500000e+00 : f32
    %190 = vector.broadcast %cst_80 : f32 to vector<4x256xf32>
    %191 = arith.mulf %189, %190 : vector<4x256xf32>
    %192 = arith.mulf %191, %86 : vector<4x256xf32>
    %193 = arith.addf %187, %192 : vector<4x256xf32>
    %cst_81 = arith.constant 1.400000e+00 : f32
    %194 = vector.broadcast %cst_81 : f32 to vector<4x256xf32>
    %195 = arith.subf %0, %194 : vector<4x256xf32>
    %cst_82 = arith.constant 2.500000e+00 : f32
    %196 = vector.broadcast %cst_82 : f32 to vector<4x256xf32>
    %197 = arith.mulf %195, %196 : vector<4x256xf32>
    %198 = arith.mulf %197, %86 : vector<4x256xf32>
    %cst_83 = arith.constant 2.200000e+00 : f32
    %199 = vector.broadcast %cst_83 : f32 to vector<4x256xf32>
    %200 = arith.subf %199, %0 : vector<4x256xf32>
    %cst_84 = arith.constant 2.500000e+00 : f32
    %201 = vector.broadcast %cst_84 : f32 to vector<4x256xf32>
    %202 = arith.mulf %200, %201 : vector<4x256xf32>
    %203 = arith.mulf %202, %94 : vector<4x256xf32>
    %204 = arith.addf %198, %203 : vector<4x256xf32>
    %cst_85 = arith.constant -2.200000e+00 : f32
    %205 = vector.broadcast %cst_85 : f32 to vector<4x256xf32>
    %206 = arith.subf %0, %205 : vector<4x256xf32>
    %cst_86 = arith.constant 1.250000e+00 : f32
    %207 = vector.broadcast %cst_86 : f32 to vector<4x256xf32>
    %208 = arith.mulf %206, %207 : vector<4x256xf32>
    %209 = arith.mulf %208, %105 : vector<4x256xf32>
    %cst_87 = arith.constant -1.000000e+00 : f32
    %210 = vector.broadcast %cst_87 : f32 to vector<4x256xf32>
    %211 = arith.subf %210, %0 : vector<4x256xf32>
    %cst_88 = arith.constant 1.250000e+00 : f32
    %212 = vector.broadcast %cst_88 : f32 to vector<4x256xf32>
    %213 = arith.mulf %211, %212 : vector<4x256xf32>
    %214 = arith.mulf %213, %116 : vector<4x256xf32>
    %215 = arith.addf %209, %214 : vector<4x256xf32>
    %cst_89 = arith.constant -1.800000e+00 : f32
    %216 = vector.broadcast %cst_89 : f32 to vector<4x256xf32>
    %217 = arith.subf %0, %216 : vector<4x256xf32>
    %cst_90 = arith.constant 1.250000e+00 : f32
    %218 = vector.broadcast %cst_90 : f32 to vector<4x256xf32>
    %219 = arith.mulf %217, %218 : vector<4x256xf32>
    %220 = arith.mulf %219, %116 : vector<4x256xf32>
    %cst_91 = arith.constant -6.000000e-01 : f32
    %221 = vector.broadcast %cst_91 : f32 to vector<4x256xf32>
    %222 = arith.subf %221, %0 : vector<4x256xf32>
    %cst_92 = arith.constant 1.250000e+00 : f32
    %223 = vector.broadcast %cst_92 : f32 to vector<4x256xf32>
    %224 = arith.mulf %222, %223 : vector<4x256xf32>
    %225 = arith.mulf %224, %127 : vector<4x256xf32>
    %226 = arith.addf %220, %225 : vector<4x256xf32>
    %cst_93 = arith.constant -1.400000e+00 : f32
    %227 = vector.broadcast %cst_93 : f32 to vector<4x256xf32>
    %228 = arith.subf %0, %227 : vector<4x256xf32>
    %cst_94 = arith.constant 1.250000e+00 : f32
    %229 = vector.broadcast %cst_94 : f32 to vector<4x256xf32>
    %230 = arith.mulf %228, %229 : vector<4x256xf32>
    %231 = arith.mulf %230, %127 : vector<4x256xf32>
    %cst_95 = arith.constant -2.000000e-01 : f32
    %232 = vector.broadcast %cst_95 : f32 to vector<4x256xf32>
    %233 = arith.subf %232, %0 : vector<4x256xf32>
    %cst_96 = arith.constant 1.250000e+00 : f32
    %234 = vector.broadcast %cst_96 : f32 to vector<4x256xf32>
    %235 = arith.mulf %233, %234 : vector<4x256xf32>
    %236 = arith.mulf %235, %138 : vector<4x256xf32>
    %237 = arith.addf %231, %236 : vector<4x256xf32>
    %cst_97 = arith.constant -1.000000e+00 : f32
    %238 = vector.broadcast %cst_97 : f32 to vector<4x256xf32>
    %239 = arith.subf %0, %238 : vector<4x256xf32>
    %cst_98 = arith.constant 1.250000e+00 : f32
    %240 = vector.broadcast %cst_98 : f32 to vector<4x256xf32>
    %241 = arith.mulf %239, %240 : vector<4x256xf32>
    %242 = arith.mulf %241, %138 : vector<4x256xf32>
    %cst_99 = arith.constant 2.000000e-01 : f32
    %243 = vector.broadcast %cst_99 : f32 to vector<4x256xf32>
    %244 = arith.subf %243, %0 : vector<4x256xf32>
    %cst_100 = arith.constant 1.250000e+00 : f32
    %245 = vector.broadcast %cst_100 : f32 to vector<4x256xf32>
    %246 = arith.mulf %244, %245 : vector<4x256xf32>
    %247 = arith.mulf %246, %149 : vector<4x256xf32>
    %248 = arith.addf %242, %247 : vector<4x256xf32>
    %cst_101 = arith.constant -6.000000e-01 : f32
    %249 = vector.broadcast %cst_101 : f32 to vector<4x256xf32>
    %250 = arith.subf %0, %249 : vector<4x256xf32>
    %cst_102 = arith.constant 1.250000e+00 : f32
    %251 = vector.broadcast %cst_102 : f32 to vector<4x256xf32>
    %252 = arith.mulf %250, %251 : vector<4x256xf32>
    %253 = arith.mulf %252, %149 : vector<4x256xf32>
    %cst_103 = arith.constant 6.000000e-01 : f32
    %254 = vector.broadcast %cst_103 : f32 to vector<4x256xf32>
    %255 = arith.subf %254, %0 : vector<4x256xf32>
    %cst_104 = arith.constant 1.250000e+00 : f32
    %256 = vector.broadcast %cst_104 : f32 to vector<4x256xf32>
    %257 = arith.mulf %255, %256 : vector<4x256xf32>
    %258 = arith.mulf %257, %160 : vector<4x256xf32>
    %259 = arith.addf %253, %258 : vector<4x256xf32>
    %cst_105 = arith.constant -2.000000e-01 : f32
    %260 = vector.broadcast %cst_105 : f32 to vector<4x256xf32>
    %261 = arith.subf %0, %260 : vector<4x256xf32>
    %cst_106 = arith.constant 1.250000e+00 : f32
    %262 = vector.broadcast %cst_106 : f32 to vector<4x256xf32>
    %263 = arith.mulf %261, %262 : vector<4x256xf32>
    %264 = arith.mulf %263, %160 : vector<4x256xf32>
    %cst_107 = arith.constant 1.000000e+00 : f32
    %265 = vector.broadcast %cst_107 : f32 to vector<4x256xf32>
    %266 = arith.subf %265, %0 : vector<4x256xf32>
    %cst_108 = arith.constant 1.250000e+00 : f32
    %267 = vector.broadcast %cst_108 : f32 to vector<4x256xf32>
    %268 = arith.mulf %266, %267 : vector<4x256xf32>
    %269 = arith.mulf %268, %171 : vector<4x256xf32>
    %270 = arith.addf %264, %269 : vector<4x256xf32>
    %cst_109 = arith.constant 2.000000e-01 : f32
    %271 = vector.broadcast %cst_109 : f32 to vector<4x256xf32>
    %272 = arith.subf %0, %271 : vector<4x256xf32>
    %cst_110 = arith.constant 1.250000e+00 : f32
    %273 = vector.broadcast %cst_110 : f32 to vector<4x256xf32>
    %274 = arith.mulf %272, %273 : vector<4x256xf32>
    %275 = arith.mulf %274, %171 : vector<4x256xf32>
    %cst_111 = arith.constant 1.400000e+00 : f32
    %276 = vector.broadcast %cst_111 : f32 to vector<4x256xf32>
    %277 = arith.subf %276, %0 : vector<4x256xf32>
    %cst_112 = arith.constant 1.250000e+00 : f32
    %278 = vector.broadcast %cst_112 : f32 to vector<4x256xf32>
    %279 = arith.mulf %277, %278 : vector<4x256xf32>
    %280 = arith.mulf %279, %182 : vector<4x256xf32>
    %281 = arith.addf %275, %280 : vector<4x256xf32>
    %cst_113 = arith.constant 6.000000e-01 : f32
    %282 = vector.broadcast %cst_113 : f32 to vector<4x256xf32>
    %283 = arith.subf %0, %282 : vector<4x256xf32>
    %cst_114 = arith.constant 1.250000e+00 : f32
    %284 = vector.broadcast %cst_114 : f32 to vector<4x256xf32>
    %285 = arith.mulf %283, %284 : vector<4x256xf32>
    %286 = arith.mulf %285, %182 : vector<4x256xf32>
    %cst_115 = arith.constant 1.800000e+00 : f32
    %287 = vector.broadcast %cst_115 : f32 to vector<4x256xf32>
    %288 = arith.subf %287, %0 : vector<4x256xf32>
    %cst_116 = arith.constant 1.250000e+00 : f32
    %289 = vector.broadcast %cst_116 : f32 to vector<4x256xf32>
    %290 = arith.mulf %288, %289 : vector<4x256xf32>
    %291 = arith.mulf %290, %193 : vector<4x256xf32>
    %292 = arith.addf %286, %291 : vector<4x256xf32>
    %cst_117 = arith.constant 1.000000e+00 : f32
    %293 = vector.broadcast %cst_117 : f32 to vector<4x256xf32>
    %294 = arith.subf %0, %293 : vector<4x256xf32>
    %cst_118 = arith.constant 1.250000e+00 : f32
    %295 = vector.broadcast %cst_118 : f32 to vector<4x256xf32>
    %296 = arith.mulf %294, %295 : vector<4x256xf32>
    %297 = arith.mulf %296, %193 : vector<4x256xf32>
    %cst_119 = arith.constant 2.200000e+00 : f32
    %298 = vector.broadcast %cst_119 : f32 to vector<4x256xf32>
    %299 = arith.subf %298, %0 : vector<4x256xf32>
    %cst_120 = arith.constant 1.250000e+00 : f32
    %300 = vector.broadcast %cst_120 : f32 to vector<4x256xf32>
    %301 = arith.mulf %299, %300 : vector<4x256xf32>
    %302 = arith.mulf %301, %204 : vector<4x256xf32>
    %303 = arith.addf %297, %302 : vector<4x256xf32>
    %cst_121 = arith.constant -2.200000e+00 : f32
    %304 = vector.broadcast %cst_121 : f32 to vector<4x256xf32>
    %305 = arith.subf %0, %304 : vector<4x256xf32>
    %cst_122 = arith.constant 0.833333313 : f32
    %306 = vector.broadcast %cst_122 : f32 to vector<4x256xf32>
    %307 = arith.mulf %305, %306 : vector<4x256xf32>
    %308 = arith.mulf %307, %215 : vector<4x256xf32>
    %cst_123 = arith.constant -6.000000e-01 : f32
    %309 = vector.broadcast %cst_123 : f32 to vector<4x256xf32>
    %310 = arith.subf %309, %0 : vector<4x256xf32>
    %cst_124 = arith.constant 0.833333313 : f32
    %311 = vector.broadcast %cst_124 : f32 to vector<4x256xf32>
    %312 = arith.mulf %310, %311 : vector<4x256xf32>
    %313 = arith.mulf %312, %226 : vector<4x256xf32>
    %314 = arith.addf %308, %313 : vector<4x256xf32>
    %cst_125 = arith.constant -1.800000e+00 : f32
    %315 = vector.broadcast %cst_125 : f32 to vector<4x256xf32>
    %316 = arith.subf %0, %315 : vector<4x256xf32>
    %cst_126 = arith.constant 0.833333313 : f32
    %317 = vector.broadcast %cst_126 : f32 to vector<4x256xf32>
    %318 = arith.mulf %316, %317 : vector<4x256xf32>
    %319 = arith.mulf %318, %226 : vector<4x256xf32>
    %cst_127 = arith.constant -2.000000e-01 : f32
    %320 = vector.broadcast %cst_127 : f32 to vector<4x256xf32>
    %321 = arith.subf %320, %0 : vector<4x256xf32>
    %cst_128 = arith.constant 0.833333313 : f32
    %322 = vector.broadcast %cst_128 : f32 to vector<4x256xf32>
    %323 = arith.mulf %321, %322 : vector<4x256xf32>
    %324 = arith.mulf %323, %237 : vector<4x256xf32>
    %325 = arith.addf %319, %324 : vector<4x256xf32>
    %cst_129 = arith.constant -1.400000e+00 : f32
    %326 = vector.broadcast %cst_129 : f32 to vector<4x256xf32>
    %327 = arith.subf %0, %326 : vector<4x256xf32>
    %cst_130 = arith.constant 0.833333313 : f32
    %328 = vector.broadcast %cst_130 : f32 to vector<4x256xf32>
    %329 = arith.mulf %327, %328 : vector<4x256xf32>
    %330 = arith.mulf %329, %237 : vector<4x256xf32>
    %cst_131 = arith.constant 2.000000e-01 : f32
    %331 = vector.broadcast %cst_131 : f32 to vector<4x256xf32>
    %332 = arith.subf %331, %0 : vector<4x256xf32>
    %cst_132 = arith.constant 0.833333313 : f32
    %333 = vector.broadcast %cst_132 : f32 to vector<4x256xf32>
    %334 = arith.mulf %332, %333 : vector<4x256xf32>
    %335 = arith.mulf %334, %248 : vector<4x256xf32>
    %336 = arith.addf %330, %335 : vector<4x256xf32>
    %cst_133 = arith.constant -1.000000e+00 : f32
    %337 = vector.broadcast %cst_133 : f32 to vector<4x256xf32>
    %338 = arith.subf %0, %337 : vector<4x256xf32>
    %cst_134 = arith.constant 0.833333313 : f32
    %339 = vector.broadcast %cst_134 : f32 to vector<4x256xf32>
    %340 = arith.mulf %338, %339 : vector<4x256xf32>
    %341 = arith.mulf %340, %248 : vector<4x256xf32>
    %cst_135 = arith.constant 6.000000e-01 : f32
    %342 = vector.broadcast %cst_135 : f32 to vector<4x256xf32>
    %343 = arith.subf %342, %0 : vector<4x256xf32>
    %cst_136 = arith.constant 0.833333313 : f32
    %344 = vector.broadcast %cst_136 : f32 to vector<4x256xf32>
    %345 = arith.mulf %343, %344 : vector<4x256xf32>
    %346 = arith.mulf %345, %259 : vector<4x256xf32>
    %347 = arith.addf %341, %346 : vector<4x256xf32>
    %cst_137 = arith.constant -6.000000e-01 : f32
    %348 = vector.broadcast %cst_137 : f32 to vector<4x256xf32>
    %349 = arith.subf %0, %348 : vector<4x256xf32>
    %cst_138 = arith.constant 0.833333313 : f32
    %350 = vector.broadcast %cst_138 : f32 to vector<4x256xf32>
    %351 = arith.mulf %349, %350 : vector<4x256xf32>
    %352 = arith.mulf %351, %259 : vector<4x256xf32>
    %cst_139 = arith.constant 1.000000e+00 : f32
    %353 = vector.broadcast %cst_139 : f32 to vector<4x256xf32>
    %354 = arith.subf %353, %0 : vector<4x256xf32>
    %cst_140 = arith.constant 0.833333313 : f32
    %355 = vector.broadcast %cst_140 : f32 to vector<4x256xf32>
    %356 = arith.mulf %354, %355 : vector<4x256xf32>
    %357 = arith.mulf %356, %270 : vector<4x256xf32>
    %358 = arith.addf %352, %357 : vector<4x256xf32>
    %cst_141 = arith.constant -2.000000e-01 : f32
    %359 = vector.broadcast %cst_141 : f32 to vector<4x256xf32>
    %360 = arith.subf %0, %359 : vector<4x256xf32>
    %cst_142 = arith.constant 0.833333313 : f32
    %361 = vector.broadcast %cst_142 : f32 to vector<4x256xf32>
    %362 = arith.mulf %360, %361 : vector<4x256xf32>
    %363 = arith.mulf %362, %270 : vector<4x256xf32>
    %cst_143 = arith.constant 1.400000e+00 : f32
    %364 = vector.broadcast %cst_143 : f32 to vector<4x256xf32>
    %365 = arith.subf %364, %0 : vector<4x256xf32>
    %cst_144 = arith.constant 0.833333313 : f32
    %366 = vector.broadcast %cst_144 : f32 to vector<4x256xf32>
    %367 = arith.mulf %365, %366 : vector<4x256xf32>
    %368 = arith.mulf %367, %281 : vector<4x256xf32>
    %369 = arith.addf %363, %368 : vector<4x256xf32>
    %cst_145 = arith.constant 2.000000e-01 : f32
    %370 = vector.broadcast %cst_145 : f32 to vector<4x256xf32>
    %371 = arith.subf %0, %370 : vector<4x256xf32>
    %cst_146 = arith.constant 0.833333313 : f32
    %372 = vector.broadcast %cst_146 : f32 to vector<4x256xf32>
    %373 = arith.mulf %371, %372 : vector<4x256xf32>
    %374 = arith.mulf %373, %281 : vector<4x256xf32>
    %cst_147 = arith.constant 1.800000e+00 : f32
    %375 = vector.broadcast %cst_147 : f32 to vector<4x256xf32>
    %376 = arith.subf %375, %0 : vector<4x256xf32>
    %cst_148 = arith.constant 0.833333313 : f32
    %377 = vector.broadcast %cst_148 : f32 to vector<4x256xf32>
    %378 = arith.mulf %376, %377 : vector<4x256xf32>
    %379 = arith.mulf %378, %292 : vector<4x256xf32>
    %380 = arith.addf %374, %379 : vector<4x256xf32>
    %cst_149 = arith.constant 6.000000e-01 : f32
    %381 = vector.broadcast %cst_149 : f32 to vector<4x256xf32>
    %382 = arith.subf %0, %381 : vector<4x256xf32>
    %cst_150 = arith.constant 0.833333313 : f32
    %383 = vector.broadcast %cst_150 : f32 to vector<4x256xf32>
    %384 = arith.mulf %382, %383 : vector<4x256xf32>
    %385 = arith.mulf %384, %292 : vector<4x256xf32>
    %cst_151 = arith.constant 2.200000e+00 : f32
    %386 = vector.broadcast %cst_151 : f32 to vector<4x256xf32>
    %387 = arith.subf %386, %0 : vector<4x256xf32>
    %cst_152 = arith.constant 0.833333313 : f32
    %388 = vector.broadcast %cst_152 : f32 to vector<4x256xf32>
    %389 = arith.mulf %387, %388 : vector<4x256xf32>
    %390 = arith.mulf %389, %303 : vector<4x256xf32>
    %391 = arith.addf %385, %390 : vector<4x256xf32>
    %c0_153 = arith.constant 0 : index
    %c0_154 = arith.constant 0 : index
    %392 = vector.load %arg2[%c0_153, %c0_154] : memref<8x36xf32, #tpu.memory_space<vmem>>, vector<8x36xf32>
    %393 = vector.extract_strided_slice %392 {offsets = [0, 0], sizes = [8, 1], strides = [1, 1]} : vector<8x36xf32> to vector<8x1xf32>
    %394 = vector.extract_strided_slice %6 {offsets = [0, 0], sizes = [1, 256], strides = [1, 1]} : vector<4x256xf32> to vector<1x256xf32>
    %395 = vector.broadcast %393 : vector<8x1xf32> to vector<8x256xf32>
    %396 = vector.broadcast %394 : vector<1x256xf32> to vector<8x256xf32>
    %397 = arith.mulf %395, %396 : vector<8x256xf32>
    %398 = vector.extract_strided_slice %392 {offsets = [0, 1], sizes = [8, 1], strides = [1, 1]} : vector<8x36xf32> to vector<8x1xf32>
    %399 = vector.extract_strided_slice %6 {offsets = [1, 0], sizes = [1, 256], strides = [1, 1]} : vector<4x256xf32> to vector<1x256xf32>
    %400 = vector.broadcast %398 : vector<8x1xf32> to vector<8x256xf32>
    %401 = vector.broadcast %399 : vector<1x256xf32> to vector<8x256xf32>
    %402 = arith.mulf %400, %401 : vector<8x256xf32>
    %403 = arith.addf %397, %402 : vector<8x256xf32>
    %404 = vector.extract_strided_slice %392 {offsets = [0, 2], sizes = [8, 1], strides = [1, 1]} : vector<8x36xf32> to vector<8x1xf32>
    %405 = vector.extract_strided_slice %6 {offsets = [2, 0], sizes = [1, 256], strides = [1, 1]} : vector<4x256xf32> to vector<1x256xf32>
    %406 = vector.broadcast %404 : vector<8x1xf32> to vector<8x256xf32>
    %407 = vector.broadcast %405 : vector<1x256xf32> to vector<8x256xf32>
    %408 = arith.mulf %406, %407 : vector<8x256xf32>
    %409 = arith.addf %403, %408 : vector<8x256xf32>
    %410 = vector.extract_strided_slice %392 {offsets = [0, 3], sizes = [8, 1], strides = [1, 1]} : vector<8x36xf32> to vector<8x1xf32>
    %411 = vector.extract_strided_slice %6 {offsets = [3, 0], sizes = [1, 256], strides = [1, 1]} : vector<4x256xf32> to vector<1x256xf32>
    %412 = vector.broadcast %410 : vector<8x1xf32> to vector<8x256xf32>
    %413 = vector.broadcast %411 : vector<1x256xf32> to vector<8x256xf32>
    %414 = arith.mulf %412, %413 : vector<8x256xf32>
    %415 = arith.addf %409, %414 : vector<8x256xf32>
    %416 = vector.extract_strided_slice %392 {offsets = [0, 4], sizes = [8, 1], strides = [1, 1]} : vector<8x36xf32> to vector<8x1xf32>
    %417 = vector.extract_strided_slice %314 {offsets = [0, 0], sizes = [1, 256], strides = [1, 1]} : vector<4x256xf32> to vector<1x256xf32>
    %418 = vector.broadcast %416 : vector<8x1xf32> to vector<8x256xf32>
    %419 = vector.broadcast %417 : vector<1x256xf32> to vector<8x256xf32>
    %420 = arith.mulf %418, %419 : vector<8x256xf32>
    %421 = arith.addf %415, %420 : vector<8x256xf32>
    %422 = vector.extract_strided_slice %392 {offsets = [0, 5], sizes = [8, 1], strides = [1, 1]} : vector<8x36xf32> to vector<8x1xf32>
    %423 = vector.extract_strided_slice %314 {offsets = [1, 0], sizes = [1, 256], strides = [1, 1]} : vector<4x256xf32> to vector<1x256xf32>
    %424 = vector.broadcast %422 : vector<8x1xf32> to vector<8x256xf32>
    %425 = vector.broadcast %423 : vector<1x256xf32> to vector<8x256xf32>
    %426 = arith.mulf %424, %425 : vector<8x256xf32>
    %427 = arith.addf %421, %426 : vector<8x256xf32>
    %428 = vector.extract_strided_slice %392 {offsets = [0, 6], sizes = [8, 1], strides = [1, 1]} : vector<8x36xf32> to vector<8x1xf32>
    %429 = vector.extract_strided_slice %314 {offsets = [2, 0], sizes = [1, 256], strides = [1, 1]} : vector<4x256xf32> to vector<1x256xf32>
    %430 = vector.broadcast %428 : vector<8x1xf32> to vector<8x256xf32>
    %431 = vector.broadcast %429 : vector<1x256xf32> to vector<8x256xf32>
    %432 = arith.mulf %430, %431 : vector<8x256xf32>
    %433 = arith.addf %427, %432 : vector<8x256xf32>
    %434 = vector.extract_strided_slice %392 {offsets = [0, 7], sizes = [8, 1], strides = [1, 1]} : vector<8x36xf32> to vector<8x1xf32>
    %435 = vector.extract_strided_slice %314 {offsets = [3, 0], sizes = [1, 256], strides = [1, 1]} : vector<4x256xf32> to vector<1x256xf32>
    %436 = vector.broadcast %434 : vector<8x1xf32> to vector<8x256xf32>
    %437 = vector.broadcast %435 : vector<1x256xf32> to vector<8x256xf32>
    %438 = arith.mulf %436, %437 : vector<8x256xf32>
    %439 = arith.addf %433, %438 : vector<8x256xf32>
    %440 = vector.extract_strided_slice %392 {offsets = [0, 8], sizes = [8, 1], strides = [1, 1]} : vector<8x36xf32> to vector<8x1xf32>
    %441 = vector.extract_strided_slice %325 {offsets = [0, 0], sizes = [1, 256], strides = [1, 1]} : vector<4x256xf32> to vector<1x256xf32>
    %442 = vector.broadcast %440 : vector<8x1xf32> to vector<8x256xf32>
    %443 = vector.broadcast %441 : vector<1x256xf32> to vector<8x256xf32>
    %444 = arith.mulf %442, %443 : vector<8x256xf32>
    %445 = arith.addf %439, %444 : vector<8x256xf32>
    %446 = vector.extract_strided_slice %392 {offsets = [0, 9], sizes = [8, 1], strides = [1, 1]} : vector<8x36xf32> to vector<8x1xf32>
    %447 = vector.extract_strided_slice %325 {offsets = [1, 0], sizes = [1, 256], strides = [1, 1]} : vector<4x256xf32> to vector<1x256xf32>
    %448 = vector.broadcast %446 : vector<8x1xf32> to vector<8x256xf32>
    %449 = vector.broadcast %447 : vector<1x256xf32> to vector<8x256xf32>
    %450 = arith.mulf %448, %449 : vector<8x256xf32>
    %451 = arith.addf %445, %450 : vector<8x256xf32>
    %452 = vector.extract_strided_slice %392 {offsets = [0, 10], sizes = [8, 1], strides = [1, 1]} : vector<8x36xf32> to vector<8x1xf32>
    %453 = vector.extract_strided_slice %325 {offsets = [2, 0], sizes = [1, 256], strides = [1, 1]} : vector<4x256xf32> to vector<1x256xf32>
    %454 = vector.broadcast %452 : vector<8x1xf32> to vector<8x256xf32>
    %455 = vector.broadcast %453 : vector<1x256xf32> to vector<8x256xf32>
    %456 = arith.mulf %454, %455 : vector<8x256xf32>
    %457 = arith.addf %451, %456 : vector<8x256xf32>
    %458 = vector.extract_strided_slice %392 {offsets = [0, 11], sizes = [8, 1], strides = [1, 1]} : vector<8x36xf32> to vector<8x1xf32>
    %459 = vector.extract_strided_slice %325 {offsets = [3, 0], sizes = [1, 256], strides = [1, 1]} : vector<4x256xf32> to vector<1x256xf32>
    %460 = vector.broadcast %458 : vector<8x1xf32> to vector<8x256xf32>
    %461 = vector.broadcast %459 : vector<1x256xf32> to vector<8x256xf32>
    %462 = arith.mulf %460, %461 : vector<8x256xf32>
    %463 = arith.addf %457, %462 : vector<8x256xf32>
    %464 = vector.extract_strided_slice %392 {offsets = [0, 12], sizes = [8, 1], strides = [1, 1]} : vector<8x36xf32> to vector<8x1xf32>
    %465 = vector.extract_strided_slice %336 {offsets = [0, 0], sizes = [1, 256], strides = [1, 1]} : vector<4x256xf32> to vector<1x256xf32>
    %466 = vector.broadcast %464 : vector<8x1xf32> to vector<8x256xf32>
    %467 = vector.broadcast %465 : vector<1x256xf32> to vector<8x256xf32>
    %468 = arith.mulf %466, %467 : vector<8x256xf32>
    %469 = arith.addf %463, %468 : vector<8x256xf32>
    %470 = vector.extract_strided_slice %392 {offsets = [0, 13], sizes = [8, 1], strides = [1, 1]} : vector<8x36xf32> to vector<8x1xf32>
    %471 = vector.extract_strided_slice %336 {offsets = [1, 0], sizes = [1, 256], strides = [1, 1]} : vector<4x256xf32> to vector<1x256xf32>
    %472 = vector.broadcast %470 : vector<8x1xf32> to vector<8x256xf32>
    %473 = vector.broadcast %471 : vector<1x256xf32> to vector<8x256xf32>
    %474 = arith.mulf %472, %473 : vector<8x256xf32>
    %475 = arith.addf %469, %474 : vector<8x256xf32>
    %476 = vector.extract_strided_slice %392 {offsets = [0, 14], sizes = [8, 1], strides = [1, 1]} : vector<8x36xf32> to vector<8x1xf32>
    %477 = vector.extract_strided_slice %336 {offsets = [2, 0], sizes = [1, 256], strides = [1, 1]} : vector<4x256xf32> to vector<1x256xf32>
    %478 = vector.broadcast %476 : vector<8x1xf32> to vector<8x256xf32>
    %479 = vector.broadcast %477 : vector<1x256xf32> to vector<8x256xf32>
    %480 = arith.mulf %478, %479 : vector<8x256xf32>
    %481 = arith.addf %475, %480 : vector<8x256xf32>
    %482 = vector.extract_strided_slice %392 {offsets = [0, 15], sizes = [8, 1], strides = [1, 1]} : vector<8x36xf32> to vector<8x1xf32>
    %483 = vector.extract_strided_slice %336 {offsets = [3, 0], sizes = [1, 256], strides = [1, 1]} : vector<4x256xf32> to vector<1x256xf32>
    %484 = vector.broadcast %482 : vector<8x1xf32> to vector<8x256xf32>
    %485 = vector.broadcast %483 : vector<1x256xf32> to vector<8x256xf32>
    %486 = arith.mulf %484, %485 : vector<8x256xf32>
    %487 = arith.addf %481, %486 : vector<8x256xf32>
    %488 = vector.extract_strided_slice %392 {offsets = [0, 16], sizes = [8, 1], strides = [1, 1]} : vector<8x36xf32> to vector<8x1xf32>
    %489 = vector.extract_strided_slice %347 {offsets = [0, 0], sizes = [1, 256], strides = [1, 1]} : vector<4x256xf32> to vector<1x256xf32>
    %490 = vector.broadcast %488 : vector<8x1xf32> to vector<8x256xf32>
    %491 = vector.broadcast %489 : vector<1x256xf32> to vector<8x256xf32>
    %492 = arith.mulf %490, %491 : vector<8x256xf32>
    %493 = arith.addf %487, %492 : vector<8x256xf32>
    %494 = vector.extract_strided_slice %392 {offsets = [0, 17], sizes = [8, 1], strides = [1, 1]} : vector<8x36xf32> to vector<8x1xf32>
    %495 = vector.extract_strided_slice %347 {offsets = [1, 0], sizes = [1, 256], strides = [1, 1]} : vector<4x256xf32> to vector<1x256xf32>
    %496 = vector.broadcast %494 : vector<8x1xf32> to vector<8x256xf32>
    %497 = vector.broadcast %495 : vector<1x256xf32> to vector<8x256xf32>
    %498 = arith.mulf %496, %497 : vector<8x256xf32>
    %499 = arith.addf %493, %498 : vector<8x256xf32>
    %500 = vector.extract_strided_slice %392 {offsets = [0, 18], sizes = [8, 1], strides = [1, 1]} : vector<8x36xf32> to vector<8x1xf32>
    %501 = vector.extract_strided_slice %347 {offsets = [2, 0], sizes = [1, 256], strides = [1, 1]} : vector<4x256xf32> to vector<1x256xf32>
    %502 = vector.broadcast %500 : vector<8x1xf32> to vector<8x256xf32>
    %503 = vector.broadcast %501 : vector<1x256xf32> to vector<8x256xf32>
    %504 = arith.mulf %502, %503 : vector<8x256xf32>
    %505 = arith.addf %499, %504 : vector<8x256xf32>
    %506 = vector.extract_strided_slice %392 {offsets = [0, 19], sizes = [8, 1], strides = [1, 1]} : vector<8x36xf32> to vector<8x1xf32>
    %507 = vector.extract_strided_slice %347 {offsets = [3, 0], sizes = [1, 256], strides = [1, 1]} : vector<4x256xf32> to vector<1x256xf32>
    %508 = vector.broadcast %506 : vector<8x1xf32> to vector<8x256xf32>
    %509 = vector.broadcast %507 : vector<1x256xf32> to vector<8x256xf32>
    %510 = arith.mulf %508, %509 : vector<8x256xf32>
    %511 = arith.addf %505, %510 : vector<8x256xf32>
    %512 = vector.extract_strided_slice %392 {offsets = [0, 20], sizes = [8, 1], strides = [1, 1]} : vector<8x36xf32> to vector<8x1xf32>
    %513 = vector.extract_strided_slice %358 {offsets = [0, 0], sizes = [1, 256], strides = [1, 1]} : vector<4x256xf32> to vector<1x256xf32>
    %514 = vector.broadcast %512 : vector<8x1xf32> to vector<8x256xf32>
    %515 = vector.broadcast %513 : vector<1x256xf32> to vector<8x256xf32>
    %516 = arith.mulf %514, %515 : vector<8x256xf32>
    %517 = arith.addf %511, %516 : vector<8x256xf32>
    %518 = vector.extract_strided_slice %392 {offsets = [0, 21], sizes = [8, 1], strides = [1, 1]} : vector<8x36xf32> to vector<8x1xf32>
    %519 = vector.extract_strided_slice %358 {offsets = [1, 0], sizes = [1, 256], strides = [1, 1]} : vector<4x256xf32> to vector<1x256xf32>
    %520 = vector.broadcast %518 : vector<8x1xf32> to vector<8x256xf32>
    %521 = vector.broadcast %519 : vector<1x256xf32> to vector<8x256xf32>
    %522 = arith.mulf %520, %521 : vector<8x256xf32>
    %523 = arith.addf %517, %522 : vector<8x256xf32>
    %524 = vector.extract_strided_slice %392 {offsets = [0, 22], sizes = [8, 1], strides = [1, 1]} : vector<8x36xf32> to vector<8x1xf32>
    %525 = vector.extract_strided_slice %358 {offsets = [2, 0], sizes = [1, 256], strides = [1, 1]} : vector<4x256xf32> to vector<1x256xf32>
    %526 = vector.broadcast %524 : vector<8x1xf32> to vector<8x256xf32>
    %527 = vector.broadcast %525 : vector<1x256xf32> to vector<8x256xf32>
    %528 = arith.mulf %526, %527 : vector<8x256xf32>
    %529 = arith.addf %523, %528 : vector<8x256xf32>
    %530 = vector.extract_strided_slice %392 {offsets = [0, 23], sizes = [8, 1], strides = [1, 1]} : vector<8x36xf32> to vector<8x1xf32>
    %531 = vector.extract_strided_slice %358 {offsets = [3, 0], sizes = [1, 256], strides = [1, 1]} : vector<4x256xf32> to vector<1x256xf32>
    %532 = vector.broadcast %530 : vector<8x1xf32> to vector<8x256xf32>
    %533 = vector.broadcast %531 : vector<1x256xf32> to vector<8x256xf32>
    %534 = arith.mulf %532, %533 : vector<8x256xf32>
    %535 = arith.addf %529, %534 : vector<8x256xf32>
    %536 = vector.extract_strided_slice %392 {offsets = [0, 24], sizes = [8, 1], strides = [1, 1]} : vector<8x36xf32> to vector<8x1xf32>
    %537 = vector.extract_strided_slice %369 {offsets = [0, 0], sizes = [1, 256], strides = [1, 1]} : vector<4x256xf32> to vector<1x256xf32>
    %538 = vector.broadcast %536 : vector<8x1xf32> to vector<8x256xf32>
    %539 = vector.broadcast %537 : vector<1x256xf32> to vector<8x256xf32>
    %540 = arith.mulf %538, %539 : vector<8x256xf32>
    %541 = arith.addf %535, %540 : vector<8x256xf32>
    %542 = vector.extract_strided_slice %392 {offsets = [0, 25], sizes = [8, 1], strides = [1, 1]} : vector<8x36xf32> to vector<8x1xf32>
    %543 = vector.extract_strided_slice %369 {offsets = [1, 0], sizes = [1, 256], strides = [1, 1]} : vector<4x256xf32> to vector<1x256xf32>
    %544 = vector.broadcast %542 : vector<8x1xf32> to vector<8x256xf32>
    %545 = vector.broadcast %543 : vector<1x256xf32> to vector<8x256xf32>
    %546 = arith.mulf %544, %545 : vector<8x256xf32>
    %547 = arith.addf %541, %546 : vector<8x256xf32>
    %548 = vector.extract_strided_slice %392 {offsets = [0, 26], sizes = [8, 1], strides = [1, 1]} : vector<8x36xf32> to vector<8x1xf32>
    %549 = vector.extract_strided_slice %369 {offsets = [2, 0], sizes = [1, 256], strides = [1, 1]} : vector<4x256xf32> to vector<1x256xf32>
    %550 = vector.broadcast %548 : vector<8x1xf32> to vector<8x256xf32>
    %551 = vector.broadcast %549 : vector<1x256xf32> to vector<8x256xf32>
    %552 = arith.mulf %550, %551 : vector<8x256xf32>
    %553 = arith.addf %547, %552 : vector<8x256xf32>
    %554 = vector.extract_strided_slice %392 {offsets = [0, 27], sizes = [8, 1], strides = [1, 1]} : vector<8x36xf32> to vector<8x1xf32>
    %555 = vector.extract_strided_slice %369 {offsets = [3, 0], sizes = [1, 256], strides = [1, 1]} : vector<4x256xf32> to vector<1x256xf32>
    %556 = vector.broadcast %554 : vector<8x1xf32> to vector<8x256xf32>
    %557 = vector.broadcast %555 : vector<1x256xf32> to vector<8x256xf32>
    %558 = arith.mulf %556, %557 : vector<8x256xf32>
    %559 = arith.addf %553, %558 : vector<8x256xf32>
    %560 = vector.extract_strided_slice %392 {offsets = [0, 28], sizes = [8, 1], strides = [1, 1]} : vector<8x36xf32> to vector<8x1xf32>
    %561 = vector.extract_strided_slice %380 {offsets = [0, 0], sizes = [1, 256], strides = [1, 1]} : vector<4x256xf32> to vector<1x256xf32>
    %562 = vector.broadcast %560 : vector<8x1xf32> to vector<8x256xf32>
    %563 = vector.broadcast %561 : vector<1x256xf32> to vector<8x256xf32>
    %564 = arith.mulf %562, %563 : vector<8x256xf32>
    %565 = arith.addf %559, %564 : vector<8x256xf32>
    %566 = vector.extract_strided_slice %392 {offsets = [0, 29], sizes = [8, 1], strides = [1, 1]} : vector<8x36xf32> to vector<8x1xf32>
    %567 = vector.extract_strided_slice %380 {offsets = [1, 0], sizes = [1, 256], strides = [1, 1]} : vector<4x256xf32> to vector<1x256xf32>
    %568 = vector.broadcast %566 : vector<8x1xf32> to vector<8x256xf32>
    %569 = vector.broadcast %567 : vector<1x256xf32> to vector<8x256xf32>
    %570 = arith.mulf %568, %569 : vector<8x256xf32>
    %571 = arith.addf %565, %570 : vector<8x256xf32>
    %572 = vector.extract_strided_slice %392 {offsets = [0, 30], sizes = [8, 1], strides = [1, 1]} : vector<8x36xf32> to vector<8x1xf32>
    %573 = vector.extract_strided_slice %380 {offsets = [2, 0], sizes = [1, 256], strides = [1, 1]} : vector<4x256xf32> to vector<1x256xf32>
    %574 = vector.broadcast %572 : vector<8x1xf32> to vector<8x256xf32>
    %575 = vector.broadcast %573 : vector<1x256xf32> to vector<8x256xf32>
    %576 = arith.mulf %574, %575 : vector<8x256xf32>
    %577 = arith.addf %571, %576 : vector<8x256xf32>
    %578 = vector.extract_strided_slice %392 {offsets = [0, 31], sizes = [8, 1], strides = [1, 1]} : vector<8x36xf32> to vector<8x1xf32>
    %579 = vector.extract_strided_slice %380 {offsets = [3, 0], sizes = [1, 256], strides = [1, 1]} : vector<4x256xf32> to vector<1x256xf32>
    %580 = vector.broadcast %578 : vector<8x1xf32> to vector<8x256xf32>
    %581 = vector.broadcast %579 : vector<1x256xf32> to vector<8x256xf32>
    %582 = arith.mulf %580, %581 : vector<8x256xf32>
    %583 = arith.addf %577, %582 : vector<8x256xf32>
    %584 = vector.extract_strided_slice %392 {offsets = [0, 32], sizes = [8, 1], strides = [1, 1]} : vector<8x36xf32> to vector<8x1xf32>
    %585 = vector.extract_strided_slice %391 {offsets = [0, 0], sizes = [1, 256], strides = [1, 1]} : vector<4x256xf32> to vector<1x256xf32>
    %586 = vector.broadcast %584 : vector<8x1xf32> to vector<8x256xf32>
    %587 = vector.broadcast %585 : vector<1x256xf32> to vector<8x256xf32>
    %588 = arith.mulf %586, %587 : vector<8x256xf32>
    %589 = arith.addf %583, %588 : vector<8x256xf32>
    %590 = vector.extract_strided_slice %392 {offsets = [0, 33], sizes = [8, 1], strides = [1, 1]} : vector<8x36xf32> to vector<8x1xf32>
    %591 = vector.extract_strided_slice %391 {offsets = [1, 0], sizes = [1, 256], strides = [1, 1]} : vector<4x256xf32> to vector<1x256xf32>
    %592 = vector.broadcast %590 : vector<8x1xf32> to vector<8x256xf32>
    %593 = vector.broadcast %591 : vector<1x256xf32> to vector<8x256xf32>
    %594 = arith.mulf %592, %593 : vector<8x256xf32>
    %595 = arith.addf %589, %594 : vector<8x256xf32>
    %596 = vector.extract_strided_slice %392 {offsets = [0, 34], sizes = [8, 1], strides = [1, 1]} : vector<8x36xf32> to vector<8x1xf32>
    %597 = vector.extract_strided_slice %391 {offsets = [2, 0], sizes = [1, 256], strides = [1, 1]} : vector<4x256xf32> to vector<1x256xf32>
    %598 = vector.broadcast %596 : vector<8x1xf32> to vector<8x256xf32>
    %599 = vector.broadcast %597 : vector<1x256xf32> to vector<8x256xf32>
    %600 = arith.mulf %598, %599 : vector<8x256xf32>
    %601 = arith.addf %595, %600 : vector<8x256xf32>
    %602 = vector.extract_strided_slice %392 {offsets = [0, 35], sizes = [8, 1], strides = [1, 1]} : vector<8x36xf32> to vector<8x1xf32>
    %603 = vector.extract_strided_slice %391 {offsets = [3, 0], sizes = [1, 256], strides = [1, 1]} : vector<4x256xf32> to vector<1x256xf32>
    %604 = vector.broadcast %602 : vector<8x1xf32> to vector<8x256xf32>
    %605 = vector.broadcast %603 : vector<1x256xf32> to vector<8x256xf32>
    %606 = arith.mulf %604, %605 : vector<8x256xf32>
    %607 = arith.addf %601, %606 : vector<8x256xf32>
    %c0_155 = arith.constant 0 : index
    %c0_156 = arith.constant 0 : index
    %608 = vector.load %arg3[%c0_155, %c0_156] : memref<8x256xf32, #tpu.memory_space<vmem>>, vector<8x256xf32>
    tpu.vector_store %arg3[%c0_155, %c0_156], %607 {strides = array<i32>} : memref<8x256xf32, #tpu.memory_space<vmem>>, vector<8x256xf32>,
    return
  }
  func.func @transform_0(%arg0: i32) -> (i32, i32) {
    %c0_i32 = arith.constant 0 : i32
    %c0_i32_0 = arith.constant 0 : i32
    return %c0_i32, %arg0 : i32, i32
  }
  func.func @transform_1(%arg0: i32) -> (i32, i32) {
    %c0_i32 = arith.constant 0 : i32
    %c0_i32_0 = arith.constant 0 : i32
    %c0_i32_1 = arith.constant 0 : i32
    return %c0_i32, %c0_i32_0 : i32, i32
  }
  func.func @transform_2(%arg0: i32) -> (i32, i32) {
    %c0_i32 = arith.constant 0 : i32
    %c0_i32_0 = arith.constant 0 : i32
    return %c0_i32, %arg0 : i32, i32
  }
}

module attributes {stable_mosaic.version = 11 : i64} {
  func.func @_kan_conv_kernel(%arg0: i32, %arg1: memref<4x256xf32, #tpu.memory_space<vmem>>, %arg2: memref<8x36xf32, #tpu.memory_space<vmem>>, %arg3: memref<8x256xf32, #tpu.memory_space<vmem>>) attributes {dimension_semantics = [#tpu.dimension_semantics<parallel>], iteration_bounds = array<i64: 8>, scalar_prefetch = 0 : i64, scratch_operands = 0 : i64, tpu.core_type = #tpu.core_type<tc>, window_params = [{transform_indices = @transform_0, window_bounds = array<i64: 4, 256>}, {pipeline_mode = #tpu.pipeline_mode<synchronous>, transform_indices = @transform_1, window_bounds = array<i64: 8, 36>}, {transform_indices = @transform_2, window_bounds = array<i64: 8, 256>}]} {
    %c0 = arith.constant 0 : index
    %c0_0 = arith.constant 0 : index
    %0 = vector.load %arg1[%c0, %c0_0] : memref<4x256xf32, #tpu.memory_space<vmem>>, vector<4x256xf32>
    %1 = arith.negf %0 : vector<4x256xf32>
    %2 = math.exp %1 : vector<4x256xf32>
    %cst = arith.constant 1.000000e+00 : f32
    %3 = vector.broadcast %cst : f32 to vector<4x256xf32>
    %4 = arith.addf %3, %2 : vector<4x256xf32>
    %5 = arith.divf %3, %4 : vector<4x256xf32>
    %6 = arith.mulf %0, %5 : vector<4x256xf32>
    %cst_1 = arith.constant -2.200000e+00 : f32
    %7 = vector.broadcast %cst_1 : f32 to vector<4x256xf32>
    %8 = arith.cmpf oge, %0, %7 : vector<4x256xf32>
    %cst_2 = arith.constant -1.800000e+00 : f32
    %9 = vector.broadcast %cst_2 : f32 to vector<4x256xf32>
    %10 = arith.cmpf olt, %0, %9 : vector<4x256xf32>
    %11 = arith.andi %8, %10 : vector<4x256xi1>
    %cst_3 = arith.constant 1.000000e+00 : f32
    %cst_4 = arith.constant 0.000000e+00 : f32
    %12 = vector.broadcast %cst_3 : f32 to vector<4x256xf32>
    %13 = vector.broadcast %cst_4 : f32 to vector<4x256xf32>
    %14 = arith.select %11, %12, %13 : vector<4x256xi1>, vector<4x256xf32>
    %cst_5 = arith.constant -1.800000e+00 : f32
    %15 = vector.broadcast %cst_5 : f32 to vector<4x256xf32>
    %16 = arith.cmpf oge, %0, %15 : vector<4x256xf32>
    %cst_6 = arith.constant -1.400000e+00 : f32
    %17 = vector.broadcast %cst_6 : f32 to vector<4x256xf32>
    %18 = arith.cmpf olt, %0, %17 : vector<4x256xf32>
    %19 = arith.andi %16, %18 : vector<4x256xi1>
    %cst_7 = arith.constant 1.000000e+00 : f32
    %cst_8 = arith.constant 0.000000e+00 : f32
    %20 = vector.broadcast %cst_7 : f32 to vector<4x256xf32>
    %21 = vector.broadcast %cst_8 : f32 to vector<4x256xf32>
    %22 = arith.select %19, %20, %21 : vector<4x256xi1>, vector<4x256xf32>
    %cst_9 = arith.constant -1.400000e+00 : f32
    %23 = vector.broadcast %cst_9 : f32 to vector<4x256xf32>
    %24 = arith.cmpf oge, %0, %23 : vector<4x256xf32>
    %cst_10 = arith.constant -1.000000e+00 : f32
    %25 = vector.broadcast %cst_10 : f32 to vector<4x256xf32>
    %26 = arith.cmpf olt, %0, %25 : vector<4x256xf32>
    %27 = arith.andi %24, %26 : vector<4x256xi1>
    %cst_11 = arith.constant 1.000000e+00 : f32
    %cst_12 = arith.constant 0.000000e+00 : f32
    %28 = vector.broadcast %cst_11 : f32 to vector<4x256xf32>
    %29 = vector.broadcast %cst_12 : f32 to vector<4x256xf32>
    %30 = arith.select %27, %28, %29 : vector<4x256xi1>, vector<4x256xf32>
    %cst_13 = arith.constant -1.000000e+00 : f32
    %31 = vector.broadcast %cst_13 : f32 to vector<4x256xf32>
    %32 = arith.cmpf oge, %0, %31 : vector<4x256xf32>
    %cst_14 = arith.constant -6.000000e-01 : f32
    %33 = vector.broadcast %cst_14 : f32 to vector<4x256xf32>
    %34 = arith.cmpf olt, %0, %33 : vector<4x256xf32>
    %35 = arith.andi %32, %34 : vector<4x256xi1>
    %cst_15 = arith.constant 1.000000e+00 : f32
    %cst_16 = arith.constant 0.000000e+00 : f32
    %36 = vector.broadcast %cst_15 : f32 to vector<4x256xf32>
    %37 = vector.broadcast %cst_16 : f32 to vector<4x256xf32>
    %38 = arith.select %35, %36, %37 : vector<4x256xi1>, vector<4x256xf32>
    %cst_17 = arith.constant -6.000000e-01 : f32
    %39 = vector.broadcast %cst_17 : f32 to vector<4x256xf32>
    %40 = arith.cmpf oge, %0, %39 : vector<4x256xf32>
    %cst_18 = arith.constant -2.000000e-01 : f32
    %41 = vector.broadcast %cst_18 : f32 to vector<4x256xf32>
    %42 = arith.cmpf olt, %0, %41 : vector<4x256xf32>
    %43 = arith.andi %40, %42 : vector<4x256xi1>
    %cst_19 = arith.constant 1.000000e+00 : f32
    %cst_20 = arith.constant 0.000000e+00 : f32
    %44 = vector.broadcast %cst_19 : f32 to vector<4x256xf32>
    %45 = vector.broadcast %cst_20 : f32 to vector<4x256xf32>
    %46 = arith.select %43, %44, %45 : vector<4x256xi1>, vector<4x256xf32>
    %cst_21 = arith.constant -2.000000e-01 : f32
    %47 = vector.broadcast %cst_21 : f32 to vector<4x256xf32>
    %48 = arith.cmpf oge, %0, %47 : vector<4x256xf32>
    %cst_22 = arith.constant 2.000000e-01 : f32
    %49 = vector.broadcast %cst_22 : f32 to vector<4x256xf32>
    %50 = arith.cmpf olt, %0, %49 : vector<4x256xf32>
    %51 = arith.andi %48, %50 : vector<4x256xi1>
    %cst_23 = arith.constant 1.000000e+00 : f32
    %cst_24 = arith.constant 0.000000e+00 : f32
    %52 = vector.broadcast %cst_23 : f32 to vector<4x256xf32>
    %53 = vector.broadcast %cst_24 : f32 to vector<4x256xf32>
    %54 = arith.select %51, %52, %53 : vector<4x256xi1>, vector<4x256xf32>
    %cst_25 = arith.constant 2.000000e-01 : f32
    %55 = vector.broadcast %cst_25 : f32 to vector<4x256xf32>
    %56 = arith.cmpf oge, %0, %55 : vector<4x256xf32>
    %cst_26 = arith.constant 6.000000e-01 : f32
    %57 = vector.broadcast %cst_26 : f32 to vector<4x256xf32>
    %58 = arith.cmpf olt, %0, %57 : vector<4x256xf32>
    %59 = arith.andi %56, %58 : vector<4x256xi1>
    %cst_27 = arith.constant 1.000000e+00 : f32
    %cst_28 = arith.constant 0.000000e+00 : f32
    %60 = vector.broadcast %cst_27 : f32 to vector<4x256xf32>
    %61 = vector.broadcast %cst_28 : f32 to vector<4x256xf32>
    %62 = arith.select %59, %60, %61 : vector<4x256xi1>, vector<4x256xf32>
    %cst_29 = arith.constant 6.000000e-01 : f32
    %63 = vector.broadcast %cst_29 : f32 to vector<4x256xf32>
    %64 = arith.cmpf oge, %0, %63 : vector<4x256xf32>
    %cst_30 = arith.constant 1.000000e+00 : f32
    %65 = vector.broadcast %cst_30 : f32 to vector<4x256xf32>
    %66 = arith.cmpf olt, %0, %65 : vector<4x256xf32>
    %67 = arith.andi %64, %66 : vector<4x256xi1>
    %cst_31 = arith.constant 1.000000e+00 : f32
    %cst_32 = arith.constant 0.000000e+00 : f32
    %68 = vector.broadcast %cst_31 : f32 to vector<4x256xf32>
    %69 = vector.broadcast %cst_32 : f32 to vector<4x256xf32>
    %70 = arith.select %67, %68, %69 : vector<4x256xi1>, vector<4x256xf32>
    %cst_33 = arith.constant 1.000000e+00 : f32
    %71 = vector.broadcast %cst_33 : f32 to vector<4x256xf32>
    %72 = arith.cmpf oge, %0, %71 : vector<4x256xf32>
    %cst_34 = arith.constant 1.400000e+00 : f32
    %73 = vector.broadcast %cst_34 : f32 to vector<4x256xf32>
    %74 = arith.cmpf olt, %0, %73 : vector<4x256xf32>
    %75 = arith.andi %72, %74 : vector<4x256xi1>
    %cst_35 = arith.constant 1.000000e+00 : f32
    %cst_36 = arith.constant 0.000000e+00 : f32
    %76 = vector.broadcast %cst_35 : f32 to vector<4x256xf32>
    %77 = vector.broadcast %cst_36 : f32 to vector<4x256xf32>
    %78 = arith.select %75, %76, %77 : vector<4x256xi1>, vector<4x256xf32>
    %cst_37 = arith.constant 1.400000e+00 : f32
    %79 = vector.broadcast %cst_37 : f32 to vector<4x256xf32>
    %80 = arith.cmpf oge, %0, %79 : vector<4x256xf32>
    %cst_38 = arith.constant 1.800000e+00 : f32
    %81 = vector.broadcast %cst_38 : f32 to vector<4x256xf32>
    %82 = arith.cmpf olt, %0, %81 : vector<4x256xf32>
    %83 = arith.andi %80, %82 : vector<4x256xi1>
    %cst_39 = arith.constant 1.000000e+00 : f32
    %cst_40 = arith.constant 0.000000e+00 : f32
    %84 = vector.broadcast %cst_39 : f32 to vector<4x256xf32>
    %85 = vector.broadcast %cst_40 : f32 to vector<4x256xf32>
    %86 = arith.select %83, %84, %85 : vector<4x256xi1>, vector<4x256xf32>
    %cst_41 = arith.constant 1.800000e+00 : f32
    %87 = vector.broadcast %cst_41 : f32 to vector<4x256xf32>
    %88 = arith.cmpf oge, %0, %87 : vector<4x256xf32>
    %cst_42 = arith.constant 2.200000e+00 : f32
    %89 = vector.broadcast %cst_42 : f32 to vector<4x256xf32>
    %90 = arith.cmpf olt, %0, %89 : vector<4x256xf32>
    %91 = arith.andi %88, %90 : vector<4x256xi1>
    %cst_43 = arith.constant 1.000000e+00 : f32
    %cst_44 = arith.constant 0.000000e+00 : f32
    %92 = vector.broadcast %cst_43 : f32 to vector<4x256xf32>
    %93 = vector.broadcast %cst_44 : f32 to vector<4x256xf32>
    %94 = arith.select %91, %92, %93 : vector<4x256xi1>, vector<4x256xf32>
    %cst_45 = arith.constant -2.200000e+00 : f32
    %95 = vector.broadcast %cst_45 : f32 to vector<4x256xf32>
    %96 = arith.subf %0, %95 : vector<4x256xf32>
    %cst_46 = arith.constant 2.500000e+00 : f32
    %97 = vector.broadcast %cst_46 : f32 to vector<4x256xf32>
    %98 = arith.mulf %96, %97 : vector<4x256xf32>
    %99 = arith.mulf %98, %14 : vector<4x256xf32>
    %cst_47 = arith.constant -1.400000e+00 : f32
    %100 = vector.broadcast %cst_47 : f32 to vector<4x256xf32>
    %101 = arith.subf %100, %0 : vector<4x256xf32>
    %cst_48 = arith.constant 2.500000e+00 : f32
    %102 = vector.broadcast %cst_48 : f32 to vector<4x256xf32>
    %103 = arith.mulf %101, %102 : vector<4x256xf32>
    %104 = arith.mulf %103, %22 : vector<4x256xf32>
    %105 = arith.addf %99, %104 : vector<4x256xf32>
    %cst_49 = arith.constant -1.800000e+00 : f32
    %106 = vector.broadcast %cst_49 : f32 to vector<4x256xf32>
    %107 = arith.subf %0, %106 : vector<4x256xf32>
    %cst_50 = arith.constant 2.500000e+00 : f32
    %108 = vector.broadcast %cst_50 : f32 to vector<4x256xf32>
    %109 = arith.mulf %107, %108 : vector<4x256xf32>
    %110 = arith.mulf %109, %22 : vector<4x256xf32>
    %cst_51 = arith.constant -1.000000e+00 : f32
    %111 = vector.broadcast %cst_51 : f32 to vector<4x256xf32>
    %112 = arith.subf %111, %0 : vector<4x256xf32>
    %cst_52 = arith.constant 2.500000e+00 : f32
    %113 = vector.broadcast %cst_52 : f32 to vector<4x256xf32>
    %114 = arith.mulf %112, %113 : vector<4x256xf32>
    %115 = arith.mulf %114, %30 : vector<4x256xf32>
    %116 = arith.addf %110, %115 : vector<4x256xf32>
    %cst_53 = arith.constant -1.400000e+00 : f32
    %117 = vector.broadcast %cst_53 : f32 to vector<4x256xf32>
    %118 = arith.subf %0, %117 : vector<4x256xf32>
    %cst_54 = arith.constant 2.500000e+00 : f32
    %119 = vector.broadcast %cst_54 : f32 to vector<4x256xf32>
    %120 = arith.mulf %118, %119 : vector<4x256xf32>
    %121 = arith.mulf %120, %30 : vector<4x256xf32>
    %cst_55 = arith.constant -6.000000e-01 : f32
    %122 = vector.broadcast %cst_55 : f32 to vector<4x256xf32>
    %123 = arith.subf %122, %0 : vector<4x256xf32>
    %cst_56 = arith.constant 2.500000e+00 : f32
    %124 = vector.broadcast %cst_56 : f32 to vector<4x256xf32>
    %125 = arith.mulf %123, %124 : vector<4x256xf32>
    %126 = arith.mulf %125, %38 : vector<4x256xf32>
    %127 = arith.addf %121, %126 : vector<4x256xf32>
    %cst_57 = arith.constant -1.000000e+00 : f32
    %128 = vector.broadcast %cst_57 : f32 to vector<4x256xf32>
    %129 = arith.subf %0, %128 : vector<4x256xf32>
    %cst_58 = arith.constant 2.500000e+00 : f32
    %130 = vector.broadcast %cst_58 : f32 to vector<4x256xf32>
    %131 = arith.mulf %129, %130 : vector<4x256xf32>
    %132 = arith.mulf %131, %38 : vector<4x256xf32>
    %cst_59 = arith.constant -2.000000e-01 : f32
    %133 = vector.broadcast %cst_59 : f32 to vector<4x256xf32>
    %134 = arith.subf %133, %0 : vector<4x256xf32>
    %cst_60 = arith.constant 2.500000e+00 : f32
    %135 = vector.broadcast %cst_60 : f32 to vector<4x256xf32>
    %136 = arith.mulf %134, %135 : vector<4x256xf32>
    %137 = arith.mulf %136, %46 : vector<4x256xf32>
    %138 = arith.addf %132, %137 : vector<4x256xf32>
    %cst_61 = arith.constant -6.000000e-01 : f32
    %139 = vector.broadcast %cst_61 : f32 to vector<4x256xf32>
    %140 = arith.subf %0, %139 : vector<4x256xf32>
    %cst_62 = arith.constant 2.500000e+00 : f32
    %141 = vector.broadcast %cst_62 : f32 to vector<4x256xf32>
    %142 = arith.mulf %140, %141 : vector<4x256xf32>
    %143 = arith.mulf %142, %46 : vector<4x256xf32>
    %cst_63 = arith.constant 2.000000e-01 : f32
    %144 = vector.broadcast %cst_63 : f32 to vector<4x256xf32>
    %145 = arith.subf %144, %0 : vector<4x256xf32>
    %cst_64 = arith.constant 2.500000e+00 : f32
    %146 = vector.broadcast %cst_64 : f32 to vector<4x256xf32>
    %147 = arith.mulf %145, %146 : vector<4x256xf32>
    %148 = arith.mulf %147, %54 : vector<4x256xf32>
    %149 = arith.addf %143, %148 : vector<4x256xf32>
    %cst_65 = arith.constant -2.000000e-01 : f32
    %150 = vector.broadcast %cst_65 : f32 to vector<4x256xf32>
    %151 = arith.subf %0, %150 : vector<4x256xf32>
    %cst_66 = arith.constant 2.500000e+00 : f32
    %152 = vector.broadcast %cst_66 : f32 to vector<4x256xf32>
    %153 = arith.mulf %151, %152 : vector<4x256xf32>
    %154 = arith.mulf %153, %54 : vector<4x256xf32>
    %cst_67 = arith.constant 6.000000e-01 : f32
    %155 = vector.broadcast %cst_67 : f32 to vector<4x256xf32>
    %156 = arith.subf %155, %0 : vector<4x256xf32>
    %cst_68 = arith.constant 2.500000e+00 : f32
    %157 = vector.broadcast %cst_68 : f32 to vector<4x256xf32>
    %158 = arith.mulf %156, %157 : vector<4x256xf32>
    %159 = arith.mulf %158, %62 : vector<4x256xf32>
    %160 = arith.addf %154, %159 : vector<4x256xf32>
    %cst_69 = arith.constant 2.000000e-01 : f32
    %161 = vector.broadcast %cst_69 : f32 to vector<4x256xf32>
    %162 = arith.subf %0, %161 : vector<4x256xf32>
    %cst_70 = arith.constant 2.500000e+00 : f32
    %163 = vector.broadcast %cst_70 : f32 to vector<4x256xf32>
    %164 = arith.mulf %162, %163 : vector<4x256xf32>
    %165 = arith.mulf %164, %62 : vector<4x256xf32>
    %cst_71 = arith.constant 1.000000e+00 : f32
    %166 = vector.broadcast %cst_71 : f32 to vector<4x256xf32>
    %167 = arith.subf %166, %0 : vector<4x256xf32>
    %cst_72 = arith.constant 2.500000e+00 : f32
    %168 = vector.broadcast %cst_72 : f32 to vector<4x256xf32>
    %169 = arith.mulf %167, %168 : vector<4x256xf32>
    %170 = arith.mulf %169, %70 : vector<4x256xf32>
    %171 = arith.addf %165, %170 : vector<4x256xf32>
    %cst_73 = arith.constant 6.000000e-01 : f32
    %172 = vector.broadcast %cst_73 : f32 to vector<4x256xf32>
    %173 = arith.subf %0, %172 : vector<4x256xf32>
    %cst_74 = arith.constant 2.500000e+00 : f32
    %174 = vector.broadcast %cst_74 : f32 to vector<4x256xf32>
    %175 = arith.mulf %173, %174 : vector<4x256xf32>
    %176 = arith.mulf %175, %70 : vector<4x256xf32>
    %cst_75 = arith.constant 1.400000e+00 : f32
    %177 = vector.broadcast %cst_75 : f32 to vector<4x256xf32>
    %178 = arith.subf %177, %0 : vector<4x256xf32>
    %cst_76 = arith.constant 2.500000e+00 : f32
    %179 = vector.broadcast %cst_76 : f32 to vector<4x256xf32>
    %180 = arith.mulf %178, %179 : vector<4x256xf32>
    %181 = arith.mulf %180, %78 : vector<4x256xf32>
    %182 = arith.addf %176, %181 : vector<4x256xf32>
    %cst_77 = arith.constant 1.000000e+00 : f32
    %183 = vector.broadcast %cst_77 : f32 to vector<4x256xf32>
    %184 = arith.subf %0, %183 : vector<4x256xf32>
    %cst_78 = arith.constant 2.500000e+00 : f32
    %185 = vector.broadcast %cst_78 : f32 to vector<4x256xf32>
    %186 = arith.mulf %184, %185 : vector<4x256xf32>
    %187 = arith.mulf %186, %78 : vector<4x256xf32>
    %cst_79 = arith.constant 1.800000e+00 : f32
    %188 = vector.broadcast %cst_79 : f32 to vector<4x256xf32>
    %189 = arith.subf %188, %0 : vector<4x256xf32>
    %cst_80 = arith.constant 2.500000e+00 : f32
    %190 = vector.broadcast %cst_80 : f32 to vector<4x256xf32>
    %191 = arith.mulf %189, %190 : vector<4x256xf32>
    %192 = arith.mulf %191, %86 : vector<4x256xf32>
    %193 = arith.addf %187, %192 : vector<4x256xf32>
    %cst_81 = arith.constant 1.400000e+00 : f32
    %194 = vector.broadcast %cst_81 : f32 to vector<4x256xf32>
    %195 = arith.subf %0, %194 : vector<4x256xf32>
    %cst_82 = arith.constant 2.500000e+00 : f32
    %196 = vector.broadcast %cst_82 : f32 to vector<4x256xf32>
    %197 = arith.mulf %195, %196 : vector<4x256xf32>
    %198 = arith.mulf %197, %86 : vector<4x256xf32>
    %cst_83 = arith.constant 2.200000e+00 : f32
    %199 = vector.broadcast %cst_83 : f32 to vector<4x256xf32>
    %200 = arith.subf %199, %0 : vector<4x256xf32>
    %cst_84 = arith.constant 2.500000e+00 : f32
    %201 = vector.broadcast %cst_84 : f32 to vector<4x256xf32>
    %202 = arith.mulf %200, %201 : vector<4x256xf32>
    %203 = arith.mulf %202, %94 : vector<4x256xf32>
    %204 = arith.addf %198, %203 : vector<4x256xf32>
    %cst_85 = arith.constant -2.200000e+00 : f32
    %205 = vector.broadcast %cst_85 : f32 to vector<4x256xf32>
    %206 = arith.subf %0, %205 : vector<4x256xf32>
    %cst_86 = arith.constant 1.250000e+00 : f32
    %207 = vector.broadcast %cst_86 : f32 to vector<4x256xf32>
    %208 = arith.mulf %206, %207 : vector<4x256xf32>
    %209 = arith.mulf %208, %105 : vector<4x256xf32>
    %cst_87 = arith.constant -1.000000e+00 : f32
    %210 = vector.broadcast %cst_87 : f32 to vector<4x256xf32>
    %211 = arith.subf %210, %0 : vector<4x256xf32>
    %cst_88 = arith.constant 1.250000e+00 : f32
    %212 = vector.broadcast %cst_88 : f32 to vector<4x256xf32>
    %213 = arith.mulf %211, %212 : vector<4x256xf32>
    %214 = arith.mulf %213, %116 : vector<4x256xf32>
    %215 = arith.addf %209, %214 : vector<4x256xf32>
    %cst_89 = arith.constant -1.800000e+00 : f32
    %216 = vector.broadcast %cst_89 : f32 to vector<4x256xf32>
    %217 = arith.subf %0, %216 : vector<4x256xf32>
    %cst_90 = arith.constant 1.250000e+00 : f32
    %218 = vector.broadcast %cst_90 : f32 to vector<4x256xf32>
    %219 = arith.mulf %217, %218 : vector<4x256xf32>
    %220 = arith.mulf %219, %116 : vector<4x256xf32>
    %cst_91 = arith.constant -6.000000e-01 : f32
    %221 = vector.broadcast %cst_91 : f32 to vector<4x256xf32>
    %222 = arith.subf %221, %0 : vector<4x256xf32>
    %cst_92 = arith.constant 1.250000e+00 : f32
    %223 = vector.broadcast %cst_92 : f32 to vector<4x256xf32>
    %224 = arith.mulf %222, %223 : vector<4x256xf32>
    %225 = arith.mulf %224, %127 : vector<4x256xf32>
    %226 = arith.addf %220, %225 : vector<4x256xf32>
    %cst_93 = arith.constant -1.400000e+00 : f32
    %227 = vector.broadcast %cst_93 : f32 to vector<4x256xf32>
    %228 = arith.subf %0, %227 : vector<4x256xf32>
    %cst_94 = arith.constant 1.250000e+00 : f32
    %229 = vector.broadcast %cst_94 : f32 to vector<4x256xf32>
    %230 = arith.mulf %228, %229 : vector<4x256xf32>
    %231 = arith.mulf %230, %127 : vector<4x256xf32>
    %cst_95 = arith.constant -2.000000e-01 : f32
    %232 = vector.broadcast %cst_95 : f32 to vector<4x256xf32>
    %233 = arith.subf %232, %0 : vector<4x256xf32>
    %cst_96 = arith.constant 1.250000e+00 : f32
    %234 = vector.broadcast %cst_96 : f32 to vector<4x256xf32>
    %235 = arith.mulf %233, %234 : vector<4x256xf32>
    %236 = arith.mulf %235, %138 : vector<4x256xf32>
    %237 = arith.addf %231, %236 : vector<4x256xf32>
    %cst_97 = arith.constant -1.000000e+00 : f32
    %238 = vector.broadcast %cst_97 : f32 to vector<4x256xf32>
    %239 = arith.subf %0, %238 : vector<4x256xf32>
    %cst_98 = arith.constant 1.250000e+00 : f32
    %240 = vector.broadcast %cst_98 : f32 to vector<4x256xf32>
    %241 = arith.mulf %239, %240 : vector<4x256xf32>
    %242 = arith.mulf %241, %138 : vector<4x256xf32>
    %cst_99 = arith.constant 2.000000e-01 : f32
    %243 = vector.broadcast %cst_99 : f32 to vector<4x256xf32>
    %244 = arith.subf %243, %0 : vector<4x256xf32>
    %cst_100 = arith.constant 1.250000e+00 : f32
    %245 = vector.broadcast %cst_100 : f32 to vector<4x256xf32>
    %246 = arith.mulf %244, %245 : vector<4x256xf32>
    %247 = arith.mulf %246, %149 : vector<4x256xf32>
    %248 = arith.addf %242, %247 : vector<4x256xf32>
    %cst_101 = arith.constant -6.000000e-01 : f32
    %249 = vector.broadcast %cst_101 : f32 to vector<4x256xf32>
    %250 = arith.subf %0, %249 : vector<4x256xf32>
    %cst_102 = arith.constant 1.250000e+00 : f32
    %251 = vector.broadcast %cst_102 : f32 to vector<4x256xf32>
    %252 = arith.mulf %250, %251 : vector<4x256xf32>
    %253 = arith.mulf %252, %149 : vector<4x256xf32>
    %cst_103 = arith.constant 6.000000e-01 : f32
    %254 = vector.broadcast %cst_103 : f32 to vector<4x256xf32>
    %255 = arith.subf %254, %0 : vector<4x256xf32>
    %cst_104 = arith.constant 1.250000e+00 : f32
    %256 = vector.broadcast %cst_104 : f32 to vector<4x256xf32>
    %257 = arith.mulf %255, %256 : vector<4x256xf32>
    %258 = arith.mulf %257, %160 : vector<4x256xf32>
    %259 = arith.addf %253, %258 : vector<4x256xf32>
    %cst_105 = arith.constant -2.000000e-01 : f32
    %260 = vector.broadcast %cst_105 : f32 to vector<4x256xf32>
    %261 = arith.subf %0, %260 : vector<4x256xf32>
    %cst_106 = arith.constant 1.250000e+00 : f32
    %262 = vector.broadcast %cst_106 : f32 to vector<4x256xf32>
    %263 = arith.mulf %261, %262 : vector<4x256xf32>
    %264 = arith.mulf %263, %160 : vector<4x256xf32>
    %cst_107 = arith.constant 1.000000e+00 : f32
    %265 = vector.broadcast %cst_107 : f32 to vector<4x256xf32>
    %266 = arith.subf %265, %0 : vector<4x256xf32>
    %cst_108 = arith.constant 1.250000e+00 : f32
    %267 = vector.broadcast %cst_108 : f32 to vector<4x256xf32>
    %268 = arith.mulf %266, %267 : vector<4x256xf32>
    %269 = arith.mulf %268, %171 : vector<4x256xf32>
    %270 = arith.addf %264, %269 : vector<4x256xf32>
    %cst_109 = arith.constant 2.000000e-01 : f32
    %271 = vector.broadcast %cst_109 : f32 to vector<4x256xf32>
    %272 = arith.subf %0, %271 : vector<4x256xf32>
    %cst_110 = arith.constant 1.250000e+00 : f32
    %273 = vector.broadcast %cst_110 : f32 to vector<4x256xf32>
    %274 = arith.mulf %272, %273 : vector<4x256xf32>
    %275 = arith.mulf %274, %171 : vector<4x256xf32>
    %cst_111 = arith.constant 1.400000e+00 : f32
    %276 = vector.broadcast %cst_111 : f32 to vector<4x256xf32>
    %277 = arith.subf %276, %0 : vector<4x256xf32>
    %cst_112 = arith.constant 1.250000e+00 : f32
    %278 = vector.broadcast %cst_112 : f32 to vector<4x256xf32>
    %279 = arith.mulf %277, %278 : vector<4x256xf32>
    %280 = arith.mulf %279, %182 : vector<4x256xf32>
    %281 = arith.addf %275, %280 : vector<4x256xf32>
    %cst_113 = arith.constant 6.000000e-01 : f32
    %282 = vector.broadcast %cst_113 : f32 to vector<4x256xf32>
    %283 = arith.subf %0, %282 : vector<4x256xf32>
    %cst_114 = arith.constant 1.250000e+00 : f32
    %284 = vector.broadcast %cst_114 : f32 to vector<4x256xf32>
    %285 = arith.mulf %283, %284 : vector<4x256xf32>
    %286 = arith.mulf %285, %182 : vector<4x256xf32>
    %cst_115 = arith.constant 1.800000e+00 : f32
    %287 = vector.broadcast %cst_115 : f32 to vector<4x256xf32>
    %288 = arith.subf %287, %0 : vector<4x256xf32>
    %cst_116 = arith.constant 1.250000e+00 : f32
    %289 = vector.broadcast %cst_116 : f32 to vector<4x256xf32>
    %290 = arith.mulf %288, %289 : vector<4x256xf32>
    %291 = arith.mulf %290, %193 : vector<4x256xf32>
    %292 = arith.addf %286, %291 : vector<4x256xf32>
    %cst_117 = arith.constant 1.000000e+00 : f32
    %293 = vector.broadcast %cst_117 : f32 to vector<4x256xf32>
    %294 = arith.subf %0, %293 : vector<4x256xf32>
    %cst_118 = arith.constant 1.250000e+00 : f32
    %295 = vector.broadcast %cst_118 : f32 to vector<4x256xf32>
    %296 = arith.mulf %294, %295 : vector<4x256xf32>
    %297 = arith.mulf %296, %193 : vector<4x256xf32>
    %cst_119 = arith.constant 2.200000e+00 : f32
    %298 = vector.broadcast %cst_119 : f32 to vector<4x256xf32>
    %299 = arith.subf %298, %0 : vector<4x256xf32>
    %cst_120 = arith.constant 1.250000e+00 : f32
    %300 = vector.broadcast %cst_120 : f32 to vector<4x256xf32>
    %301 = arith.mulf %299, %300 : vector<4x256xf32>
    %302 = arith.mulf %301, %204 : vector<4x256xf32>
    %303 = arith.addf %297, %302 : vector<4x256xf32>
    %cst_121 = arith.constant -2.200000e+00 : f32
    %304 = vector.broadcast %cst_121 : f32 to vector<4x256xf32>
    %305 = arith.subf %0, %304 : vector<4x256xf32>
    %cst_122 = arith.constant 0.833333313 : f32
    %306 = vector.broadcast %cst_122 : f32 to vector<4x256xf32>
    %307 = arith.mulf %305, %306 : vector<4x256xf32>
    %308 = arith.mulf %307, %215 : vector<4x256xf32>
    %cst_123 = arith.constant -6.000000e-01 : f32
    %309 = vector.broadcast %cst_123 : f32 to vector<4x256xf32>
    %310 = arith.subf %309, %0 : vector<4x256xf32>
    %cst_124 = arith.constant 0.833333313 : f32
    %311 = vector.broadcast %cst_124 : f32 to vector<4x256xf32>
    %312 = arith.mulf %310, %311 : vector<4x256xf32>
    %313 = arith.mulf %312, %226 : vector<4x256xf32>
    %314 = arith.addf %308, %313 : vector<4x256xf32>
    %cst_125 = arith.constant -1.800000e+00 : f32
    %315 = vector.broadcast %cst_125 : f32 to vector<4x256xf32>
    %316 = arith.subf %0, %315 : vector<4x256xf32>
    %cst_126 = arith.constant 0.833333313 : f32
    %317 = vector.broadcast %cst_126 : f32 to vector<4x256xf32>
    %318 = arith.mulf %316, %317 : vector<4x256xf32>
    %319 = arith.mulf %318, %226 : vector<4x256xf32>
    %cst_127 = arith.constant -2.000000e-01 : f32
    %320 = vector.broadcast %cst_127 : f32 to vector<4x256xf32>
    %321 = arith.subf %320, %0 : vector<4x256xf32>
    %cst_128 = arith.constant 0.833333313 : f32
    %322 = vector.broadcast %cst_128 : f32 to vector<4x256xf32>
    %323 = arith.mulf %321, %322 : vector<4x256xf32>
    %324 = arith.mulf %323, %237 : vector<4x256xf32>
    %325 = arith.addf %319, %324 : vector<4x256xf32>
    %cst_129 = arith.constant -1.400000e+00 : f32
    %326 = vector.broadcast %cst_129 : f32 to vector<4x256xf32>
    %327 = arith.subf %0, %326 : vector<4x256xf32>
    %cst_130 = arith.constant 0.833333313 : f32
    %328 = vector.broadcast %cst_130 : f32 to vector<4x256xf32>
    %329 = arith.mulf %327, %328 : vector<4x256xf32>
    %330 = arith.mulf %329, %237 : vector<4x256xf32>
    %cst_131 = arith.constant 2.000000e-01 : f32
    %331 = vector.broadcast %cst_131 : f32 to vector<4x256xf32>
    %332 = arith.subf %331, %0 : vector<4x256xf32>
    %cst_132 = arith.constant 0.833333313 : f32
    %333 = vector.broadcast %cst_132 : f32 to vector<4x256xf32>
    %334 = arith.mulf %332, %333 : vector<4x256xf32>
    %335 = arith.mulf %334, %248 : vector<4x256xf32>
    %336 = arith.addf %330, %335 : vector<4x256xf32>
    %cst_133 = arith.constant -1.000000e+00 : f32
    %337 = vector.broadcast %cst_133 : f32 to vector<4x256xf32>
    %338 = arith.subf %0, %337 : vector<4x256xf32>
    %cst_134 = arith.constant 0.833333313 : f32
    %339 = vector.broadcast %cst_134 : f32 to vector<4x256xf32>
    %340 = arith.mulf %338, %339 : vector<4x256xf32>
    %341 = arith.mulf %340, %248 : vector<4x256xf32>
    %cst_135 = arith.constant 6.000000e-01 : f32
    %342 = vector.broadcast %cst_135 : f32 to vector<4x256xf32>
    %343 = arith.subf %342, %0 : vector<4x256xf32>
    %cst_136 = arith.constant 0.833333313 : f32
    %344 = vector.broadcast %cst_136 : f32 to vector<4x256xf32>
    %345 = arith.mulf %343, %344 : vector<4x256xf32>
    %346 = arith.mulf %345, %259 : vector<4x256xf32>
    %347 = arith.addf %341, %346 : vector<4x256xf32>
    %cst_137 = arith.constant -6.000000e-01 : f32
    %348 = vector.broadcast %cst_137 : f32 to vector<4x256xf32>
    %349 = arith.subf %0, %348 : vector<4x256xf32>
    %cst_138 = arith.constant 0.833333313 : f32
    %350 = vector.broadcast %cst_138 : f32 to vector<4x256xf32>
    %351 = arith.mulf %349, %350 : vector<4x256xf32>
    %352 = arith.mulf %351, %259 : vector<4x256xf32>
    %cst_139 = arith.constant 1.000000e+00 : f32
    %353 = vector.broadcast %cst_139 : f32 to vector<4x256xf32>
    %354 = arith.subf %353, %0 : vector<4x256xf32>
    %cst_140 = arith.constant 0.833333313 : f32
    %355 = vector.broadcast %cst_140 : f32 to vector<4x256xf32>
    %356 = arith.mulf %354, %355 : vector<4x256xf32>
    %357 = arith.mulf %356, %270 : vector<4x256xf32>
    %358 = arith.addf %352, %357 : vector<4x256xf32>
    %cst_141 = arith.constant -2.000000e-01 : f32
    %359 = vector.broadcast %cst_141 : f32 to vector<4x256xf32>
    %360 = arith.subf %0, %359 : vector<4x256xf32>
    %cst_142 = arith.constant 0.833333313 : f32
    %361 = vector.broadcast %cst_142 : f32 to vector<4x256xf32>
    %362 = arith.mulf %360, %361 : vector<4x256xf32>
    %363 = arith.mulf %362, %270 : vector<4x256xf32>
    %cst_143 = arith.constant 1.400000e+00 : f32
    %364 = vector.broadcast %cst_143 : f32 to vector<4x256xf32>
    %365 = arith.subf %364, %0 : vector<4x256xf32>
    %cst_144 = arith.constant 0.833333313 : f32
    %366 = vector.broadcast %cst_144 : f32 to vector<4x256xf32>
    %367 = arith.mulf %365, %366 : vector<4x256xf32>
    %368 = arith.mulf %367, %281 : vector<4x256xf32>
    %369 = arith.addf %363, %368 : vector<4x256xf32>
    %cst_145 = arith.constant 2.000000e-01 : f32
    %370 = vector.broadcast %cst_145 : f32 to vector<4x256xf32>
    %371 = arith.subf %0, %370 : vector<4x256xf32>
    %cst_146 = arith.constant 0.833333313 : f32
    %372 = vector.broadcast %cst_146 : f32 to vector<4x256xf32>
    %373 = arith.mulf %371, %372 : vector<4x256xf32>
    %374 = arith.mulf %373, %281 : vector<4x256xf32>
    %cst_147 = arith.constant 1.800000e+00 : f32
    %375 = vector.broadcast %cst_147 : f32 to vector<4x256xf32>
    %376 = arith.subf %375, %0 : vector<4x256xf32>
    %cst_148 = arith.constant 0.833333313 : f32
    %377 = vector.broadcast %cst_148 : f32 to vector<4x256xf32>
    %378 = arith.mulf %376, %377 : vector<4x256xf32>
    %379 = arith.mulf %378, %292 : vector<4x256xf32>
    %380 = arith.addf %374, %379 : vector<4x256xf32>
    %cst_149 = arith.constant 6.000000e-01 : f32
    %381 = vector.broadcast %cst_149 : f32 to vector<4x256xf32>
    %382 = arith.subf %0, %381 : vector<4x256xf32>
    %cst_150 = arith.constant 0.833333313 : f32
    %383 = vector.broadcast %cst_150 : f32 to vector<4x256xf32>
    %384 = arith.mulf %382, %383 : vector<4x256xf32>
    %385 = arith.mulf %384, %292 : vector<4x256xf32>
    %cst_151 = arith.constant 2.200000e+00 : f32
    %386 = vector.broadcast %cst_151 : f32 to vector<4x256xf32>
    %387 = arith.subf %386, %0 : vector<4x256xf32>
    %cst_152 = arith.constant 0.833333313 : f32
    %388 = vector.broadcast %cst_152 : f32 to vector<4x256xf32>
    %389 = arith.mulf %387, %388 : vector<4x256xf32>
    %390 = arith.mulf %389, %303 : vector<4x256xf32>
    %391 = arith.addf %385, %390 : vector<4x256xf32>
    %c0_153 = arith.constant 0 : index
    %c0_154 = arith.constant 0 : index
    %392 = vector.load %arg2[%c0_153, %c0_154] : memref<8x36xf32, #tpu.memory_space<vmem>>, vector<8x36xf32>
    %393 = vector.extract_strided_slice %392 {offsets = [0, 0], sizes = [8, 1], strides = [1, 1]} : vector<8x36xf32> to vector<8x1xf32>
    %394 = vector.extract_strided_slice %6 {offsets = [0, 0], sizes = [1, 256], strides = [1, 1]} : vector<4x256xf32> to vector<1x256xf32>
    %395 = vector.broadcast %393 : vector<8x1xf32> to vector<8x256xf32>
    %396 = vector.broadcast %394 : vector<1x256xf32> to vector<8x256xf32>
    %397 = arith.mulf %395, %396 : vector<8x256xf32>
    %398 = vector.extract_strided_slice %392 {offsets = [0, 1], sizes = [8, 1], strides = [1, 1]} : vector<8x36xf32> to vector<8x1xf32>
    %399 = vector.extract_strided_slice %6 {offsets = [1, 0], sizes = [1, 256], strides = [1, 1]} : vector<4x256xf32> to vector<1x256xf32>
    %400 = vector.broadcast %398 : vector<8x1xf32> to vector<8x256xf32>
    %401 = vector.broadcast %399 : vector<1x256xf32> to vector<8x256xf32>
    %402 = arith.mulf %400, %401 : vector<8x256xf32>
    %403 = arith.addf %397, %402 : vector<8x256xf32>
    %404 = vector.extract_strided_slice %392 {offsets = [0, 2], sizes = [8, 1], strides = [1, 1]} : vector<8x36xf32> to vector<8x1xf32>
    %405 = vector.extract_strided_slice %6 {offsets = [2, 0], sizes = [1, 256], strides = [1, 1]} : vector<4x256xf32> to vector<1x256xf32>
    %406 = vector.broadcast %404 : vector<8x1xf32> to vector<8x256xf32>
    %407 = vector.broadcast %405 : vector<1x256xf32> to vector<8x256xf32>
    %408 = arith.mulf %406, %407 : vector<8x256xf32>
    %409 = arith.addf %403, %408 : vector<8x256xf32>
    %410 = vector.extract_strided_slice %392 {offsets = [0, 3], sizes = [8, 1], strides = [1, 1]} : vector<8x36xf32> to vector<8x1xf32>
    %411 = vector.extract_strided_slice %6 {offsets = [3, 0], sizes = [1, 256], strides = [1, 1]} : vector<4x256xf32> to vector<1x256xf32>
    %412 = vector.broadcast %410 : vector<8x1xf32> to vector<8x256xf32>
    %413 = vector.broadcast %411 : vector<1x256xf32> to vector<8x256xf32>
    %414 = arith.mulf %412, %413 : vector<8x256xf32>
    %415 = arith.addf %409, %414 : vector<8x256xf32>
    %416 = vector.extract_strided_slice %392 {offsets = [0, 4], sizes = [8, 1], strides = [1, 1]} : vector<8x36xf32> to vector<8x1xf32>
    %417 = vector.extract_strided_slice %314 {offsets = [0, 0], sizes = [1, 256], strides = [1, 1]} : vector<4x256xf32> to vector<1x256xf32>
    %418 = vector.broadcast %416 : vector<8x1xf32> to vector<8x256xf32>
    %419 = vector.broadcast %417 : vector<1x256xf32> to vector<8x256xf32>
    %420 = arith.mulf %418, %419 : vector<8x256xf32>
    %421 = arith.addf %415, %420 : vector<8x256xf32>
    %422 = vector.extract_strided_slice %392 {offsets = [0, 5], sizes = [8, 1], strides = [1, 1]} : vector<8x36xf32> to vector<8x1xf32>
    %423 = vector.extract_strided_slice %314 {offsets = [1, 0], sizes = [1, 256], strides = [1, 1]} : vector<4x256xf32> to vector<1x256xf32>
    %424 = vector.broadcast %422 : vector<8x1xf32> to vector<8x256xf32>
    %425 = vector.broadcast %423 : vector<1x256xf32> to vector<8x256xf32>
    %426 = arith.mulf %424, %425 : vector<8x256xf32>
    %427 = arith.addf %421, %426 : vector<8x256xf32>
    %428 = vector.extract_strided_slice %392 {offsets = [0, 6], sizes = [8, 1], strides = [1, 1]} : vector<8x36xf32> to vector<8x1xf32>
    %429 = vector.extract_strided_slice %314 {offsets = [2, 0], sizes = [1, 256], strides = [1, 1]} : vector<4x256xf32> to vector<1x256xf32>
    %430 = vector.broadcast %428 : vector<8x1xf32> to vector<8x256xf32>
    %431 = vector.broadcast %429 : vector<1x256xf32> to vector<8x256xf32>
    %432 = arith.mulf %430, %431 : vector<8x256xf32>
    %433 = arith.addf %427, %432 : vector<8x256xf32>
    %434 = vector.extract_strided_slice %392 {offsets = [0, 7], sizes = [8, 1], strides = [1, 1]} : vector<8x36xf32> to vector<8x1xf32>
    %435 = vector.extract_strided_slice %314 {offsets = [3, 0], sizes = [1, 256], strides = [1, 1]} : vector<4x256xf32> to vector<1x256xf32>
    %436 = vector.broadcast %434 : vector<8x1xf32> to vector<8x256xf32>
    %437 = vector.broadcast %435 : vector<1x256xf32> to vector<8x256xf32>
    %438 = arith.mulf %436, %437 : vector<8x256xf32>
    %439 = arith.addf %433, %438 : vector<8x256xf32>
    %440 = vector.extract_strided_slice %392 {offsets = [0, 8], sizes = [8, 1], strides = [1, 1]} : vector<8x36xf32> to vector<8x1xf32>
    %441 = vector.extract_strided_slice %325 {offsets = [0, 0], sizes = [1, 256], strides = [1, 1]} : vector<4x256xf32> to vector<1x256xf32>
    %442 = vector.broadcast %440 : vector<8x1xf32> to vector<8x256xf32>
    %443 = vector.broadcast %441 : vector<1x256xf32> to vector<8x256xf32>
    %444 = arith.mulf %442, %443 : vector<8x256xf32>
    %445 = arith.addf %439, %444 : vector<8x256xf32>
    %446 = vector.extract_strided_slice %392 {offsets = [0, 9], sizes = [8, 1], strides = [1, 1]} : vector<8x36xf32> to vector<8x1xf32>
    %447 = vector.extract_strided_slice %325 {offsets = [1, 0], sizes = [1, 256], strides = [1, 1]} : vector<4x256xf32> to vector<1x256xf32>
    %448 = vector.broadcast %446 : vector<8x1xf32> to vector<8x256xf32>
    %449 = vector.broadcast %447 : vector<1x256xf32> to vector<8x256xf32>
    %450 = arith.mulf %448, %449 : vector<8x256xf32>
    %451 = arith.addf %445, %450 : vector<8x256xf32>
    %452 = vector.extract_strided_slice %392 {offsets = [0, 10], sizes = [8, 1], strides = [1, 1]} : vector<8x36xf32> to vector<8x1xf32>
    %453 = vector.extract_strided_slice %325 {offsets = [2, 0], sizes = [1, 256], strides = [1, 1]} : vector<4x256xf32> to vector<1x256xf32>
    %454 = vector.broadcast %452 : vector<8x1xf32> to vector<8x256xf32>
    %455 = vector.broadcast %453 : vector<1x256xf32> to vector<8x256xf32>
    %456 = arith.mulf %454, %455 : vector<8x256xf32>
    %457 = arith.addf %451, %456 : vector<8x256xf32>
    %458 = vector.extract_strided_slice %392 {offsets = [0, 11], sizes = [8, 1], strides = [1, 1]} : vector<8x36xf32> to vector<8x1xf32>
    %459 = vector.extract_strided_slice %325 {offsets = [3, 0], sizes = [1, 256], strides = [1, 1]} : vector<4x256xf32> to vector<1x256xf32>
    %460 = vector.broadcast %458 : vector<8x1xf32> to vector<8x256xf32>
    %461 = vector.broadcast %459 : vector<1x256xf32> to vector<8x256xf32>
    %462 = arith.mulf %460, %461 : vector<8x256xf32>
    %463 = arith.addf %457, %462 : vector<8x256xf32>
    %464 = vector.extract_strided_slice %392 {offsets = [0, 12], sizes = [8, 1], strides = [1, 1]} : vector<8x36xf32> to vector<8x1xf32>
    %465 = vector.extract_strided_slice %336 {offsets = [0, 0], sizes = [1, 256], strides = [1, 1]} : vector<4x256xf32> to vector<1x256xf32>
    %466 = vector.broadcast %464 : vector<8x1xf32> to vector<8x256xf32>
    %467 = vector.broadcast %465 : vector<1x256xf32> to vector<8x256xf32>
    %468 = arith.mulf %466, %467 : vector<8x256xf32>
    %469 = arith.addf %463, %468 : vector<8x256xf32>
    %470 = vector.extract_strided_slice %392 {offsets = [0, 13], sizes = [8, 1], strides = [1, 1]} : vector<8x36xf32> to vector<8x1xf32>
    %471 = vector.extract_strided_slice %336 {offsets = [1, 0], sizes = [1, 256], strides = [1, 1]} : vector<4x256xf32> to vector<1x256xf32>
    %472 = vector.broadcast %470 : vector<8x1xf32> to vector<8x256xf32>
    %473 = vector.broadcast %471 : vector<1x256xf32> to vector<8x256xf32>
    %474 = arith.mulf %472, %473 : vector<8x256xf32>
    %475 = arith.addf %469, %474 : vector<8x256xf32>
    %476 = vector.extract_strided_slice %392 {offsets = [0, 14], sizes = [8, 1], strides = [1, 1]} : vector<8x36xf32> to vector<8x1xf32>
    %477 = vector.extract_strided_slice %336 {offsets = [2, 0], sizes = [1, 256], strides = [1, 1]} : vector<4x256xf32> to vector<1x256xf32>
    %478 = vector.broadcast %476 : vector<8x1xf32> to vector<8x256xf32>
    %479 = vector.broadcast %477 : vector<1x256xf32> to vector<8x256xf32>
    %480 = arith.mulf %478, %479 : vector<8x256xf32>
    %481 = arith.addf %475, %480 : vector<8x256xf32>
    %482 = vector.extract_strided_slice %392 {offsets = [0, 15], sizes = [8, 1], strides = [1, 1]} : vector<8x36xf32> to vector<8x1xf32>
    %483 = vector.extract_strided_slice %336 {offsets = [3, 0], sizes = [1, 256], strides = [1, 1]} : vector<4x256xf32> to vector<1x256xf32>
    %484 = vector.broadcast %482 : vector<8x1xf32> to vector<8x256xf32>
    %485 = vector.broadcast %483 : vector<1x256xf32> to vector<8x256xf32>
    %486 = arith.mulf %484, %485 : vector<8x256xf32>
    %487 = arith.addf %481, %486 : vector<8x256xf32>
    %488 = vector.extract_strided_slice %392 {offsets = [0, 16], sizes = [8, 1], strides = [1, 1]} : vector<8x36xf32> to vector<8x1xf32>
    %489 = vector.extract_strided_slice %347 {offsets = [0, 0], sizes = [1, 256], strides = [1, 1]} : vector<4x256xf32> to vector<1x256xf32>
    %490 = vector.broadcast %488 : vector<8x1xf32> to vector<8x256xf32>
    %491 = vector.broadcast %489 : vector<1x256xf32> to vector<8x256xf32>
    %492 = arith.mulf %490, %491 : vector<8x256xf32>
    %493 = arith.addf %487, %492 : vector<8x256xf32>
    %494 = vector.extract_strided_slice %392 {offsets = [0, 17], sizes = [8, 1], strides = [1, 1]} : vector<8x36xf32> to vector<8x1xf32>
    %495 = vector.extract_strided_slice %347 {offsets = [1, 0], sizes = [1, 256], strides = [1, 1]} : vector<4x256xf32> to vector<1x256xf32>
    %496 = vector.broadcast %494 : vector<8x1xf32> to vector<8x256xf32>
    %497 = vector.broadcast %495 : vector<1x256xf32> to vector<8x256xf32>
    %498 = arith.mulf %496, %497 : vector<8x256xf32>
    %499 = arith.addf %493, %498 : vector<8x256xf32>
    %500 = vector.extract_strided_slice %392 {offsets = [0, 18], sizes = [8, 1], strides = [1, 1]} : vector<8x36xf32> to vector<8x1xf32>
    %501 = vector.extract_strided_slice %347 {offsets = [2, 0], sizes = [1, 256], strides = [1, 1]} : vector<4x256xf32> to vector<1x256xf32>
    %502 = vector.broadcast %500 : vector<8x1xf32> to vector<8x256xf32>
    %503 = vector.broadcast %501 : vector<1x256xf32> to vector<8x256xf32>
    %504 = arith.mulf %502, %503 : vector<8x256xf32>
    %505 = arith.addf %499, %504 : vector<8x256xf32>
    %506 = vector.extract_strided_slice %392 {offsets = [0, 19], sizes = [8, 1], strides = [1, 1]} : vector<8x36xf32> to vector<8x1xf32>
    %507 = vector.extract_strided_slice %347 {offsets = [3, 0], sizes = [1, 256], strides = [1, 1]} : vector<4x256xf32> to vector<1x256xf32>
    %508 = vector.broadcast %506 : vector<8x1xf32> to vector<8x256xf32>
    %509 = vector.broadcast %507 : vector<1x256xf32> to vector<8x256xf32>
    %510 = arith.mulf %508, %509 : vector<8x256xf32>
    %511 = arith.addf %505, %510 : vector<8x256xf32>
    %512 = vector.extract_strided_slice %392 {offsets = [0, 20], sizes = [8, 1], strides = [1, 1]} : vector<8x36xf32> to vector<8x1xf32>
    %513 = vector.extract_strided_slice %358 {offsets = [0, 0], sizes = [1, 256], strides = [1, 1]} : vector<4x256xf32> to vector<1x256xf32>
    %514 = vector.broadcast %512 : vector<8x1xf32> to vector<8x256xf32>
    %515 = vector.broadcast %513 : vector<1x256xf32> to vector<8x256xf32>
    %516 = arith.mulf %514, %515 : vector<8x256xf32>
    %517 = arith.addf %511, %516 : vector<8x256xf32>
    %518 = vector.extract_strided_slice %392 {offsets = [0, 21], sizes = [8, 1], strides = [1, 1]} : vector<8x36xf32> to vector<8x1xf32>
    %519 = vector.extract_strided_slice %358 {offsets = [1, 0], sizes = [1, 256], strides = [1, 1]} : vector<4x256xf32> to vector<1x256xf32>
    %520 = vector.broadcast %518 : vector<8x1xf32> to vector<8x256xf32>
    %521 = vector.broadcast %519 : vector<1x256xf32> to vector<8x256xf32>
    %522 = arith.mulf %520, %521 : vector<8x256xf32>
    %523 = arith.addf %517, %522 : vector<8x256xf32>
    %524 = vector.extract_strided_slice %392 {offsets = [0, 22], sizes = [8, 1], strides = [1, 1]} : vector<8x36xf32> to vector<8x1xf32>
    %525 = vector.extract_strided_slice %358 {offsets = [2, 0], sizes = [1, 256], strides = [1, 1]} : vector<4x256xf32> to vector<1x256xf32>
    %526 = vector.broadcast %524 : vector<8x1xf32> to vector<8x256xf32>
    %527 = vector.broadcast %525 : vector<1x256xf32> to vector<8x256xf32>
    %528 = arith.mulf %526, %527 : vector<8x256xf32>
    %529 = arith.addf %523, %528 : vector<8x256xf32>
    %530 = vector.extract_strided_slice %392 {offsets = [0, 23], sizes = [8, 1], strides = [1, 1]} : vector<8x36xf32> to vector<8x1xf32>
    %531 = vector.extract_strided_slice %358 {offsets = [3, 0], sizes = [1, 256], strides = [1, 1]} : vector<4x256xf32> to vector<1x256xf32>
    %532 = vector.broadcast %530 : vector<8x1xf32> to vector<8x256xf32>
    %533 = vector.broadcast %531 : vector<1x256xf32> to vector<8x256xf32>
    %534 = arith.mulf %532, %533 : vector<8x256xf32>
    %535 = arith.addf %529, %534 : vector<8x256xf32>
    %536 = vector.extract_strided_slice %392 {offsets = [0, 24], sizes = [8, 1], strides = [1, 1]} : vector<8x36xf32> to vector<8x1xf32>
    %537 = vector.extract_strided_slice %369 {offsets = [0, 0], sizes = [1, 256], strides = [1, 1]} : vector<4x256xf32> to vector<1x256xf32>
    %538 = vector.broadcast %536 : vector<8x1xf32> to vector<8x256xf32>
    %539 = vector.broadcast %537 : vector<1x256xf32> to vector<8x256xf32>
    %540 = arith.mulf %538, %539 : vector<8x256xf32>
    %541 = arith.addf %535, %540 : vector<8x256xf32>
    %542 = vector.extract_strided_slice %392 {offsets = [0, 25], sizes = [8, 1], strides = [1, 1]} : vector<8x36xf32> to vector<8x1xf32>
    %543 = vector.extract_strided_slice %369 {offsets = [1, 0], sizes = [1, 256], strides = [1, 1]} : vector<4x256xf32> to vector<1x256xf32>
    %544 = vector.broadcast %542 : vector<8x1xf32> to vector<8x256xf32>
    %545 = vector.broadcast %543 : vector<1x256xf32> to vector<8x256xf32>
    %546 = arith.mulf %544, %545 : vector<8x256xf32>
    %547 = arith.addf %541, %546 : vector<8x256xf32>
    %548 = vector.extract_strided_slice %392 {offsets = [0, 26], sizes = [8, 1], strides = [1, 1]} : vector<8x36xf32> to vector<8x1xf32>
    %549 = vector.extract_strided_slice %369 {offsets = [2, 0], sizes = [1, 256], strides = [1, 1]} : vector<4x256xf32> to vector<1x256xf32>
    %550 = vector.broadcast %548 : vector<8x1xf32> to vector<8x256xf32>
    %551 = vector.broadcast %549 : vector<1x256xf32> to vector<8x256xf32>
    %552 = arith.mulf %550, %551 : vector<8x256xf32>
    %553 = arith.addf %547, %552 : vector<8x256xf32>
    %554 = vector.extract_strided_slice %392 {offsets = [0, 27], sizes = [8, 1], strides = [1, 1]} : vector<8x36xf32> to vector<8x1xf32>
    %555 = vector.extract_strided_slice %369 {offsets = [3, 0], sizes = [1, 256], strides = [1, 1]} : vector<4x256xf32> to vector<1x256xf32>
    %556 = vector.broadcast %554 : vector<8x1xf32> to vector<8x256xf32>
    %557 = vector.broadcast %555 : vector<1x256xf32> to vector<8x256xf32>
    %558 = arith.mulf %556, %557 : vector<8x256xf32>
    %559 = arith.addf %553, %558 : vector<8x256xf32>
    %560 = vector.extract_strided_slice %392 {offsets = [0, 28], sizes = [8, 1], strides = [1, 1]} : vector<8x36xf32> to vector<8x1xf32>
    %561 = vector.extract_strided_slice %380 {offsets = [0, 0], sizes = [1, 256], strides = [1, 1]} : vector<4x256xf32> to vector<1x256xf32>
    %562 = vector.broadcast %560 : vector<8x1xf32> to vector<8x256xf32>
    %563 = vector.broadcast %561 : vector<1x256xf32> to vector<8x256xf32>
    %564 = arith.mulf %562, %563 : vector<8x256xf32>
    %565 = arith.addf %559, %564 : vector<8x256xf32>
    %566 = vector.extract_strided_slice %392 {offsets = [0, 29], sizes = [8, 1], strides = [1, 1]} : vector<8x36xf32> to vector<8x1xf32>
    %567 = vector.extract_strided_slice %380 {offsets = [1, 0], sizes = [1, 256], strides = [1, 1]} : vector<4x256xf32> to vector<1x256xf32>
    %568 = vector.broadcast %566 : vector<8x1xf32> to vector<8x256xf32>
    %569 = vector.broadcast %567 : vector<1x256xf32> to vector<8x256xf32>
    %570 = arith.mulf %568, %569 : vector<8x256xf32>
    %571 = arith.addf %565, %570 : vector<8x256xf32>
    %572 = vector.extract_strided_slice %392 {offsets = [0, 30], sizes = [8, 1], strides = [1, 1]} : vector<8x36xf32> to vector<8x1xf32>
    %573 = vector.extract_strided_slice %380 {offsets = [2, 0], sizes = [1, 256], strides = [1, 1]} : vector<4x256xf32> to vector<1x256xf32>
    %574 = vector.broadcast %572 : vector<8x1xf32> to vector<8x256xf32>
    %575 = vector.broadcast %573 : vector<1x256xf32> to vector<8x256xf32>
    %576 = arith.mulf %574, %575 : vector<8x256xf32>
    %577 = arith.addf %571, %576 : vector<8x256xf32>
    %578 = vector.extract_strided_slice %392 {offsets = [0, 31], sizes = [8, 1], strides = [1, 1]} : vector<8x36xf32> to vector<8x1xf32>
    %579 = vector.extract_strided_slice %380 {offsets = [3, 0], sizes = [1, 256], strides = [1, 1]} : vector<4x256xf32> to vector<1x256xf32>
    %580 = vector.broadcast %578 : vector<8x1xf32> to vector<8x256xf32>
    %581 = vector.broadcast %579 : vector<1x256xf32> to vector<8x256xf32>
    %582 = arith.mulf %580, %581 : vector<8x256xf32>
    %583 = arith.addf %577, %582 : vector<8x256xf32>
    %584 = vector.extract_strided_slice %392 {offsets = [0, 32], sizes = [8, 1], strides = [1, 1]} : vector<8x36xf32> to vector<8x1xf32>
    %585 = vector.extract_strided_slice %391 {offsets = [0, 0], sizes = [1, 256], strides = [1, 1]} : vector<4x256xf32> to vector<1x256xf32>
    %586 = vector.broadcast %584 : vector<8x1xf32> to vector<8x256xf32>
    %587 = vector.broadcast %585 : vector<1x256xf32> to vector<8x256xf32>
    %588 = arith.mulf %586, %587 : vector<8x256xf32>
    %589 = arith.addf %583, %588 : vector<8x256xf32>
    %590 = vector.extract_strided_slice %392 {offsets = [0, 33], sizes = [8, 1], strides = [1, 1]} : vector<8x36xf32> to vector<8x1xf32>
    %591 = vector.extract_strided_slice %391 {offsets = [1, 0], sizes = [1, 256], strides = [1, 1]} : vector<4x256xf32> to vector<1x256xf32>
    %592 = vector.broadcast %590 : vector<8x1xf32> to vector<8x256xf32>
    %593 = vector.broadcast %591 : vector<1x256xf32> to vector<8x256xf32>
    %594 = arith.mulf %592, %593 : vector<8x256xf32>
    %595 = arith.addf %589, %594 : vector<8x256xf32>
    %596 = vector.extract_strided_slice %392 {offsets = [0, 34], sizes = [8, 1], strides = [1, 1]} : vector<8x36xf32> to vector<8x1xf32>
    %597 = vector.extract_strided_slice %391 {offsets = [2, 0], sizes = [1, 256], strides = [1, 1]} : vector<4x256xf32> to vector<1x256xf32>
    %598 = vector.broadcast %596 : vector<8x1xf32> to vector<8x256xf32>
    %599 = vector.broadcast %597 : vector<1x256xf32> to vector<8x256xf32>
    %600 = arith.mulf %598, %599 : vector<8x256xf32>
    %601 = arith.addf %595, %600 : vector<8x256xf32>
    %602 = vector.extract_strided_slice %392 {offsets = [0, 35], sizes = [8, 1], strides = [1, 1]} : vector<8x36xf32> to vector<8x1xf32>
    %603 = vector.extract_strided_slice %391 {offsets = [3, 0], sizes = [1, 256], strides = [1, 1]} : vector<4x256xf32> to vector<1x256xf32>
    %604 = vector.broadcast %602 : vector<8x1xf32> to vector<8x256xf32>
    %605 = vector.broadcast %603 : vector<1x256xf32> to vector<8x256xf32>
    %606 = arith.mulf %604, %605 : vector<8x256xf32>
    %607 = arith.addf %601, %606 : vector<8x256xf32>
    %c0_155 = arith.constant 0 : index
    %c0_156 = arith.constant 0 : index
    %608 = vector.load %arg3[%c0_155, %c0_156] : memref<8x256xf32, #tpu.memory_space<vmem>>, vector<8x256xf32>
    tpu.vector_store %arg3[%c0_155, %c0_156], %607 {strides = array<i32>} : memref<8x256xf32, #tpu.memory_space<vmem>>, vector<8x256xf32>,
    return
  }
  func.func @transform_0(%arg0: i32) -> (i32, i32) {
    %c0_i32 = arith.constant 0 : i32
    %c0_i32_0 = arith.constant 0 : i32
    return %c0_i32, %arg0 : i32, i32
  }
  func.func @transform_1(%arg0: i32) -> (i32, i32) {
    %c0_i32 = arith.constant 0 : i32
    %c0_i32_0 = arith.constant 0 : i32
    %c0_i32_1 = arith.constant 0 : i32
    return %c0_i32, %c0_i32_0 : i32, i32
  }
  func.func @transform_2(%arg0: i32) -> (i32, i32) {
    %c0_i32 = arith.constant 0 : i32
    %c0_i32_0 = arith.constant 0 : i32
    return %c0_i32, %arg0 : i32, i32
  }
}

</mosaic_0001>

<bundles_post_ra>
// kernel: kan_conv_forward.3
= control target key start
LH: loop header
LB: loop body
LE: loop exit
PB: predicated region body
PF: predicated region fallthrough
CT: control target
= control target key end

     0   :  { %s1524_s9 = smov 0   ;;  %s1981_s0 = inlined_call_operand.vmem [shape: f32[4,768], index: 0, kind: input, shape index: {}]   ;;  %s1982_s1 = inlined_call_operand.vmem [shape: f32[8,36], index: 1, kind: input, shape index: {}]   ;;  %s1983_s2 = inlined_call_operand.vmem [shape: f32[8,768], index: 2, kind: output, shape index: {}]  }
   0x1 LB: > { %s1357_s10 = sadd.s32 4294967295, %s1470_s9   ;;  %p1361_p0 = scmp.ge.s32.totalorder %s1470_s9, 1  ;;  %s1470_s9 = sphi %s1524_s9, %s12_s9  }
   0x2   : > { %p113_p1 = scmp.lt.s32.totalorder %s1470_s9, 4 }
   0x4   : > { %p114_p2 = pnand %p1361_p0, %p113_p1 }
   0x5   : > { %v1535_v0 = vld [vmem:[%s1982_s1] sm:$0xff] (!%p114_p2)  ;;  %v1472_v1 = vmov (!%p114_p2), 2   ;;  %v1473_v2 = vmov (!%p114_p2), 0   ;;  %v1474_v3 = vmov (!%p114_p2), 3   ;;  %v1475_v4 = vmov (!%p114_p2), 1   ;;  %s1362_s13 = sshll.u32 (!%p114_p2), %s1357_s10, 1 }
   0x6   : > { %117 = sbr.rel (%p114_p2) target bundleno = 252 (0xfc), region = 28  ;;  %1426 = vset.pattern.permute.xlu1 (!%p114_p2), %v1472_v1  ;;  %1424 = vset.pattern.permute.xlu0 (!%p114_p2), %v1473_v2  ;;  %v1476_v5 = vmov (!%p114_p2), 4   ;;  %v1477_v6 = vmov (!%p114_p2), 5   ;;  %v1478_v7 = vmov (!%p114_p2), 6   ;;  %v1479_v8 = vmov (!%p114_p2), 8   ;;  %p136_p3 = scmp.lt.s32.totalorder (!%p114_p2), %s1362_s13, 5 }
   0x7   : > { %408 = vperm.xlu1 (!%p114_p2), %1426, %v1535_v0   ;;  %357 = vperm.xlu0 (!%p114_p2), %1424, %v1535_v0   ;;  %v1480_v9 = vmov (!%p114_p2), 7   ;;  %v1481_v10 = vmov (!%p114_p2), 11   ;;  %v1482_v11 = vmov (!%p114_p2), 9   ;;  %v1483_v12 = vmov (!%p114_p2), 14  }
   0x8   : > { %v1484_v13 = vmov (!%p114_p2), 10   ;;  %v1485_v14 = vmov (!%p114_p2), 17   ;;  %v1486_v15 = vmov (!%p114_p2), 12   ;;  %v1487_v16 = vmov (!%p114_p2), 20  }
   0x9   : > { %v1488_v17 = vmov (!%p114_p2), 13   ;;  %v1489_v18 = vmov (!%p114_p2), 23   ;;  %v1490_v19 = vmov (!%p114_p2), 15   ;;  %v1491_v20 = vmov (!%p114_p2), 26  }
   0xa   : > { %v1492_v21 = vmov (!%p114_p2), 16   ;;  %v1493_v22 = vmov (!%p114_p2), 29   ;;  %v1494_v23 = vmov (!%p114_p2), 18   ;;  %v1495_v24 = vmov (!%p114_p2), 32  }
   0xb   : > { %1427 = vset.pattern.permute.xlu1 (!%p114_p2), %v1474_v3  ;;  %1425 = vset.pattern.permute.xlu0 (!%p114_p2), %v1475_v4  ;;  %v1496_v25 = vmov (!%p114_p2), 19   ;;  %v1497_v26 = vmov (!%p114_p2), 35   ;;  %v1498_v27 = vmov (!%p114_p2), 21   ;;  %v1499_v28 = vmov (!%p114_p2), 22  }
   0xc   : > { %434 = vperm.xlu1 (!%p114_p2), %1427, %v1535_v0   ;;  %382 = vperm.xlu0 (!%p114_p2), %1425, %v1535_v0   ;;  %v1500_v29 = vmov (!%p114_p2), 24   ;;  %v1501_v30 = vmov (!%p114_p2), 25   ;;  %v1502_v31 = vmov (!%p114_p2), 27   ;;  %v1503_v34 = vmov (!%p114_p2), 28  }
   0xd   : > { %s1985_s13 = smov (!%p136_p3, %s1362_s13), 5  ;;  %v1504_v35 = vmov 30   ;;  %v1505_v42 = vmov 31   ;;  %v1506_v43 = vmov 0.0   ;;  %v1507_v58 = vmov 33  }
   0xe   : > { %s1363_s14 = sshll.u32 %s1985_s13, 2  ;;  %s1365_s18 = sshll.u32 %s1985_s13, 3 }
   0xf   : > { %s139_s17 = scalar_lea.vmem %s1981_s0, %s1363_s14  ;;  %s145_s21 = scalar_lea.vmem %s1983_s2, %s1365_s18 }
  0x10   : > { %1428 = vset.pattern.permute.xlu1 %v1476_v5  ;;  %1429 = vset.pattern.permute.xlu0 %v1477_v6  ;;  %v1575_v32 = vld [vmem:[%s139_s17] sm:$0xff] }
  0x11   : > { %460 = vperm.xlu1 %1428, %v1535_v0   ;;  %487 = vperm.xlu0 %1429, %v1535_v0   ;;  %v1366_v33 = vmul.f32 -1.442695, %v1575_v32  ;;  %vm155_vm0 = vcmp.ge.f32.partialorder %v1575_v32, -2.2  ;;  %vm156_vm1 = vcmp.lt.f32.partialorder %v1575_v32, -1.8 }
  0x12   : > { %vm159_vm2 = vcmp.ge.f32.partialorder %v1575_v32, -1.8  ;;  %vm160_vm3 = vcmp.lt.f32.partialorder %v1575_v32, -1.4  ;;  %vm163_vm4 = vcmp.ge.f32.partialorder %v1575_v32, -1.4  ;;  %vm157_vm8 = vmand %vm155_vm0, %vm156_vm1 }
  0x13   : > { %1460 = vpow2.f32 %v1366_v33  ;;  %vm164_vm5 = vcmp.lt.f32.partialorder %v1575_v32, -1.0  ;;  %vm167_vm6 = vcmp.ge.f32.partialorder %v1575_v32, -1.0  ;;  %vm168_vm7 = vcmp.lt.f32.partialorder %v1575_v32, -0.6  ;;  %vm161_vm9 = vmand %vm159_vm2, %vm160_vm3 }
  0x14   : > { %v1367_v36 = vadd.f32 2.2, %v1575_v32  ;;  %v202_v37 = vsub.f32 -1.4, %v1575_v32  ;;  %v1592_v38 = vadd.f32 1.8, %v1575_v32  ;;  %vm165_vm10 = vmand %vm163_vm4, %vm164_vm5 }
  0x15   : > { %1430 = vset.pattern.permute.xlu1 %v1478_v7  ;;  %1432 = vset.pattern.permute.xlu0 %v1479_v8  ;;  %v209_v39 = vsub.f32 -1.0, %v1575_v32  ;;  %v1596_v40 = vadd.f32 1.4, %v1575_v32  ;;  %v216_v41 = vsub.f32 -0.6, %v1575_v32  ;;  %vm169_vm11 = vmand %vm167_vm6, %vm168_vm7  ;;  %v158_v44 = vsel %vm157_vm8, 1.0, %v1506_v43 }
  0x16   : > { %513 = vperm.xlu1 %1430, %v1535_v0   ;;  %565 = vperm.xlu0 %1432, %v1535_v0   ;;  %v200_v45 = vmul.f32 2.5, %v1367_v36  ;;  %v203_v46 = vmul.f32 2.5, %v202_v37  ;;  %v207_v47 = vmul.f32 2.5, %v1592_v38  ;;  %v162_v48 = vsel %vm161_vm9, 1.0, %v1506_v43 }
  0x17   : > { %v210_v49 = vmul.f32 2.5, %v209_v39  ;;  %v214_v50 = vmul.f32 2.5, %v1596_v40  ;;  %v217_v51 = vmul.f32 2.5, %v216_v41  ;;  %v166_v53 = vsel %vm165_vm10, 1.0, %v1506_v43 }
  0x18   : > { %v170_v54 = vsel %vm169_vm11, 1.0, %v1506_v43  ;;  %v201_v55 = vmul.f32 %v200_v45, %v158_v44  ;;  %v204_v56 = vmul.f32 %v203_v46, %v162_v48  ;;  %v208_v57 = vmul.f32 %v207_v47, %v162_v48 }
  0x19   : > { %v211_v60 = vmul.f32 %v210_v49, %v166_v53  ;;  %v215_v61 = vmul.f32 %v214_v50, %v166_v53  ;;  %v218_v62 = vmul.f32 %v217_v51, %v170_v54  ;;  %v269_v63 = vmul.f32 1.25, %v1367_v36 }
  0x1a   : > { %1431 = vset.pattern.permute.xlu1 %v1480_v9  ;;  %1435 = vset.pattern.permute.xlu0 %v1481_v10  ;;  %v271_v1 = vmul.f32 1.25, %v209_v39  ;;  %v274_v2 = vmul.f32 1.25, %v1592_v38  ;;  %v276_v3 = vmul.f32 1.25, %v216_v41  ;;  %v205_v4 = vadd.f32 %v204_v56, %v201_v55 }
  0x1b   : > { %539 = vperm.xlu1 %1431, %v1535_v0   ;;  %644 = vperm.xlu0 %1435, %v1535_v0   ;;  %v212_v5 = vadd.f32 %v211_v60, %v208_v57  ;;  %v219_v6 = vadd.f32 %v218_v62, %v215_v61  ;;  %v1508_v7 = vmov 34   ;;  %vm171_vm12 = vcmp.ge.f32.partialorder %v1575_v32, -0.6 }
  0x1c   : > { %vm172_vm13 = vcmp.lt.f32.partialorder %v1575_v32, -0.2  ;;  %v1612_v8 = vadd.f32 1.0, %v1575_v32  ;;  %v223_v9 = vsub.f32 -0.2, %v1575_v32  ;;  %v361_v10 = vlaneseq }
  0x1d   : > { %v1461_v52 = vpop.eup %1460  ;;  %vm173_vm14 = vmand %vm171_vm12, %vm172_vm13  ;;  %vm175_vm15 = vcmp.ge.f32.partialorder %v1575_v32, -0.2  ;;  %vm176_vm0 = vcmp.lt.f32.partialorder %v1575_v32, 0.2  ;;  %vm179_vm2 = vcmp.ge.f32.partialorder %v1575_v32, 0.2 }
  0x1e   : > { %v151_v59 = vadd.f32 1.0, %v1461_v52  ;;  %vm177_vm1 = vmand %vm175_vm15, %vm176_vm0  ;;  %v281_v39 = vmul.f32 1.25, %v223_v9  ;;  %v284_v46 = vmul.f32 1.25, %v1612_v8  ;;  %v321_v53 = vmul.f32 0.8333333, %v223_v9 }
  0x1f   : > { %1433 = vset.pattern.permute.xlu1 %v1482_v11  ;;  %1438 = vset.pattern.permute.xlu0 %v1483_v12  ;;  %v270_v11 = vmul.f32 %v269_v63, %v205_v4  ;;  %v272_v12 = vmul.f32 %v271_v1, %v212_v5  ;;  %v1650_v50 = vsel %vm177_vm1, 1.0, %v1506_v43  ;;  %vm180_vm3 = vcmp.lt.f32.partialorder %v1575_v32, 0.6 }
  0x20   : > { %592 = vperm.xlu1 %1433, %v1535_v0   ;;  %723 = vperm.xlu0 %1438, %v1535_v0   ;;  %1462 = vrcp.f32 %v151_v59  ;;  %vm181_vm4 = vmand %vm179_vm2, %vm180_vm3  ;;  %vm183_vm5 = vcmp.ge.f32.partialorder %v1575_v32, 0.6  ;;  %vm184_vm6 = vcmp.lt.f32.partialorder %v1575_v32, 1.0  ;;  %vm187_vm8 = vcmp.ge.f32.partialorder %v1575_v32, 1.0 }
  0x21   : > { %vm185_vm7 = vmand %vm183_vm5, %vm184_vm6  ;;  %vm188_vm9 = vcmp.lt.f32.partialorder %v1575_v32, 1.4  ;;  %vm191_vm11 = vcmp.ge.f32.partialorder %v1575_v32, 1.4  ;;  %vm192_vm12 = vcmp.lt.f32.partialorder %v1575_v32, 1.8 }
  0x22   : > { %vm189_vm10 = vmand %vm187_vm8, %vm188_vm9  ;;  %vm196_vm15 = vcmp.lt.f32.partialorder %v1575_v32, 2.2 }
  0x23   : > { %vm193_vm13 = vmand %vm191_vm11, %vm192_vm12 }
  0x24   : > { %1434 = vset.pattern.permute.xlu1 %v1484_v13  ;;  %1441 = vset.pattern.permute.xlu0 %v1485_v14  ;;  %v275_v13 = vmul.f32 %v274_v2, %v212_v5  ;;  %v277_v14 = vmul.f32 %v276_v3, %v219_v6 }
  0x25   : > { %618 = vperm.xlu1 %1434, %v1535_v0   ;;  %802 = vperm.xlu0 %1441, %v1535_v0  }
  0x29   : > { %1436 = vset.pattern.permute.xlu1 %v1486_v15  ;;  %1444 = vset.pattern.permute.xlu0 %v1487_v16  ;;  %v221_v15 = vmul.f32 2.5, %v1612_v8  ;;  %v224_v16 = vmul.f32 2.5, %v223_v9  ;;  %v1674_v9 = vsub.f32 0.6, %v1575_v32 }
  0x2a   : > { %670 = vperm.xlu1 %1436, %v1535_v0   ;;  %880 = vperm.xlu0 %1444, %v1535_v0  }
  0x2e   : > { %1437 = vset.pattern.permute.xlu1 %v1488_v17  ;;  %1447 = vset.pattern.permute.xlu0 %v1489_v18  ;;  %v362_v17 = vshrl.u32 %v361_v10, 7  ;;  %v174_v18 = vsel %vm173_vm14, 1.0, %v1506_v43  ;;  %vm195_vm14 = vcmp.ge.f32.partialorder %v1575_v32, 1.8 }
  0x2f   : > { %697 = vperm.xlu1 %1437, %v1535_v0   ;;  %959 = vperm.xlu0 %1447, %v1535_v0   ;;  %vm197_vm0 = vmand %vm195_vm14, %vm196_vm15 }
  0x30   : > { %v1639_v37 = vsub.s32 5, %v362_v17  ;;  %v1647_v49 = vsub.s32 3, %v362_v17  ;;  %v1652_v51 = vsub.s32 7, %v362_v17 }
  0x33   : > { %1439 = vset.pattern.permute.xlu1 %v1490_v19  ;;  %1450 = vset.pattern.permute.xlu0 %v1491_v20  ;;  %v273_v19 = vadd.f32 %v272_v12, %v270_v11  ;;  %v278_v20 = vadd.f32 %v277_v14, %v275_v13 }
  0x34   : > { %749 = vperm.xlu1 %1439, %v1535_v0   ;;  %1038 = vperm.xlu0 %1450, %v1535_v0  }
  0x38   : > { %1440 = vset.pattern.permute.xlu1 %v1492_v21  ;;  %1453 = vset.pattern.permute.xlu0 %v1493_v22  ;;  %v316_v21 = vmul.f32 0.8333333, %v216_v41  ;;  %v1463_v22 = vpop.eup %1462  ;;  %v319_v41 = vmul.f32 0.8333333, %v1592_v38 }
  0x39   : > { %775 = vperm.xlu1 %1440, %v1535_v0   ;;  %1117 = vperm.xlu0 %1453, %v1535_v0  }
  0x3a   : > { %v320_v56 = vmul.f32 %v319_v41, %v278_v20 }
  0x3d   : > { %1442 = vset.pattern.permute.xlu1 %v1494_v23  ;;  %1456 = vset.pattern.permute.xlu0 %v1495_v24  ;;  %v222_v23 = vmul.f32 %v221_v15, %v170_v54  ;;  %v225_v24 = vmul.f32 %v224_v16, %v174_v18 }
  0x3e   : > { %828 = vperm.xlu1 %1442, %v1535_v0   ;;  %1195 = vperm.xlu0 %1456, %v1535_v0  }
  0x42   : > { %1443 = vset.pattern.permute.xlu1 %v1496_v25  ;;  %1459 = vset.pattern.permute.xlu0 %v1497_v26  ;;  %v1620_v25 = vadd.f32 0.6, %v1575_v32  ;;  %v1623_v26 = vsub.f32 0.2, %v1575_v32 }
  0x43   : > { %854 = vperm.xlu1 %1443, %v1535_v0   ;;  %1274 = vperm.xlu0 %1459, %v1535_v0  }
  0x44   : > { %v228_v44 = vmul.f32 2.5, %v1620_v25  ;;  %v231_v45 = vmul.f32 2.5, %v1623_v26  ;;  %v286_v57 = vmul.f32 1.25, %v1623_v26 }
  0x46   : > { %v229_v59 = vmul.f32 %v228_v44, %v174_v18  ;;  %v232_v60 = vmul.f32 %v231_v45, %v1650_v50 }
  0x47   : > { %1445 = vset.pattern.permute.xlu1 %v1498_v27  ;;  %v1625_v27 = vsub.s32 2, %v362_v17 }
  0x48   : > { %907 = vperm.xlu1 %1445, %v1535_v0   ;;  %v1699_v44 = vadd.f32 %v232_v60, %v229_v59 }
  0x4c   : > { %1446 = vset.pattern.permute.xlu1 %v1499_v28  ;;  %v1627_v28 = vsub.s32 6, %v362_v17 }
  0x4d   : > { %933 = vperm.xlu1 %1446, %v1535_v0  }
  0x51   : > { %1448 = vset.pattern.permute.xlu1 %v1500_v29  ;;  %v1629_v29 = vsub.s32 0, %v362_v17 }
  0x52   : > { %985 = vperm.xlu1 %1448, %v1535_v0  }
  0x56   : > { %1449 = vset.pattern.permute.xlu1 %v1501_v30  ;;  %v1631_v30 = vsub.s32 4, %v362_v17 }
  0x57   : > { %1012 = vperm.xlu1 %1449, %v1535_v0  }
  0x5b   : > { %1451 = vset.pattern.permute.xlu1 %v1502_v31  ;;  %v1633_v31 = vsub.s32 1, %v362_v17 }
  0x5c   : > { %1064 = vperm.xlu1 %1451, %v1535_v0  }
  0x60   : > { %1452 = vset.pattern.permute.xlu1 %v1503_v34  ;;  %v317_v34 = vmul.f32 %v316_v21, %v278_v20 }
  0x61   : > { %1090 = vperm.xlu1 %1452, %v1535_v0  }
  0x65   : > { %1454 = vset.pattern.permute.xlu1 %v1504_v35  ;;  %v279_v35 = vmul.f32 1.25, %v1596_v40 }
  0x66   : > { %1143 = vperm.xlu1 %1454, %v1535_v0  }
  0x67   : > { %v280_v38 = vmul.f32 %v279_v35, %v219_v6 }
  0x6a   : > { %1455 = vset.pattern.permute.xlu1 %v1505_v42  ;;  %v226_v42 = vadd.f32 %v225_v24, %v222_v23 }
  0x6b   : > { %1169 = vperm.xlu1 %1455, %v1535_v0  }
  0x6c   : > { %v1660_v61 = vmul.f32 %v284_v46, %v226_v42 }
  0x6f   : > { %1457 = vset.pattern.permute.xlu1 %v1507_v58  ;;  %v282_v58 = vmul.f32 %v281_v39, %v226_v42 }
  0x70   : > { %1222 = vperm.xlu1 %1457, %v1535_v0  }
  0x71   : > { %v1686_v17 = vadd.f32 %v282_v58, %v280_v38 }
  0x73   : > { %v322_v42 = vmul.f32 %v321_v53, %v1686_v17 }
  0x74   : > { %1458 = vset.pattern.permute.xlu1 %v1508_v7  ;;  %v1671_v7 = vadd.f32 0.2, %v1575_v32 }
  0x75   : > { %1248 = vperm.xlu1 %1458, %v1535_v0   ;;  %v314_v0 = vmul.f32 0.8333333, %v1367_v36  ;;  %v154_v36 = vmul.f32 %v1463_v22, %v1575_v32 }
  0x77   : > { %v315_v33 = vmul.f32 %v314_v0, %v273_v19  ;;  %v364_v47 = vrot.slane %v154_v36, %v1629_v29  ;;  %v368_v48 = vrot.slane %v154_v36, %v1631_v30  ;;  %v388_v54 = vrot.slane %v154_v36, %v1633_v31 }
  0x78   : > { %v392_v55 = vrot.slane %v154_v36, %v1639_v37  ;;  %v414_v63 = vrot.slane %v154_v36, %v1625_v27  ;;  %v418_v1 = vrot.slane %v154_v36, %v1627_v28  ;;  %v440_v10 = vrot.slane %v154_v36, %v1647_v49 }
  0x79   : > { %v1654_v52 = vadd.f32 %v317_v34, %v315_v33  ;;  %v374_v3 = vrot.slane %v364_v47, %v1629_v29  ;;  %v378_v4 = vrot.slane %v368_v48, %v1629_v29  ;;  %v444_v11 = vrot.slane %v154_v36, %v1652_v51 }
  0x7a   : > { %v398_v12 = vrot.slane %v388_v54, %v1633_v31  ;;  %v402_v13 = vrot.slane %v392_v55, %v1633_v31  ;;  %v424_v18 = vrot.slane %v414_v63, %v1625_v27  ;;  %v428_v19 = vrot.slane %v418_v1, %v1625_v27 }
  0x7b   : > { %v467_v5 = vrot.slane %v1654_v52, %v1629_v29  ;;  %v471_v6 = vrot.slane %v1654_v52, %v1631_v30  ;;  %v493_v14 = vrot.slane %v1654_v52, %v1633_v31  ;;  %v497_v15 = vrot.slane %v1654_v52, %v1639_v37 }
  0x7c   : > { %v519_v16 = vrot.slane %v1654_v52, %v1625_v27  ;;  %v523_v33 = vrot.slane %v1654_v52, %v1627_v28  ;;  %v545_v34 = vrot.slane %v1654_v52, %v1647_v49  ;;  %v450_v35 = vrot.slane %v440_v10, %v1647_v49 }
  0x7d   : > { %v477_v23 = vrot.slane %v467_v5, %v1629_v29  ;;  %v481_v24 = vrot.slane %v471_v6, %v1629_v29  ;;  %v454_v36 = vrot.slane %v444_v11, %v1647_v49  ;;  %v503_v38 = vrot.slane %v493_v14, %v1633_v31 }
  0x7e   : > { %v507_v54 = vrot.slane %v497_v15, %v1633_v31  ;;  %v529_v55 = vrot.slane %v519_v16, %v1625_v27  ;;  %v549_v58 = vrot.slane %v1654_v52, %v1652_v51  ;;  %v235_v5 = vmul.f32 2.5, %v1671_v7 }
  0x7f   : > { %v287_v52 = vmul.f32 %v286_v57, %v1699_v44  ;;  %v238_v11 = vmul.f32 2.5, %v1674_v9  ;;  %v533_v14 = vrot.slane %v523_v33, %v1625_v27  ;;  %v1719_v15 = vsel %vm181_vm4, 1.0, %v1506_v43 }
  0x80   : > { %v559_v57 = vrot.slane %v549_v58, %v1647_v49 }
  0x81   : > { %v239_v33 = vmul.f32 %v238_v11, %v1719_v15  ;;  %v329_v11 = vmul.f32 0.8333333, %v1612_v8 }
  0x86   : > { %v409_v62 = vpop.permute.xlu1 %408  ;;  %v358_v2 = vpop.permute.xlu0 %357 }
  0x87   : > { %v379_v20 = vmul.f32 %v374_v3, %v358_v2  ;;  %v380_v0 = vmul.f32 %v378_v4, %v358_v2  ;;  %v429_v45 = vmul.f32 %v424_v18, %v409_v62  ;;  %v430_v46 = vmul.f32 %v428_v19, %v409_v62 }
  0x88   : > { %v1712_v4 = vadd.f32 %v322_v42, %v320_v56  ;;  %v324_v56 = vmul.f32 0.8333333, %v1596_v40  ;;  %v326_v19 = vmul.f32 0.8333333, %v1623_v26  ;;  %v289_v40 = vmul.f32 1.25, %v1620_v25 }
  0x8a   : > { %v325_v42 = vmul.f32 %v324_v56, %v1686_v17  ;;  %v1749_v17 = vsub.f32 1.0, %v1575_v32 }
  0x8b   : > { %v435_v21 = vpop.permute.xlu1 %434  ;;  %v383_v22 = vpop.permute.xlu0 %382 }
  0x8c   : > { %v403_v39 = vmul.f32 %v398_v12, %v383_v22  ;;  %v404_v41 = vmul.f32 %v402_v13, %v383_v22  ;;  %v455_v53 = vmul.f32 %v450_v35, %v435_v21  ;;  %v456_v59 = vmul.f32 %v454_v36, %v435_v21 }
  0x8d   : > { %v572_v21 = vrot.slane %v1712_v4, %v1629_v29  ;;  %v576_v22 = vrot.slane %v1712_v4, %v1631_v30  ;;  %v245_v8 = vmul.f32 2.5, %v1749_v17 }
  0x8e   : > { %v405_v47 = vadd.f32 %v403_v39, %v379_v20  ;;  %v406_v48 = vadd.f32 %v404_v41, %v380_v0  ;;  %v555_v0 = vrot.slane %v545_v34, %v1647_v49  ;;  %v598_v39 = vrot.slane %v1712_v4, %v1633_v31 }
  0x8f   : > { %v602_v41 = vrot.slane %v1712_v4, %v1639_v37 }
  0x90   : > { %v431_v60 = vadd.f32 %v429_v45, %v405_v47  ;;  %v432_v63 = vadd.f32 %v430_v46, %v406_v48  ;;  %v461_v1 = vpop.permute.xlu1 %460  ;;  %v488_v2 = vpop.permute.xlu0 %487  ;;  %v586_v45 = vrot.slane %v576_v22, %v1629_v29 }
  0x91   : > { %v482_v62 = vmul.f32 %v477_v23, %v461_v1  ;;  %v483_v3 = vmul.f32 %v481_v24, %v461_v1  ;;  %v508_v12 = vmul.f32 %v503_v38, %v488_v2  ;;  %v509_v13 = vmul.f32 %v507_v54, %v488_v2 }
  0x92   : > { %v457_v6 = vadd.f32 %v455_v53, %v431_v60  ;;  %v458_v10 = vadd.f32 %v456_v59, %v432_v63  ;;  %v288_v23 = vadd.f32 %v287_v52, %v1660_v61  ;;  %v236_v24 = vmul.f32 %v235_v5, %v1650_v50 }
  0x93   : > { %v291_v61 = vmul.f32 1.25, %v1674_v9  ;;  %v582_v50 = vrot.slane %v572_v21, %v1629_v29  ;;  %v1746_v54 = vadd.f32 -0.2, %v1575_v32  ;;  %v608_v60 = vrot.slane %v598_v39, %v1633_v31 }
  0x94   : > { %v484_v16 = vadd.f32 %v482_v62, %v457_v6  ;;  %v485_v18 = vadd.f32 %v483_v3, %v458_v10  ;;  %v327_v48 = vmul.f32 %v326_v19, %v288_v23  ;;  %v1743_v38 = vadd.f32 %v239_v33, %v236_v24 }
  0x95   : > { %v514_v20 = vpop.permute.xlu1 %513  ;;  %v566_v47 = vpop.permute.xlu0 %565  ;;  %v612_v63 = vrot.slane %v602_v41, %v1633_v31  ;;  %v624_v1 = vrot.slane %v1712_v4, %v1625_v27  ;;  %v628_v2 = vrot.slane %v1712_v4, %v1627_v28  ;;  %v290_v52 = vmul.f32 %v289_v40, %v1699_v44 }
  0x96   : > { %v510_v26 = vadd.f32 %v508_v12, %v484_v16  ;;  %v511_v35 = vadd.f32 %v509_v13, %v485_v18  ;;  %v534_v36 = vmul.f32 %v529_v55, %v514_v20  ;;  %v535_v34 = vmul.f32 %v533_v14, %v514_v20 }
  0x97   : > { %v587_v5 = vmul.f32 %v582_v50, %v566_v47  ;;  %v588_v6 = vmul.f32 %v586_v45, %v566_v47  ;;  %v1761_v10 = vadd.f32 %v327_v48, %v325_v42  ;;  %v650_v13 = vrot.slane %v1712_v4, %v1647_v49 }
  0x98   : > { %v536_v55 = vadd.f32 %v534_v36, %v510_v26  ;;  %v537_v58 = vadd.f32 %v535_v34, %v511_v35  ;;  %v654_v14 = vrot.slane %v1712_v4, %v1652_v51  ;;  %v1770_v16 = vsel %vm185_vm7, 1.0, %v1506_v43 }
  0x99   : > { %v242_v18 = vmul.f32 2.5, %v1746_v54  ;;  %v634_v56 = vrot.slane %v624_v1, %v1625_v27  ;;  %v638_v19 = vrot.slane %v628_v2, %v1625_v27  ;;  %v292_v44 = vmul.f32 %v291_v61, %v1743_v38 }
  0x9a   : > { %v540_v46 = vpop.permute.xlu1 %539  ;;  %v677_v4 = vrot.slane %v1761_v10, %v1629_v29  ;;  %v681_v22 = vrot.slane %v1761_v10, %v1631_v30  ;;  %v331_v24 = vmul.f32 0.8333333, %v1674_v9  ;;  %v660_v33 = vrot.slane %v650_v13, %v1647_v49  ;;  %v645_v34 = vpop.permute.xlu0 %644 }
  0x9b   : > { %v560_v53 = vmul.f32 %v555_v0, %v540_v46  ;;  %v561_v59 = vmul.f32 %v559_v57, %v540_v46  ;;  %v664_v40 = vrot.slane %v654_v14, %v1647_v49  ;;  %v330_v26 = vmul.f32 %v329_v11, %v288_v23 }
  0x9c   : > { %v243_v35 = vmul.f32 %v242_v18, %v1719_v15  ;;  %v293_v39 = vadd.f32 %v292_v44, %v290_v52  ;;  %v246_v41 = vmul.f32 %v245_v8, %v1770_v16  ;;  %v294_v42 = vmul.f32 1.25, %v1671_v7 }
  0x9d   : > { %v562_v62 = vadd.f32 %v560_v53, %v536_v55  ;;  %v563_v3 = vadd.f32 %v561_v59, %v537_v58  ;;  %v296_v61 = vmul.f32 1.25, %v1749_v17  ;;  %v687_v47 = vrot.slane %v677_v4, %v1629_v29 }
  0x9e   : > { %v691_v48 = vrot.slane %v681_v22, %v1629_v29  ;;  %v703_v15 = vrot.slane %v1761_v10, %v1633_v31  ;;  %v707_v23 = vrot.slane %v1761_v10, %v1639_v37  ;;  %v665_v53 = vmul.f32 %v660_v33, %v645_v34 }
  0x9f   : > { %v593_v12 = vpop.permute.xlu1 %592  ;;  %v589_v20 = vadd.f32 %v587_v5, %v562_v62  ;;  %v590_v0 = vadd.f32 %v588_v6, %v563_v3  ;;  %v666_v59 = vmul.f32 %v664_v40, %v645_v34  ;;  %v729_v2 = vrot.slane %v1761_v10, %v1625_v27  ;;  %v724_v22 = vpop.permute.xlu0 %723 }
  0xa0   : > { %v613_v57 = vmul.f32 %v608_v60, %v593_v12  ;;  %v614_v21 = vmul.f32 %v612_v63, %v593_v12  ;;  %v332_v60 = vmul.f32 %v331_v24, %v293_v39  ;;  %v1794_v63 = vadd.f32 %v246_v41, %v243_v35 }
  0xa1   : > { %v733_v62 = vrot.slane %v1761_v10, %v1627_v28  ;;  %v1803_v3 = vadd.f32 -0.6, %v1575_v32  ;;  %v713_v5 = vrot.slane %v703_v15, %v1633_v31  ;;  %v717_v6 = vrot.slane %v707_v23, %v1633_v31 }
  0xa2   : > { %v615_v50 = vadd.f32 %v613_v57, %v589_v20  ;;  %v616_v45 = vadd.f32 %v614_v21, %v590_v0  ;;  %v755_v52 = vrot.slane %v1761_v10, %v1647_v49  ;;  %v1810_v11 = vsub.f32 1.4, %v1575_v32 }
  0xa3   : > { %v295_v44 = vmul.f32 %v294_v42, %v1743_v38  ;;  %v297_v8 = vmul.f32 %v296_v61, %v1794_v63  ;;  %v739_v20 = vrot.slane %v729_v2, %v1625_v27  ;;  %v743_v0 = vrot.slane %v733_v62, %v1625_v27 }
  0xa4   : > { %v619_v36 = vpop.permute.xlu1 %618  ;;  %v334_v57 = vmul.f32 0.8333333, %v1620_v25  ;;  %v336_v21 = vmul.f32 0.8333333, %v1749_v17  ;;  %v765_v24 = vrot.slane %v755_v52, %v1647_v49  ;;  %v249_v33 = vmul.f32 2.5, %v1803_v3 }
  0xa5   : > { %v639_v46 = vmul.f32 %v634_v56, %v619_v36  ;;  %v640_v9 = vmul.f32 %v638_v19, %v619_v36  ;;  %v759_v56 = vrot.slane %v1761_v10, %v1652_v51  ;;  %v1814_v19 = vadd.f32 %v332_v60, %v330_v26 }
  0xa6   : > { %v1824_v10 = vsel %vm189_vm10, 1.0, %v1506_v43  ;;  %v252_v38 = vmul.f32 2.5, %v1810_v11  ;;  %v298_v41 = vadd.f32 %v297_v8, %v295_v44 }
  0xa7   : > { %v641_v55 = vadd.f32 %v639_v46, %v615_v50  ;;  %v642_v58 = vadd.f32 %v640_v9, %v616_v45  ;;  %v769_v34 = vrot.slane %v759_v56, %v1647_v49  ;;  %v782_v25 = vrot.slane %v1814_v19, %v1629_v29  ;;  %v803_v56 = vpop.permute.xlu0 %802 }
  0xa8   : > { %v786_v17 = vrot.slane %v1814_v19, %v1631_v30  ;;  %v744_v50 = vmul.f32 %v739_v20, %v724_v22  ;;  %v745_v45 = vmul.f32 %v743_v0, %v724_v22  ;;  %v335_v46 = vmul.f32 %v334_v57, %v293_v39 }
  0xa9   : > { %v671_v1 = vpop.permute.xlu1 %670  ;;  %v667_v12 = vadd.f32 %v665_v53, %v641_v55  ;;  %v668_v13 = vadd.f32 %v666_v59, %v642_v58  ;;  %v250_v9 = vmul.f32 %v249_v33, %v1770_v16  ;;  %v808_v15 = vrot.slane %v1814_v19, %v1633_v31 }
  0xaa   : > { %v692_v14 = vmul.f32 %v687_v47, %v671_v1  ;;  %v693_v18 = vmul.f32 %v691_v48, %v671_v1  ;;  %v253_v47 = vmul.f32 %v252_v38, %v1824_v10  ;;  %v812_v23 = vrot.slane %v1814_v19, %v1639_v37 }
  0xab   : > { %v834_v55 = vrot.slane %v1814_v19, %v1625_v27  ;;  %v299_v58 = vmul.f32 1.25, %v1746_v54  ;;  %v792_v53 = vrot.slane %v782_v25, %v1629_v29  ;;  %v796_v39 = vrot.slane %v786_v17, %v1629_v29 }
  0xac   : > { %v694_v40 = vadd.f32 %v692_v14, %v667_v12  ;;  %v695_v26 = vadd.f32 %v693_v18, %v668_v13  ;;  %v838_v16 = vrot.slane %v1814_v19, %v1627_v28  ;;  %v337_v59 = vmul.f32 %v336_v21, %v298_v41 }
  0xad   : > { %v1850_v52 = vadd.f32 %v253_v47, %v250_v9  ;;  %v301_v12 = vmul.f32 1.25, %v1810_v11  ;;  %v818_v13 = vrot.slane %v808_v15, %v1633_v31  ;;  %v822_v14 = vrot.slane %v812_v23, %v1633_v31 }
  0xae   : > { %v698_v4 = vpop.permute.xlu1 %697  ;;  %v844_v44 = vrot.slane %v834_v55, %v1625_v27  ;;  %v1858_v8 = vadd.f32 %v337_v59, %v335_v46  ;;  %v1864_v20 = vsub.f32 1.8, %v1575_v32  ;;  %v848_v22 = vrot.slane %v838_v16, %v1625_v27 }
  0xaf   : > { %v718_v35 = vmul.f32 %v713_v5, %v698_v4  ;;  %v719_v36 = vmul.f32 %v717_v6, %v698_v4  ;;  %v860_v5 = vrot.slane %v1814_v19, %v1647_v49  ;;  %v864_v6 = vrot.slane %v1814_v19, %v1652_v51 }
  0xb0   : > { %v1861_v19 = vadd.f32 -1.0, %v1575_v32  ;;  %v302_v33 = vmul.f32 %v301_v12, %v1850_v52  ;;  %v339_v38 = vmul.f32 0.8333333, %v1671_v7  ;;  %v887_v25 = vrot.slane %v1858_v8, %v1629_v29 }
  0xb1   : > { %v720_v42 = vadd.f32 %v718_v35, %v694_v40  ;;  %v721_v61 = vadd.f32 %v719_v36, %v695_v26  ;;  %v823_v35 = vmul.f32 %v818_v13, %v803_v56  ;;  %v824_v36 = vmul.f32 %v822_v14, %v803_v56 }
  0xb2   : > { %v259_v17 = vmul.f32 2.5, %v1864_v20  ;;  %v891_v7 = vrot.slane %v1858_v8, %v1631_v30  ;;  %v874_v46 = vrot.slane %v864_v6, %v1647_v49  ;;  %v340_v47 = vmul.f32 %v339_v38, %v298_v41 }
  0xb3   : > { %v750_v48 = vpop.permute.xlu1 %749  ;;  %v746_v60 = vadd.f32 %v744_v50, %v720_v42  ;;  %v747_v1 = vadd.f32 %v745_v45, %v721_v61  ;;  %v913_v61 = vrot.slane %v1858_v8, %v1633_v31  ;;  %v917_v50 = vrot.slane %v1858_v8, %v1639_v37 }
  0xb4   : > { %v770_v2 = vmul.f32 %v765_v24, %v750_v48  ;;  %v771_v62 = vmul.f32 %v769_v34, %v750_v48  ;;  %v300_v24 = vmul.f32 %v299_v58, %v1794_v63  ;;  %v870_v34 = vrot.slane %v860_v5, %v1647_v49 }
  0xb5   : > { %v256_v63 = vmul.f32 2.5, %v1861_v19  ;;  %v194_v45 = vsel %vm193_vm13, 1.0, %v1506_v43  ;;  %v341_v48 = vmul.f32 0.8333333, %v1810_v11  ;;  %v923_v41 = vrot.slane %v913_v61, %v1633_v31 }
  0xb6   : > { %v772_v0 = vadd.f32 %v770_v2, %v746_v60  ;;  %v773_v57 = vadd.f32 %v771_v62, %v747_v1  ;;  %v303_v9 = vadd.f32 %v302_v33, %v300_v24  ;;  %v260_v59 = vmul.f32 %v259_v17, %v194_v45  ;;  %v881_v62 = vpop.permute.xlu0 %880 }
  0xb7   : > { %v257_v16 = vmul.f32 %v256_v63, %v1824_v10  ;;  %v897_v60 = vrot.slane %v887_v25, %v1629_v29  ;;  %v901_v1 = vrot.slane %v891_v7, %v1629_v29  ;;  %v927_v11 = vrot.slane %v917_v50, %v1633_v31 }
  0xb8   : > { %v776_v18 = vpop.permute.xlu1 %775  ;;  %v342_v5 = vmul.f32 %v341_v48, %v303_v9  ;;  %v304_v6 = vmul.f32 1.25, %v1803_v3  ;;  %v306_v56 = vmul.f32 1.25, %v1864_v20  ;;  %v965_v24 = vrot.slane %v1858_v8, %v1647_v49 }
  0xb9   : > { %v797_v21 = vmul.f32 %v792_v53, %v776_v18  ;;  %v798_v4 = vmul.f32 %v796_v39, %v776_v18  ;;  %v939_v53 = vrot.slane %v1858_v8, %v1625_v27  ;;  %v943_v39 = vrot.slane %v1858_v8, %v1627_v28 }
  0xba   : > { %v1900_v18 = vadd.f32 %v260_v59, %v257_v16  ;;  %v969_v33 = vrot.slane %v1858_v8, %v1652_v51  ;;  %v343_v38 = vadd.f32 %v342_v5, %v340_v47  ;;  %v198_v25 = vsel %vm197_vm0, 1.0, %v1506_v43 }
  0xbb   : > { %v799_v40 = vadd.f32 %v797_v21, %v772_v0  ;;  %v800_v26 = vadd.f32 %v798_v4, %v773_v57  ;;  %v1905_v0 = vsub.f32 2.2, %v1575_v32  ;;  %v902_v4 = vmul.f32 %v897_v60, %v881_v62 }
  0xbc   : > { %v992_v50 = vrot.slane %v343_v38, %v1629_v29  ;;  %v975_v47 = vrot.slane %v965_v24, %v1647_v49 }
  0xbd   : > { %v829_v42 = vpop.permute.xlu1 %828  ;;  %v825_v15 = vadd.f32 %v823_v35, %v799_v40  ;;  %v826_v23 = vadd.f32 %v824_v36, %v800_v26  ;;  %v949_v26 = vrot.slane %v939_v53, %v1625_v27  ;;  %v953_v35 = vrot.slane %v943_v39, %v1625_v27 }
  0xbe   : > { %v849_v55 = vmul.f32 %v844_v44, %v829_v42  ;;  %v850_v58 = vmul.f32 %v848_v22, %v829_v42  ;;  %v1376_v44 = vadd.f32 -1.4, %v1575_v32  ;;  %v903_v22 = vmul.f32 %v901_v1, %v881_v62 }
  0xbf   : > { %v305_v32 = vmul.f32 %v304_v6, %v1850_v52  ;;  %v344_v36 = vmul.f32 0.8333333, %v1746_v54  ;;  %v266_v17 = vmul.f32 2.5, %v1905_v0  ;;  %v979_v52 = vrot.slane %v969_v33, %v1647_v49 }
  0xc0   : > { %v851_v12 = vadd.f32 %v849_v55, %v825_v15  ;;  %v852_v10 = vadd.f32 %v850_v58, %v826_v23  ;;  %v263_v63 = vmul.f32 2.5, %v1376_v44  ;;  %v346_v54 = vmul.f32 0.8333333, %v1864_v20  ;;  %v960_v15 = vpop.permute.xlu0 %959 }
  0xc1   : > { %v345_v23 = vmul.f32 %v344_v36, %v303_v9  ;;  %v267_v58 = vmul.f32 %v266_v17, %v198_v25  ;;  %v1002_v60 = vrot.slane %v992_v50, %v1629_v29  ;;  %v980_v62 = vmul.f32 %v975_v47, %v960_v15 }
  0xc2   : > { %v855_v2 = vpop.permute.xlu1 %854  ;;  %v264_v55 = vmul.f32 %v263_v63, %v194_v45  ;;  %v981_v5 = vmul.f32 %v979_v52, %v960_v15  ;;  %v309_v45 = vmul.f32 1.25, %v1861_v19 }
  0xc3   : > { %v875_v13 = vmul.f32 %v870_v34, %v855_v2  ;;  %v876_v14 = vmul.f32 %v874_v46, %v855_v2  ;;  %v307_v34 = vmul.f32 %v306_v56, %v1900_v18  ;;  %v996_v46 = vrot.slane %v343_v38, %v1631_v30 }
  0xc4   : > { %v268_v9 = vadd.f32 %v267_v58, %v264_v55 }
  0xc5   : > { %v877_v57 = vadd.f32 %v875_v13, %v851_v12  ;;  %v878_v21 = vadd.f32 %v876_v14, %v852_v10  ;;  %v308_v43 = vadd.f32 %v307_v34, %v305_v32  ;;  %v1006_v1 = vrot.slane %v996_v46, %v1629_v29  ;;  %v1039_v34 = vpop.permute.xlu0 %1038 }
  0xc6   : > { %v311_v12 = vmul.f32 1.25, %v1905_v0  ;;  %v1044_v13 = vrot.slane %v343_v38, %v1625_v27  ;;  %v1048_v14 = vrot.slane %v343_v38, %v1627_v28  ;;  %v351_v46 = vmul.f32 0.8333333, %v1905_v0 }
  0xc7   : > { %v908_v40 = vpop.permute.xlu1 %907  ;;  %v904_v42 = vadd.f32 %v902_v4, %v877_v57  ;;  %v905_v7 = vadd.f32 %v903_v22, %v878_v21  ;;  %v347_v6 = vmul.f32 %v346_v54, %v308_v43  ;;  %v1070_v57 = vrot.slane %v343_v38, %v1647_v49 }
  0xc8   : > { %v928_v8 = vmul.f32 %v923_v41, %v908_v40  ;;  %v929_v61 = vmul.f32 %v927_v11, %v908_v40  ;;  %v1018_v41 = vrot.slane %v343_v38, %v1633_v31  ;;  %v1022_v11 = vrot.slane %v343_v38, %v1639_v37 }
  0xc9   : > { %v1074_v21 = vrot.slane %v343_v38, %v1652_v51  ;;  %v348_v19 = vadd.f32 %v347_v6, %v345_v23  ;;  %v310_v40 = vmul.f32 %v309_v45, %v1900_v18  ;;  %v1058_v32 = vrot.slane %v1048_v14, %v1625_v27 }
  0xca   : > { %v930_v53 = vadd.f32 %v928_v8, %v904_v42  ;;  %v931_v39 = vadd.f32 %v929_v61, %v905_v7  ;;  %v1028_v56 = vrot.slane %v1018_v41, %v1633_v31  ;;  %v1032_v44 = vrot.slane %v1022_v11, %v1633_v31 }
  0xcb   : > { %v1080_v25 = vrot.slane %v1070_v57, %v1647_v49  ;;  %v1084_v63 = vrot.slane %v1074_v21, %v1647_v49  ;;  %v349_v38 = vmul.f32 0.8333333, %v1803_v3  ;;  %v1097_v61 = vrot.slane %v348_v19, %v1629_v29 }
  0xcc   : > { %v934_v48 = vpop.permute.xlu1 %933  ;;  %v1101_v18 = vrot.slane %v348_v19, %v1631_v30  ;;  %v1123_v23 = vrot.slane %v348_v19, %v1633_v31  ;;  %v1127_v3 = vrot.slane %v348_v19, %v1639_v37  ;;  %v1149_v0 = vrot.slane %v348_v19, %v1625_v27 }
  0xcd   : > { %v954_v16 = vmul.f32 %v949_v26, %v934_v48  ;;  %v955_v59 = vmul.f32 %v953_v35, %v934_v48  ;;  %v312_v26 = vmul.f32 %v311_v12, %v268_v9  ;;  %v1054_v35 = vrot.slane %v1044_v13, %v1625_v27 }
  0xce   : > { %v1060_v48 = vmul.f32 %v1058_v32, %v1039_v34  ;;  %v1107_v55 = vrot.slane %v1097_v61, %v1629_v29  ;;  %v1111_v58 = vrot.slane %v1101_v18, %v1629_v29  ;;  %v1153_v41 = vrot.slane %v348_v19, %v1627_v28 }
  0xcf   : > { %v956_v2 = vadd.f32 %v954_v16, %v930_v53  ;;  %v957_v20 = vadd.f32 %v955_v59, %v931_v39  ;;  %v313_v50 = vadd.f32 %v312_v26, %v310_v40  ;;  %v1059_v54 = vmul.f32 %v1054_v35, %v1039_v34 }
  0xd0   : > { %v350_v53 = vmul.f32 %v349_v38, %v308_v43  ;;  %v1133_v11 = vrot.slane %v1123_v23, %v1633_v31  ;;  %v1159_v12 = vrot.slane %v1149_v0, %v1625_v27  ;;  %v1175_v13 = vrot.slane %v348_v19, %v1647_v49 }
  0xd1   : > { %v986_v10 = vpop.permute.xlu1 %985  ;;  %v982_v4 = vadd.f32 %v980_v62, %v956_v2  ;;  %v983_v22 = vadd.f32 %v981_v5, %v957_v20  ;;  %v352_v39 = vmul.f32 %v351_v46, %v313_v50  ;;  %v1137_v2 = vrot.slane %v1127_v3, %v1633_v31  ;;  %v1118_v62 = vpop.permute.xlu0 %1117 }
  0xd2   : > { %v1007_v24 = vmul.f32 %v1002_v60, %v986_v10  ;;  %v1008_v33 = vmul.f32 %v1006_v1, %v986_v10  ;;  %v1163_v10 = vrot.slane %v1153_v41, %v1625_v27  ;;  %v1179_v14 = vrot.slane %v348_v19, %v1652_v51 }
  0xd3   : > { %v353_v5 = vadd.f32 %v352_v39, %v350_v53  ;;  %v1138_v57 = vmul.f32 %v1133_v11, %v1118_v62  ;;  %v1139_v21 = vmul.f32 %v1137_v2, %v1118_v62 }
  0xd4   : > { %v1009_v17 = vadd.f32 %v1007_v24, %v982_v4  ;;  %v1010_v42 = vadd.f32 %v1008_v33, %v983_v22  ;;  %v1185_v33 = vrot.slane %v1175_v13, %v1647_v49  ;;  %v1189_v40 = vrot.slane %v1179_v14, %v1647_v49 }
  0xd5   : > { %v1202_v22 = vrot.slane %v353_v5, %v1629_v29  ;;  %v1206_v24 = vrot.slane %v353_v5, %v1631_v30  ;;  %v1228_v26 = vrot.slane %v353_v5, %v1633_v31  ;;  %v1232_v35 = vrot.slane %v353_v5, %v1639_v37 }
  0xd6   : > { %v1013_v36 = vpop.permute.xlu1 %1012  ;;  %v1254_v37 = vrot.slane %v353_v5, %v1625_v27  ;;  %v1258_v50 = vrot.slane %v353_v5, %v1627_v28  ;;  %v1280_v46 = vrot.slane %v353_v5, %v1647_v49 }
  0xd7   : > { %v1033_v7 = vmul.f32 %v1028_v56, %v1013_v36  ;;  %v1034_v8 = vmul.f32 %v1032_v44, %v1013_v36  ;;  %v1238_v30 = vrot.slane %v1228_v26, %v1633_v31 }
  0xd8   : > { %v1264_v23 = vrot.slane %v1254_v37, %v1625_v27  ;;  %v1290_v3 = vrot.slane %v1280_v46, %v1647_v49 }
  0xd9   : > { %v1035_v47 = vadd.f32 %v1033_v7, %v1009_v17  ;;  %v1036_v52 = vadd.f32 %v1034_v8, %v1010_v42  ;;  %v1196_v17 = vpop.permute.xlu0 %1195  ;;  %v1242_v42 = vrot.slane %v1232_v35, %v1633_v31  ;;  %v1268_v31 = vrot.slane %v1258_v50, %v1625_v27 }
  0xdb   : > { %v1065_v15 = vpop.permute.xlu1 %1064  ;;  %v1061_v16 = vadd.f32 %v1059_v54, %v1035_v47  ;;  %v1062_v59 = vadd.f32 %v1060_v48, %v1036_v52  ;;  %v1284_v47 = vrot.slane %v353_v5, %v1652_v51 }
  0xdc   : > { %v1085_v60 = vmul.f32 %v1080_v25, %v1065_v15  ;;  %v1086_v1 = vmul.f32 %v1084_v63, %v1065_v15  ;;  %v1212_v25 = vrot.slane %v1202_v22, %v1629_v29  ;;  %v1216_v63 = vrot.slane %v1206_v24, %v1629_v29 }
  0xde   : > { %v1087_v6 = vadd.f32 %v1085_v60, %v1061_v16  ;;  %v1088_v9 = vadd.f32 %v1086_v1, %v1062_v59  ;;  %v1217_v54 = vmul.f32 %v1212_v25, %v1196_v17  ;;  %v1218_v48 = vmul.f32 %v1216_v63, %v1196_v17  ;;  %v1275_v16 = vpop.permute.xlu0 %1274 }
  0xdf   : > { %v1295_v59 = vmul.f32 %v1290_v3, %v1275_v16 }
  0xe0   : > { %v1091_v20 = vpop.permute.xlu1 %1090 }
  0xe1   : > { %v1112_v45 = vmul.f32 %v1107_v55, %v1091_v20  ;;  %v1113_v43 = vmul.f32 %v1111_v58, %v1091_v20  ;;  %v1294_v55 = vrot.slane %v1284_v47, %v1647_v49 }
  0xe3   : > { %v1114_v56 = vadd.f32 %v1112_v45, %v1087_v6  ;;  %v1115_v44 = vadd.f32 %v1113_v43, %v1088_v9  ;;  %v1296_v60 = vmul.f32 %v1294_v55, %v1275_v16 }
  0xe5   : > { %v1144_v4 = vpop.permute.xlu1 %1143  ;;  %v1140_v32 = vadd.f32 %v1138_v57, %v1114_v56  ;;  %v1141_v36 = vadd.f32 %v1139_v21, %v1115_v44 }
  0xe6   : > { %v1164_v19 = vmul.f32 %v1159_v12, %v1144_v4  ;;  %v1165_v34 = vmul.f32 %v1163_v10, %v1144_v4 }
  0xe8   : > { %v1166_v7 = vadd.f32 %v1164_v19, %v1140_v32  ;;  %v1167_v8 = vadd.f32 %v1165_v34, %v1141_v36 }
  0xea   : > { %v1170_v38 = vpop.permute.xlu1 %1169 }
  0xeb   : > { %v1190_v61 = vmul.f32 %v1185_v33, %v1170_v38  ;;  %v1191_v18 = vmul.f32 %v1189_v40, %v1170_v38 }
  0xed   : > { %v1192_v52 = vadd.f32 %v1190_v61, %v1166_v7  ;;  %v1193_v29 = vadd.f32 %v1191_v18, %v1167_v8 }
  0xef   : > { %v1223_v15 = vpop.permute.xlu1 %1222  ;;  %v1219_v58 = vadd.f32 %v1217_v54, %v1192_v52  ;;  %v1220_v28 = vadd.f32 %v1218_v48, %v1193_v29 }
  0xf0   : > { %v1243_v53 = vmul.f32 %v1238_v30, %v1223_v15  ;;  %v1244_v39 = vmul.f32 %v1242_v42, %v1223_v15 }
  0xf2   : > { %v1245_v1 = vadd.f32 %v1243_v53, %v1219_v58  ;;  %v1246_v0 = vadd.f32 %v1244_v39, %v1220_v28 }
  0xf4   : > { %v1249_v51 = vpop.permute.xlu1 %1248 }
  0xf5   : > { %v1269_v41 = vmul.f32 %v1264_v23, %v1249_v51  ;;  %v1270_v11 = vmul.f32 %v1268_v31, %v1249_v51 }
  0xf7   : > { %v1271_v2 = vadd.f32 %v1269_v41, %v1245_v1  ;;  %v1272_v20 = vadd.f32 %v1270_v11, %v1246_v0 }
  0xf9   : > { %v1297_v27 = vadd.f32 %v1295_v59, %v1271_v2  ;;  %v1298_v49 = vadd.f32 %v1296_v60, %v1272_v20 }
  0xfb   : > { %1299 = vst [vmem:[%s145_s21] sm:$0xff] %v1297_v27  ;;  %1300 = vst [vmem:[%s145_s21 + $0x8] sm:$0xff] %v1298_v49 }
  0xfc PF: > { %s12_s9 = sadd.s32 1, %s1470_s9  }
  0xfd   : > { %p9_p4 = scmp.ge.s32.totalorder %s12_s9, 5  }
  0xff   :  { %11 = sbr.rel (!%p9_p4) target bundleno = 1 (0x1), region = 58 }

// kernel: kan_conv_forward.4
= control target key start
LH: loop header
LB: loop body
LE: loop exit
PB: predicated region body
PF: predicated region fallthrough
CT: control target
= control target key end

     0   :  { %s1524_s9 = smov 0   ;;  %s1981_s0 = inlined_call_operand.vmem [shape: f32[4,512], index: 0, kind: input, shape index: {}]   ;;  %s1982_s1 = inlined_call_operand.vmem [shape: f32[8,36], index: 1, kind: input, shape index: {}]   ;;  %s1983_s2 = inlined_call_operand.vmem [shape: f32[8,512], index: 2, kind: output, shape index: {}]  }
   0x1 LB: > { %s1357_s10 = sadd.s32 4294967295, %s1470_s9   ;;  %p1361_p0 = scmp.ge.s32.totalorder %s1470_s9, 1  ;;  %s1470_s9 = sphi %s1524_s9, %s12_s9  }
   0x2   : > { %p113_p1 = scmp.lt.s32.totalorder %s1470_s9, 3 }
   0x4   : > { %p114_p2 = pnand %p1361_p0, %p113_p1 }
   0x5   : > { %v1535_v0 = vld [vmem:[%s1982_s1] sm:$0xff] (!%p114_p2)  ;;  %v1472_v1 = vmov (!%p114_p2), 2   ;;  %v1473_v2 = vmov (!%p114_p2), 0   ;;  %v1474_v3 = vmov (!%p114_p2), 3   ;;  %v1475_v4 = vmov (!%p114_p2), 1   ;;  %s1362_s13 = sshll.u32 (!%p114_p2), %s1357_s10, 1 }
   0x6   : > { %117 = sbr.rel (%p114_p2) target bundleno = 252 (0xfc), region = 28  ;;  %1426 = vset.pattern.permute.xlu1 (!%p114_p2), %v1472_v1  ;;  %1424 = vset.pattern.permute.xlu0 (!%p114_p2), %v1473_v2  ;;  %v1476_v5 = vmov (!%p114_p2), 4   ;;  %v1477_v6 = vmov (!%p114_p2), 5   ;;  %v1478_v7 = vmov (!%p114_p2), 6   ;;  %v1479_v8 = vmov (!%p114_p2), 8   ;;  %p136_p3 = scmp.lt.s32.totalorder (!%p114_p2), %s1362_s13, 3 }
   0x7   : > { %408 = vperm.xlu1 (!%p114_p2), %1426, %v1535_v0   ;;  %357 = vperm.xlu0 (!%p114_p2), %1424, %v1535_v0   ;;  %v1480_v9 = vmov (!%p114_p2), 7   ;;  %v1481_v10 = vmov (!%p114_p2), 11   ;;  %v1482_v11 = vmov (!%p114_p2), 9   ;;  %v1483_v12 = vmov (!%p114_p2), 14  }
   0x8   : > { %v1484_v13 = vmov (!%p114_p2), 10   ;;  %v1485_v14 = vmov (!%p114_p2), 17   ;;  %v1486_v15 = vmov (!%p114_p2), 12   ;;  %v1487_v16 = vmov (!%p114_p2), 20  }
   0x9   : > { %v1488_v17 = vmov (!%p114_p2), 13   ;;  %v1489_v18 = vmov (!%p114_p2), 23   ;;  %v1490_v19 = vmov (!%p114_p2), 15   ;;  %v1491_v20 = vmov (!%p114_p2), 26  }
   0xa   : > { %v1492_v21 = vmov (!%p114_p2), 16   ;;  %v1493_v22 = vmov (!%p114_p2), 29   ;;  %v1494_v23 = vmov (!%p114_p2), 18   ;;  %v1495_v24 = vmov (!%p114_p2), 32  }
   0xb   : > { %1427 = vset.pattern.permute.xlu1 (!%p114_p2), %v1474_v3  ;;  %1425 = vset.pattern.permute.xlu0 (!%p114_p2), %v1475_v4  ;;  %v1496_v25 = vmov (!%p114_p2), 19   ;;  %v1497_v26 = vmov (!%p114_p2), 35   ;;  %v1498_v27 = vmov (!%p114_p2), 21   ;;  %v1499_v28 = vmov (!%p114_p2), 22  }
   0xc   : > { %434 = vperm.xlu1 (!%p114_p2), %1427, %v1535_v0   ;;  %382 = vperm.xlu0 (!%p114_p2), %1425, %v1535_v0   ;;  %v1500_v29 = vmov (!%p114_p2), 24   ;;  %v1501_v30 = vmov (!%p114_p2), 25   ;;  %v1502_v31 = vmov (!%p114_p2), 27   ;;  %v1503_v34 = vmov (!%p114_p2), 28  }
   0xd   : > { %s1985_s13 = smov (!%p136_p3, %s1362_s13), 3  ;;  %v1504_v35 = vmov 30   ;;  %v1505_v42 = vmov 31   ;;  %v1506_v43 = vmov 0.0   ;;  %v1507_v58 = vmov 33  }
   0xe   : > { %s1363_s14 = sshll.u32 %s1985_s13, 2  ;;  %s1365_s18 = sshll.u32 %s1985_s13, 3 }
   0xf   : > { %s139_s17 = scalar_lea.vmem %s1981_s0, %s1363_s14  ;;  %s145_s21 = scalar_lea.vmem %s1983_s2, %s1365_s18 }
  0x10   : > { %1428 = vset.pattern.permute.xlu1 %v1476_v5  ;;  %1429 = vset.pattern.permute.xlu0 %v1477_v6  ;;  %v1575_v32 = vld [vmem:[%s139_s17] sm:$0xff] }
  0x11   : > { %460 = vperm.xlu1 %1428, %v1535_v0   ;;  %487 = vperm.xlu0 %1429, %v1535_v0   ;;  %v1366_v33 = vmul.f32 -1.442695, %v1575_v32  ;;  %vm155_vm0 = vcmp.ge.f32.partialorder %v1575_v32, -2.2  ;;  %vm156_vm1 = vcmp.lt.f32.partialorder %v1575_v32, -1.8 }
  0x12   : > { %vm159_vm2 = vcmp.ge.f32.partialorder %v1575_v32, -1.8  ;;  %vm160_vm3 = vcmp.lt.f32.partialorder %v1575_v32, -1.4  ;;  %vm163_vm4 = vcmp.ge.f32.partialorder %v1575_v32, -1.4  ;;  %vm157_vm8 = vmand %vm155_vm0, %vm156_vm1 }
  0x13   : > { %1460 = vpow2.f32 %v1366_v33  ;;  %vm164_vm5 = vcmp.lt.f32.partialorder %v1575_v32, -1.0  ;;  %vm167_vm6 = vcmp.ge.f32.partialorder %v1575_v32, -1.0  ;;  %vm168_vm7 = vcmp.lt.f32.partialorder %v1575_v32, -0.6  ;;  %vm161_vm9 = vmand %vm159_vm2, %vm160_vm3 }
  0x14   : > { %v1367_v36 = vadd.f32 2.2, %v1575_v32  ;;  %v202_v37 = vsub.f32 -1.4, %v1575_v32  ;;  %v1592_v38 = vadd.f32 1.8, %v1575_v32  ;;  %vm165_vm10 = vmand %vm163_vm4, %vm164_vm5 }
  0x15   : > { %1430 = vset.pattern.permute.xlu1 %v1478_v7  ;;  %1432 = vset.pattern.permute.xlu0 %v1479_v8  ;;  %v209_v39 = vsub.f32 -1.0, %v1575_v32  ;;  %v1596_v40 = vadd.f32 1.4, %v1575_v32  ;;  %v216_v41 = vsub.f32 -0.6, %v1575_v32  ;;  %vm169_vm11 = vmand %vm167_vm6, %vm168_vm7  ;;  %v158_v44 = vsel %vm157_vm8, 1.0, %v1506_v43 }
  0x16   : > { %513 = vperm.xlu1 %1430, %v1535_v0   ;;  %565 = vperm.xlu0 %1432, %v1535_v0   ;;  %v200_v45 = vmul.f32 2.5, %v1367_v36  ;;  %v203_v46 = vmul.f32 2.5, %v202_v37  ;;  %v207_v47 = vmul.f32 2.5, %v1592_v38  ;;  %v162_v48 = vsel %vm161_vm9, 1.0, %v1506_v43 }
  0x17   : > { %v210_v49 = vmul.f32 2.5, %v209_v39  ;;  %v214_v50 = vmul.f32 2.5, %v1596_v40  ;;  %v217_v51 = vmul.f32 2.5, %v216_v41  ;;  %v166_v53 = vsel %vm165_vm10, 1.0, %v1506_v43 }
  0x18   : > { %v170_v54 = vsel %vm169_vm11, 1.0, %v1506_v43  ;;  %v201_v55 = vmul.f32 %v200_v45, %v158_v44  ;;  %v204_v56 = vmul.f32 %v203_v46, %v162_v48  ;;  %v208_v57 = vmul.f32 %v207_v47, %v162_v48 }
  0x19   : > { %v211_v60 = vmul.f32 %v210_v49, %v166_v53  ;;  %v215_v61 = vmul.f32 %v214_v50, %v166_v53  ;;  %v218_v62 = vmul.f32 %v217_v51, %v170_v54  ;;  %v269_v63 = vmul.f32 1.25, %v1367_v36 }
  0x1a   : > { %1431 = vset.pattern.permute.xlu1 %v1480_v9  ;;  %1435 = vset.pattern.permute.xlu0 %v1481_v10  ;;  %v271_v1 = vmul.f32 1.25, %v209_v39  ;;  %v274_v2 = vmul.f32 1.25, %v1592_v38  ;;  %v276_v3 = vmul.f32 1.25, %v216_v41  ;;  %v205_v4 = vadd.f32 %v204_v56, %v201_v55 }
  0x1b   : > { %539 = vperm.xlu1 %1431, %v1535_v0   ;;  %644 = vperm.xlu0 %1435, %v1535_v0   ;;  %v212_v5 = vadd.f32 %v211_v60, %v208_v57  ;;  %v219_v6 = vadd.f32 %v218_v62, %v215_v61  ;;  %v1508_v7 = vmov 34   ;;  %vm171_vm12 = vcmp.ge.f32.partialorder %v1575_v32, -0.6 }
  0x1c   : > { %vm172_vm13 = vcmp.lt.f32.partialorder %v1575_v32, -0.2  ;;  %v1612_v8 = vadd.f32 1.0, %v1575_v32  ;;  %v223_v9 = vsub.f32 -0.2, %v1575_v32  ;;  %v361_v10 = vlaneseq }
  0x1d   : > { %v1461_v52 = vpop.eup %1460  ;;  %vm173_vm14 = vmand %vm171_vm12, %vm172_vm13  ;;  %vm175_vm15 = vcmp.ge.f32.partialorder %v1575_v32, -0.2  ;;  %vm176_vm0 = vcmp.lt.f32.partialorder %v1575_v32, 0.2  ;;  %vm179_vm2 = vcmp.ge.f32.partialorder %v1575_v32, 0.2 }
  0x1e   : > { %v151_v59 = vadd.f32 1.0, %v1461_v52  ;;  %vm177_vm1 = vmand %vm175_vm15, %vm176_vm0  ;;  %v281_v39 = vmul.f32 1.25, %v223_v9  ;;  %v284_v46 = vmul.f32 1.25, %v1612_v8  ;;  %v321_v53 = vmul.f32 0.8333333, %v223_v9 }
  0x1f   : > { %1433 = vset.pattern.permute.xlu1 %v1482_v11  ;;  %1438 = vset.pattern.permute.xlu0 %v1483_v12  ;;  %v270_v11 = vmul.f32 %v269_v63, %v205_v4  ;;  %v272_v12 = vmul.f32 %v271_v1, %v212_v5  ;;  %v1650_v50 = vsel %vm177_vm1, 1.0, %v1506_v43  ;;  %vm180_vm3 = vcmp.lt.f32.partialorder %v1575_v32, 0.6 }
  0x20   : > { %592 = vperm.xlu1 %1433, %v1535_v0   ;;  %723 = vperm.xlu0 %1438, %v1535_v0   ;;  %1462 = vrcp.f32 %v151_v59  ;;  %vm181_vm4 = vmand %vm179_vm2, %vm180_vm3  ;;  %vm183_vm5 = vcmp.ge.f32.partialorder %v1575_v32, 0.6  ;;  %vm184_vm6 = vcmp.lt.f32.partialorder %v1575_v32, 1.0  ;;  %vm187_vm8 = vcmp.ge.f32.partialorder %v1575_v32, 1.0 }
  0x21   : > { %vm185_vm7 = vmand %vm183_vm5, %vm184_vm6  ;;  %vm188_vm9 = vcmp.lt.f32.partialorder %v1575_v32, 1.4  ;;  %vm191_vm11 = vcmp.ge.f32.partialorder %v1575_v32, 1.4  ;;  %vm192_vm12 = vcmp.lt.f32.partialorder %v1575_v32, 1.8 }
  0x22   : > { %vm189_vm10 = vmand %vm187_vm8, %vm188_vm9  ;;  %vm196_vm15 = vcmp.lt.f32.partialorder %v1575_v32, 2.2 }
  0x23   : > { %vm193_vm13 = vmand %vm191_vm11, %vm192_vm12 }
  0x24   : > { %1434 = vset.pattern.permute.xlu1 %v1484_v13  ;;  %1441 = vset.pattern.permute.xlu0 %v1485_v14  ;;  %v275_v13 = vmul.f32 %v274_v2, %v212_v5  ;;  %v277_v14 = vmul.f32 %v276_v3, %v219_v6 }
  0x25   : > { %618 = vperm.xlu1 %1434, %v1535_v0   ;;  %802 = vperm.xlu0 %1441, %v1535_v0  }
  0x29   : > { %1436 = vset.pattern.permute.xlu1 %v1486_v15  ;;  %1444 = vset.pattern.permute.xlu0 %v1487_v16  ;;  %v221_v15 = vmul.f32 2.5, %v1612_v8  ;;  %v224_v16 = vmul.f32 2.5, %v223_v9  ;;  %v1674_v9 = vsub.f32 0.6, %v1575_v32 }
  0x2a   : > { %670 = vperm.xlu1 %1436, %v1535_v0   ;;  %880 = vperm.xlu0 %1444, %v1535_v0  }
  0x2e   : > { %1437 = vset.pattern.permute.xlu1 %v1488_v17  ;;  %1447 = vset.pattern.permute.xlu0 %v1489_v18  ;;  %v362_v17 = vshrl.u32 %v361_v10, 7  ;;  %v174_v18 = vsel %vm173_vm14, 1.0, %v1506_v43  ;;  %vm195_vm14 = vcmp.ge.f32.partialorder %v1575_v32, 1.8 }
  0x2f   : > { %697 = vperm.xlu1 %1437, %v1535_v0   ;;  %959 = vperm.xlu0 %1447, %v1535_v0   ;;  %vm197_vm0 = vmand %vm195_vm14, %vm196_vm15 }
  0x30   : > { %v1639_v37 = vsub.s32 5, %v362_v17  ;;  %v1647_v49 = vsub.s32 3, %v362_v17  ;;  %v1652_v51 = vsub.s32 7, %v362_v17 }
  0x33   : > { %1439 = vset.pattern.permute.xlu1 %v1490_v19  ;;  %1450 = vset.pattern.permute.xlu0 %v1491_v20  ;;  %v273_v19 = vadd.f32 %v272_v12, %v270_v11  ;;  %v278_v20 = vadd.f32 %v277_v14, %v275_v13 }
  0x34   : > { %749 = vperm.xlu1 %1439, %v1535_v0   ;;  %1038 = vperm.xlu0 %1450, %v1535_v0  }
  0x38   : > { %1440 = vset.pattern.permute.xlu1 %v1492_v21  ;;  %1453 = vset.pattern.permute.xlu0 %v1493_v22  ;;  %v316_v21 = vmul.f32 0.8333333, %v216_v41  ;;  %v1463_v22 = vpop.eup %1462  ;;  %v319_v41 = vmul.f32 0.8333333, %v1592_v38 }
  0x39   : > { %775 = vperm.xlu1 %1440, %v1535_v0   ;;  %1117 = vperm.xlu0 %1453, %v1535_v0  }
  0x3a   : > { %v320_v56 = vmul.f32 %v319_v41, %v278_v20 }
  0x3d   : > { %1442 = vset.pattern.permute.xlu1 %v1494_v23  ;;  %1456 = vset.pattern.permute.xlu0 %v1495_v24  ;;  %v222_v23 = vmul.f32 %v221_v15, %v170_v54  ;;  %v225_v24 = vmul.f32 %v224_v16, %v174_v18 }
  0x3e   : > { %828 = vperm.xlu1 %1442, %v1535_v0   ;;  %1195 = vperm.xlu0 %1456, %v1535_v0  }
  0x42   : > { %1443 = vset.pattern.permute.xlu1 %v1496_v25  ;;  %1459 = vset.pattern.permute.xlu0 %v1497_v26  ;;  %v1620_v25 = vadd.f32 0.6, %v1575_v32  ;;  %v1623_v26 = vsub.f32 0.2, %v1575_v32 }
  0x43   : > { %854 = vperm.xlu1 %1443, %v1535_v0   ;;  %1274 = vperm.xlu0 %1459, %v1535_v0  }
  0x44   : > { %v228_v44 = vmul.f32 2.5, %v1620_v25  ;;  %v231_v45 = vmul.f32 2.5, %v1623_v26  ;;  %v286_v57 = vmul.f32 1.25, %v1623_v26 }
  0x46   : > { %v229_v59 = vmul.f32 %v228_v44, %v174_v18  ;;  %v232_v60 = vmul.f32 %v231_v45, %v1650_v50 }
  0x47   : > { %1445 = vset.pattern.permute.xlu1 %v1498_v27  ;;  %v1625_v27 = vsub.s32 2, %v362_v17 }
  0x48   : > { %907 = vperm.xlu1 %1445, %v1535_v0   ;;  %v1699_v44 = vadd.f32 %v232_v60, %v229_v59 }
  0x4c   : > { %1446 = vset.pattern.permute.xlu1 %v1499_v28  ;;  %v1627_v28 = vsub.s32 6, %v362_v17 }
  0x4d   : > { %933 = vperm.xlu1 %1446, %v1535_v0  }
  0x51   : > { %1448 = vset.pattern.permute.xlu1 %v1500_v29  ;;  %v1629_v29 = vsub.s32 0, %v362_v17 }
  0x52   : > { %985 = vperm.xlu1 %1448, %v1535_v0  }
  0x56   : > { %1449 = vset.pattern.permute.xlu1 %v1501_v30  ;;  %v1631_v30 = vsub.s32 4, %v362_v17 }
  0x57   : > { %1012 = vperm.xlu1 %1449, %v1535_v0  }
  0x5b   : > { %1451 = vset.pattern.permute.xlu1 %v1502_v31  ;;  %v1633_v31 = vsub.s32 1, %v362_v17 }
  0x5c   : > { %1064 = vperm.xlu1 %1451, %v1535_v0  }
  0x60   : > { %1452 = vset.pattern.permute.xlu1 %v1503_v34  ;;  %v317_v34 = vmul.f32 %v316_v21, %v278_v20 }
  0x61   : > { %1090 = vperm.xlu1 %1452, %v1535_v0  }
  0x65   : > { %1454 = vset.pattern.permute.xlu1 %v1504_v35  ;;  %v279_v35 = vmul.f32 1.25, %v1596_v40 }
  0x66   : > { %1143 = vperm.xlu1 %1454, %v1535_v0  }
  0x67   : > { %v280_v38 = vmul.f32 %v279_v35, %v219_v6 }
  0x6a   : > { %1455 = vset.pattern.permute.xlu1 %v1505_v42  ;;  %v226_v42 = vadd.f32 %v225_v24, %v222_v23 }
  0x6b   : > { %1169 = vperm.xlu1 %1455, %v1535_v0  }
  0x6c   : > { %v1660_v61 = vmul.f32 %v284_v46, %v226_v42 }
  0x6f   : > { %1457 = vset.pattern.permute.xlu1 %v1507_v58  ;;  %v282_v58 = vmul.f32 %v281_v39, %v226_v42 }
  0x70   : > { %1222 = vperm.xlu1 %1457, %v1535_v0  }
  0x71   : > { %v1686_v17 = vadd.f32 %v282_v58, %v280_v38 }
  0x73   : > { %v322_v42 = vmul.f32 %v321_v53, %v1686_v17 }
  0x74   : > { %1458 = vset.pattern.permute.xlu1 %v1508_v7  ;;  %v1671_v7 = vadd.f32 0.2, %v1575_v32 }
  0x75   : > { %1248 = vperm.xlu1 %1458, %v1535_v0   ;;  %v314_v0 = vmul.f32 0.8333333, %v1367_v36  ;;  %v154_v36 = vmul.f32 %v1463_v22, %v1575_v32 }
  0x77   : > { %v315_v33 = vmul.f32 %v314_v0, %v273_v19  ;;  %v364_v47 = vrot.slane %v154_v36, %v1629_v29  ;;  %v368_v48 = vrot.slane %v154_v36, %v1631_v30  ;;  %v388_v54 = vrot.slane %v154_v36, %v1633_v31 }
  0x78   : > { %v392_v55 = vrot.slane %v154_v36, %v1639_v37  ;;  %v414_v63 = vrot.slane %v154_v36, %v1625_v27  ;;  %v418_v1 = vrot.slane %v154_v36, %v1627_v28  ;;  %v440_v10 = vrot.slane %v154_v36, %v1647_v49 }
  0x79   : > { %v1654_v52 = vadd.f32 %v317_v34, %v315_v33  ;;  %v374_v3 = vrot.slane %v364_v47, %v1629_v29  ;;  %v378_v4 = vrot.slane %v368_v48, %v1629_v29  ;;  %v444_v11 = vrot.slane %v154_v36, %v1652_v51 }
  0x7a   : > { %v398_v12 = vrot.slane %v388_v54, %v1633_v31  ;;  %v402_v13 = vrot.slane %v392_v55, %v1633_v31  ;;  %v424_v18 = vrot.slane %v414_v63, %v1625_v27  ;;  %v428_v19 = vrot.slane %v418_v1, %v1625_v27 }
  0x7b   : > { %v467_v5 = vrot.slane %v1654_v52, %v1629_v29  ;;  %v471_v6 = vrot.slane %v1654_v52, %v1631_v30  ;;  %v493_v14 = vrot.slane %v1654_v52, %v1633_v31  ;;  %v497_v15 = vrot.slane %v1654_v52, %v1639_v37 }
  0x7c   : > { %v519_v16 = vrot.slane %v1654_v52, %v1625_v27  ;;  %v523_v33 = vrot.slane %v1654_v52, %v1627_v28  ;;  %v545_v34 = vrot.slane %v1654_v52, %v1647_v49  ;;  %v450_v35 = vrot.slane %v440_v10, %v1647_v49 }
  0x7d   : > { %v477_v23 = vrot.slane %v467_v5, %v1629_v29  ;;  %v481_v24 = vrot.slane %v471_v6, %v1629_v29  ;;  %v454_v36 = vrot.slane %v444_v11, %v1647_v49  ;;  %v503_v38 = vrot.slane %v493_v14, %v1633_v31 }
  0x7e   : > { %v507_v54 = vrot.slane %v497_v15, %v1633_v31  ;;  %v529_v55 = vrot.slane %v519_v16, %v1625_v27  ;;  %v549_v58 = vrot.slane %v1654_v52, %v1652_v51  ;;  %v235_v5 = vmul.f32 2.5, %v1671_v7 }
  0x7f   : > { %v287_v52 = vmul.f32 %v286_v57, %v1699_v44  ;;  %v238_v11 = vmul.f32 2.5, %v1674_v9  ;;  %v533_v14 = vrot.slane %v523_v33, %v1625_v27  ;;  %v1719_v15 = vsel %vm181_vm4, 1.0, %v1506_v43 }
  0x80   : > { %v559_v57 = vrot.slane %v549_v58, %v1647_v49 }
  0x81   : > { %v239_v33 = vmul.f32 %v238_v11, %v1719_v15  ;;  %v329_v11 = vmul.f32 0.8333333, %v1612_v8 }
  0x86   : > { %v409_v62 = vpop.permute.xlu1 %408  ;;  %v358_v2 = vpop.permute.xlu0 %357 }
  0x87   : > { %v379_v20 = vmul.f32 %v374_v3, %v358_v2  ;;  %v380_v0 = vmul.f32 %v378_v4, %v358_v2  ;;  %v429_v45 = vmul.f32 %v424_v18, %v409_v62  ;;  %v430_v46 = vmul.f32 %v428_v19, %v409_v62 }
  0x88   : > { %v1712_v4 = vadd.f32 %v322_v42, %v320_v56  ;;  %v324_v56 = vmul.f32 0.8333333, %v1596_v40  ;;  %v326_v19 = vmul.f32 0.8333333, %v1623_v26  ;;  %v289_v40 = vmul.f32 1.25, %v1620_v25 }
  0x8a   : > { %v325_v42 = vmul.f32 %v324_v56, %v1686_v17  ;;  %v1749_v17 = vsub.f32 1.0, %v1575_v32 }
  0x8b   : > { %v435_v21 = vpop.permute.xlu1 %434  ;;  %v383_v22 = vpop.permute.xlu0 %382 }
  0x8c   : > { %v403_v39 = vmul.f32 %v398_v12, %v383_v22  ;;  %v404_v41 = vmul.f32 %v402_v13, %v383_v22  ;;  %v455_v53 = vmul.f32 %v450_v35, %v435_v21  ;;  %v456_v59 = vmul.f32 %v454_v36, %v435_v21 }
  0x8d   : > { %v572_v21 = vrot.slane %v1712_v4, %v1629_v29  ;;  %v576_v22 = vrot.slane %v1712_v4, %v1631_v30  ;;  %v245_v8 = vmul.f32 2.5, %v1749_v17 }
  0x8e   : > { %v405_v47 = vadd.f32 %v403_v39, %v379_v20  ;;  %v406_v48 = vadd.f32 %v404_v41, %v380_v0  ;;  %v555_v0 = vrot.slane %v545_v34, %v1647_v49  ;;  %v598_v39 = vrot.slane %v1712_v4, %v1633_v31 }
  0x8f   : > { %v602_v41 = vrot.slane %v1712_v4, %v1639_v37 }
  0x90   : > { %v431_v60 = vadd.f32 %v429_v45, %v405_v47  ;;  %v432_v63 = vadd.f32 %v430_v46, %v406_v48  ;;  %v461_v1 = vpop.permute.xlu1 %460  ;;  %v488_v2 = vpop.permute.xlu0 %487  ;;  %v586_v45 = vrot.slane %v576_v22, %v1629_v29 }
  0x91   : > { %v482_v62 = vmul.f32 %v477_v23, %v461_v1  ;;  %v483_v3 = vmul.f32 %v481_v24, %v461_v1  ;;  %v508_v12 = vmul.f32 %v503_v38, %v488_v2  ;;  %v509_v13 = vmul.f32 %v507_v54, %v488_v2 }
  0x92   : > { %v457_v6 = vadd.f32 %v455_v53, %v431_v60  ;;  %v458_v10 = vadd.f32 %v456_v59, %v432_v63  ;;  %v288_v23 = vadd.f32 %v287_v52, %v1660_v61  ;;  %v236_v24 = vmul.f32 %v235_v5, %v1650_v50 }
  0x93   : > { %v291_v61 = vmul.f32 1.25, %v1674_v9  ;;  %v582_v50 = vrot.slane %v572_v21, %v1629_v29  ;;  %v1746_v54 = vadd.f32 -0.2, %v1575_v32  ;;  %v608_v60 = vrot.slane %v598_v39, %v1633_v31 }
  0x94   : > { %v484_v16 = vadd.f32 %v482_v62, %v457_v6  ;;  %v485_v18 = vadd.f32 %v483_v3, %v458_v10  ;;  %v327_v48 = vmul.f32 %v326_v19, %v288_v23  ;;  %v1743_v38 = vadd.f32 %v239_v33, %v236_v24 }
  0x95   : > { %v514_v20 = vpop.permute.xlu1 %513  ;;  %v566_v47 = vpop.permute.xlu0 %565  ;;  %v612_v63 = vrot.slane %v602_v41, %v1633_v31  ;;  %v624_v1 = vrot.slane %v1712_v4, %v1625_v27  ;;  %v628_v2 = vrot.slane %v1712_v4, %v1627_v28  ;;  %v290_v52 = vmul.f32 %v289_v40, %v1699_v44 }
  0x96   : > { %v510_v26 = vadd.f32 %v508_v12, %v484_v16  ;;  %v511_v35 = vadd.f32 %v509_v13, %v485_v18  ;;  %v534_v36 = vmul.f32 %v529_v55, %v514_v20  ;;  %v535_v34 = vmul.f32 %v533_v14, %v514_v20 }
  0x97   : > { %v587_v5 = vmul.f32 %v582_v50, %v566_v47  ;;  %v588_v6 = vmul.f32 %v586_v45, %v566_v47  ;;  %v1761_v10 = vadd.f32 %v327_v48, %v325_v42  ;;  %v650_v13 = vrot.slane %v1712_v4, %v1647_v49 }
  0x98   : > { %v536_v55 = vadd.f32 %v534_v36, %v510_v26  ;;  %v537_v58 = vadd.f32 %v535_v34, %v511_v35  ;;  %v654_v14 = vrot.slane %v1712_v4, %v1652_v51  ;;  %v1770_v16 = vsel %vm185_vm7, 1.0, %v1506_v43 }
  0x99   : > { %v242_v18 = vmul.f32 2.5, %v1746_v54  ;;  %v634_v56 = vrot.slane %v624_v1, %v1625_v27  ;;  %v638_v19 = vrot.slane %v628_v2, %v1625_v27  ;;  %v292_v44 = vmul.f32 %v291_v61, %v1743_v38 }
  0x9a   : > { %v540_v46 = vpop.permute.xlu1 %539  ;;  %v677_v4 = vrot.slane %v1761_v10, %v1629_v29  ;;  %v681_v22 = vrot.slane %v1761_v10, %v1631_v30  ;;  %v331_v24 = vmul.f32 0.8333333, %v1674_v9  ;;  %v660_v33 = vrot.slane %v650_v13, %v1647_v49  ;;  %v645_v34 = vpop.permute.xlu0 %644 }
  0x9b   : > { %v560_v53 = vmul.f32 %v555_v0, %v540_v46  ;;  %v561_v59 = vmul.f32 %v559_v57, %v540_v46  ;;  %v664_v40 = vrot.slane %v654_v14, %v1647_v49  ;;  %v330_v26 = vmul.f32 %v329_v11, %v288_v23 }
  0x9c   : > { %v243_v35 = vmul.f32 %v242_v18, %v1719_v15  ;;  %v293_v39 = vadd.f32 %v292_v44, %v290_v52  ;;  %v246_v41 = vmul.f32 %v245_v8, %v1770_v16  ;;  %v294_v42 = vmul.f32 1.25, %v1671_v7 }
  0x9d   : > { %v562_v62 = vadd.f32 %v560_v53, %v536_v55  ;;  %v563_v3 = vadd.f32 %v561_v59, %v537_v58  ;;  %v296_v61 = vmul.f32 1.25, %v1749_v17  ;;  %v687_v47 = vrot.slane %v677_v4, %v1629_v29 }
  0x9e   : > { %v691_v48 = vrot.slane %v681_v22, %v1629_v29  ;;  %v703_v15 = vrot.slane %v1761_v10, %v1633_v31  ;;  %v707_v23 = vrot.slane %v1761_v10, %v1639_v37  ;;  %v665_v53 = vmul.f32 %v660_v33, %v645_v34 }
  0x9f   : > { %v593_v12 = vpop.permute.xlu1 %592  ;;  %v589_v20 = vadd.f32 %v587_v5, %v562_v62  ;;  %v590_v0 = vadd.f32 %v588_v6, %v563_v3  ;;  %v666_v59 = vmul.f32 %v664_v40, %v645_v34  ;;  %v729_v2 = vrot.slane %v1761_v10, %v1625_v27  ;;  %v724_v22 = vpop.permute.xlu0 %723 }
  0xa0   : > { %v613_v57 = vmul.f32 %v608_v60, %v593_v12  ;;  %v614_v21 = vmul.f32 %v612_v63, %v593_v12  ;;  %v332_v60 = vmul.f32 %v331_v24, %v293_v39  ;;  %v1794_v63 = vadd.f32 %v246_v41, %v243_v35 }
  0xa1   : > { %v733_v62 = vrot.slane %v1761_v10, %v1627_v28  ;;  %v1803_v3 = vadd.f32 -0.6, %v1575_v32  ;;  %v713_v5 = vrot.slane %v703_v15, %v1633_v31  ;;  %v717_v6 = vrot.slane %v707_v23, %v1633_v31 }
  0xa2   : > { %v615_v50 = vadd.f32 %v613_v57, %v589_v20  ;;  %v616_v45 = vadd.f32 %v614_v21, %v590_v0  ;;  %v755_v52 = vrot.slane %v1761_v10, %v1647_v49  ;;  %v1810_v11 = vsub.f32 1.4, %v1575_v32 }
  0xa3   : > { %v295_v44 = vmul.f32 %v294_v42, %v1743_v38  ;;  %v297_v8 = vmul.f32 %v296_v61, %v1794_v63  ;;  %v739_v20 = vrot.slane %v729_v2, %v1625_v27  ;;  %v743_v0 = vrot.slane %v733_v62, %v1625_v27 }
  0xa4   : > { %v619_v36 = vpop.permute.xlu1 %618  ;;  %v334_v57 = vmul.f32 0.8333333, %v1620_v25  ;;  %v336_v21 = vmul.f32 0.8333333, %v1749_v17  ;;  %v765_v24 = vrot.slane %v755_v52, %v1647_v49  ;;  %v249_v33 = vmul.f32 2.5, %v1803_v3 }
  0xa5   : > { %v639_v46 = vmul.f32 %v634_v56, %v619_v36  ;;  %v640_v9 = vmul.f32 %v638_v19, %v619_v36  ;;  %v759_v56 = vrot.slane %v1761_v10, %v1652_v51  ;;  %v1814_v19 = vadd.f32 %v332_v60, %v330_v26 }
  0xa6   : > { %v1824_v10 = vsel %vm189_vm10, 1.0, %v1506_v43  ;;  %v252_v38 = vmul.f32 2.5, %v1810_v11  ;;  %v298_v41 = vadd.f32 %v297_v8, %v295_v44 }
  0xa7   : > { %v641_v55 = vadd.f32 %v639_v46, %v615_v50  ;;  %v642_v58 = vadd.f32 %v640_v9, %v616_v45  ;;  %v769_v34 = vrot.slane %v759_v56, %v1647_v49  ;;  %v782_v25 = vrot.slane %v1814_v19, %v1629_v29  ;;  %v803_v56 = vpop.permute.xlu0 %802 }
  0xa8   : > { %v786_v17 = vrot.slane %v1814_v19, %v1631_v30  ;;  %v744_v50 = vmul.f32 %v739_v20, %v724_v22  ;;  %v745_v45 = vmul.f32 %v743_v0, %v724_v22  ;;  %v335_v46 = vmul.f32 %v334_v57, %v293_v39 }
  0xa9   : > { %v671_v1 = vpop.permute.xlu1 %670  ;;  %v667_v12 = vadd.f32 %v665_v53, %v641_v55  ;;  %v668_v13 = vadd.f32 %v666_v59, %v642_v58  ;;  %v250_v9 = vmul.f32 %v249_v33, %v1770_v16  ;;  %v808_v15 = vrot.slane %v1814_v19, %v1633_v31 }
  0xaa   : > { %v692_v14 = vmul.f32 %v687_v47, %v671_v1  ;;  %v693_v18 = vmul.f32 %v691_v48, %v671_v1  ;;  %v253_v47 = vmul.f32 %v252_v38, %v1824_v10  ;;  %v812_v23 = vrot.slane %v1814_v19, %v1639_v37 }
  0xab   : > { %v834_v55 = vrot.slane %v1814_v19, %v1625_v27  ;;  %v299_v58 = vmul.f32 1.25, %v1746_v54  ;;  %v792_v53 = vrot.slane %v782_v25, %v1629_v29  ;;  %v796_v39 = vrot.slane %v786_v17, %v1629_v29 }
  0xac   : > { %v694_v40 = vadd.f32 %v692_v14, %v667_v12  ;;  %v695_v26 = vadd.f32 %v693_v18, %v668_v13  ;;  %v838_v16 = vrot.slane %v1814_v19, %v1627_v28  ;;  %v337_v59 = vmul.f32 %v336_v21, %v298_v41 }
  0xad   : > { %v1850_v52 = vadd.f32 %v253_v47, %v250_v9  ;;  %v301_v12 = vmul.f32 1.25, %v1810_v11  ;;  %v818_v13 = vrot.slane %v808_v15, %v1633_v31  ;;  %v822_v14 = vrot.slane %v812_v23, %v1633_v31 }
  0xae   : > { %v698_v4 = vpop.permute.xlu1 %697  ;;  %v844_v44 = vrot.slane %v834_v55, %v1625_v27  ;;  %v1858_v8 = vadd.f32 %v337_v59, %v335_v46  ;;  %v1864_v20 = vsub.f32 1.8, %v1575_v32  ;;  %v848_v22 = vrot.slane %v838_v16, %v1625_v27 }
  0xaf   : > { %v718_v35 = vmul.f32 %v713_v5, %v698_v4  ;;  %v719_v36 = vmul.f32 %v717_v6, %v698_v4  ;;  %v860_v5 = vrot.slane %v1814_v19, %v1647_v49  ;;  %v864_v6 = vrot.slane %v1814_v19, %v1652_v51 }
  0xb0   : > { %v1861_v19 = vadd.f32 -1.0, %v1575_v32  ;;  %v302_v33 = vmul.f32 %v301_v12, %v1850_v52  ;;  %v339_v38 = vmul.f32 0.8333333, %v1671_v7  ;;  %v887_v25 = vrot.slane %v1858_v8, %v1629_v29 }
  0xb1   : > { %v720_v42 = vadd.f32 %v718_v35, %v694_v40  ;;  %v721_v61 = vadd.f32 %v719_v36, %v695_v26  ;;  %v823_v35 = vmul.f32 %v818_v13, %v803_v56  ;;  %v824_v36 = vmul.f32 %v822_v14, %v803_v56 }
  0xb2   : > { %v259_v17 = vmul.f32 2.5, %v1864_v20  ;;  %v891_v7 = vrot.slane %v1858_v8, %v1631_v30  ;;  %v874_v46 = vrot.slane %v864_v6, %v1647_v49  ;;  %v340_v47 = vmul.f32 %v339_v38, %v298_v41 }
  0xb3   : > { %v750_v48 = vpop.permute.xlu1 %749  ;;  %v746_v60 = vadd.f32 %v744_v50, %v720_v42  ;;  %v747_v1 = vadd.f32 %v745_v45, %v721_v61  ;;  %v913_v61 = vrot.slane %v1858_v8, %v1633_v31  ;;  %v917_v50 = vrot.slane %v1858_v8, %v1639_v37 }
  0xb4   : > { %v770_v2 = vmul.f32 %v765_v24, %v750_v48  ;;  %v771_v62 = vmul.f32 %v769_v34, %v750_v48  ;;  %v300_v24 = vmul.f32 %v299_v58, %v1794_v63  ;;  %v870_v34 = vrot.slane %v860_v5, %v1647_v49 }
  0xb5   : > { %v256_v63 = vmul.f32 2.5, %v1861_v19  ;;  %v194_v45 = vsel %vm193_vm13, 1.0, %v1506_v43  ;;  %v341_v48 = vmul.f32 0.8333333, %v1810_v11  ;;  %v923_v41 = vrot.slane %v913_v61, %v1633_v31 }
  0xb6   : > { %v772_v0 = vadd.f32 %v770_v2, %v746_v60  ;;  %v773_v57 = vadd.f32 %v771_v62, %v747_v1  ;;  %v303_v9 = vadd.f32 %v302_v33, %v300_v24  ;;  %v260_v59 = vmul.f32 %v259_v17, %v194_v45  ;;  %v881_v62 = vpop.permute.xlu0 %880 }
  0xb7   : > { %v257_v16 = vmul.f32 %v256_v63, %v1824_v10  ;;  %v897_v60 = vrot.slane %v887_v25, %v1629_v29  ;;  %v901_v1 = vrot.slane %v891_v7, %v1629_v29  ;;  %v927_v11 = vrot.slane %v917_v50, %v1633_v31 }
  0xb8   : > { %v776_v18 = vpop.permute.xlu1 %775  ;;  %v342_v5 = vmul.f32 %v341_v48, %v303_v9  ;;  %v304_v6 = vmul.f32 1.25, %v1803_v3  ;;  %v306_v56 = vmul.f32 1.25, %v1864_v20  ;;  %v965_v24 = vrot.slane %v1858_v8, %v1647_v49 }
  0xb9   : > { %v797_v21 = vmul.f32 %v792_v53, %v776_v18  ;;  %v798_v4 = vmul.f32 %v796_v39, %v776_v18  ;;  %v939_v53 = vrot.slane %v1858_v8, %v1625_v27  ;;  %v943_v39 = vrot.slane %v1858_v8, %v1627_v28 }
  0xba   : > { %v1900_v18 = vadd.f32 %v260_v59, %v257_v16  ;;  %v969_v33 = vrot.slane %v1858_v8, %v1652_v51  ;;  %v343_v38 = vadd.f32 %v342_v5, %v340_v47  ;;  %v198_v25 = vsel %vm197_vm0, 1.0, %v1506_v43 }
  0xbb   : > { %v799_v40 = vadd.f32 %v797_v21, %v772_v0  ;;  %v800_v26 = vadd.f32 %v798_v4, %v773_v57  ;;  %v1905_v0 = vsub.f32 2.2, %v1575_v32  ;;  %v902_v4 = vmul.f32 %v897_v60, %v881_v62 }
  0xbc   : > { %v992_v50 = vrot.slane %v343_v38, %v1629_v29  ;;  %v975_v47 = vrot.slane %v965_v24, %v1647_v49 }
  0xbd   : > { %v829_v42 = vpop.permute.xlu1 %828  ;;  %v825_v15 = vadd.f32 %v823_v35, %v799_v40  ;;  %v826_v23 = vadd.f32 %v824_v36, %v800_v26  ;;  %v949_v26 = vrot.slane %v939_v53, %v1625_v27  ;;  %v953_v35 = vrot.slane %v943_v39, %v1625_v27 }
  0xbe   : > { %v849_v55 = vmul.f32 %v844_v44, %v829_v42  ;;  %v850_v58 = vmul.f32 %v848_v22, %v829_v42  ;;  %v1376_v44 = vadd.f32 -1.4, %v1575_v32  ;;  %v903_v22 = vmul.f32 %v901_v1, %v881_v62 }
  0xbf   : > { %v305_v32 = vmul.f32 %v304_v6, %v1850_v52  ;;  %v344_v36 = vmul.f32 0.8333333, %v1746_v54  ;;  %v266_v17 = vmul.f32 2.5, %v1905_v0  ;;  %v979_v52 = vrot.slane %v969_v33, %v1647_v49 }
  0xc0   : > { %v851_v12 = vadd.f32 %v849_v55, %v825_v15  ;;  %v852_v10 = vadd.f32 %v850_v58, %v826_v23  ;;  %v263_v63 = vmul.f32 2.5, %v1376_v44  ;;  %v346_v54 = vmul.f32 0.8333333, %v1864_v20  ;;  %v960_v15 = vpop.permute.xlu0 %959 }
  0xc1   : > { %v345_v23 = vmul.f32 %v344_v36, %v303_v9  ;;  %v267_v58 = vmul.f32 %v266_v17, %v198_v25  ;;  %v1002_v60 = vrot.slane %v992_v50, %v1629_v29  ;;  %v980_v62 = vmul.f32 %v975_v47, %v960_v15 }
  0xc2   : > { %v855_v2 = vpop.permute.xlu1 %854  ;;  %v264_v55 = vmul.f32 %v263_v63, %v194_v45  ;;  %v981_v5 = vmul.f32 %v979_v52, %v960_v15  ;;  %v309_v45 = vmul.f32 1.25, %v1861_v19 }
  0xc3   : > { %v875_v13 = vmul.f32 %v870_v34, %v855_v2  ;;  %v876_v14 = vmul.f32 %v874_v46, %v855_v2  ;;  %v307_v34 = vmul.f32 %v306_v56, %v1900_v18  ;;  %v996_v46 = vrot.slane %v343_v38, %v1631_v30 }
  0xc4   : > { %v268_v9 = vadd.f32 %v267_v58, %v264_v55 }
  0xc5   : > { %v877_v57 = vadd.f32 %v875_v13, %v851_v12  ;;  %v878_v21 = vadd.f32 %v876_v14, %v852_v10  ;;  %v308_v43 = vadd.f32 %v307_v34, %v305_v32  ;;  %v1006_v1 = vrot.slane %v996_v46, %v1629_v29  ;;  %v1039_v34 = vpop.permute.xlu0 %1038 }
  0xc6   : > { %v311_v12 = vmul.f32 1.25, %v1905_v0  ;;  %v1044_v13 = vrot.slane %v343_v38, %v1625_v27  ;;  %v1048_v14 = vrot.slane %v343_v38, %v1627_v28  ;;  %v351_v46 = vmul.f32 0.8333333, %v1905_v0 }
  0xc7   : > { %v908_v40 = vpop.permute.xlu1 %907  ;;  %v904_v42 = vadd.f32 %v902_v4, %v877_v57  ;;  %v905_v7 = vadd.f32 %v903_v22, %v878_v21  ;;  %v347_v6 = vmul.f32 %v346_v54, %v308_v43  ;;  %v1070_v57 = vrot.slane %v343_v38, %v1647_v49 }
  0xc8   : > { %v928_v8 = vmul.f32 %v923_v41, %v908_v40  ;;  %v929_v61 = vmul.f32 %v927_v11, %v908_v40  ;;  %v1018_v41 = vrot.slane %v343_v38, %v1633_v31  ;;  %v1022_v11 = vrot.slane %v343_v38, %v1639_v37 }
  0xc9   : > { %v1074_v21 = vrot.slane %v343_v38, %v1652_v51  ;;  %v348_v19 = vadd.f32 %v347_v6, %v345_v23  ;;  %v310_v40 = vmul.f32 %v309_v45, %v1900_v18  ;;  %v1058_v32 = vrot.slane %v1048_v14, %v1625_v27 }
  0xca   : > { %v930_v53 = vadd.f32 %v928_v8, %v904_v42  ;;  %v931_v39 = vadd.f32 %v929_v61, %v905_v7  ;;  %v1028_v56 = vrot.slane %v1018_v41, %v1633_v31  ;;  %v1032_v44 = vrot.slane %v1022_v11, %v1633_v31 }
  0xcb   : > { %v1080_v25 = vrot.slane %v1070_v57, %v1647_v49  ;;  %v1084_v63 = vrot.slane %v1074_v21, %v1647_v49  ;;  %v349_v38 = vmul.f32 0.8333333, %v1803_v3  ;;  %v1097_v61 = vrot.slane %v348_v19, %v1629_v29 }
  0xcc   : > { %v934_v48 = vpop.permute.xlu1 %933  ;;  %v1101_v18 = vrot.slane %v348_v19, %v1631_v30  ;;  %v1123_v23 = vrot.slane %v348_v19, %v1633_v31  ;;  %v1127_v3 = vrot.slane %v348_v19, %v1639_v37  ;;  %v1149_v0 = vrot.slane %v348_v19, %v1625_v27 }
  0xcd   : > { %v954_v16 = vmul.f32 %v949_v26, %v934_v48  ;;  %v955_v59 = vmul.f32 %v953_v35, %v934_v48  ;;  %v312_v26 = vmul.f32 %v311_v12, %v268_v9  ;;  %v1054_v35 = vrot.slane %v1044_v13, %v1625_v27 }
  0xce   : > { %v1060_v48 = vmul.f32 %v1058_v32, %v1039_v34  ;;  %v1107_v55 = vrot.slane %v1097_v61, %v1629_v29  ;;  %v1111_v58 = vrot.slane %v1101_v18, %v1629_v29  ;;  %v1153_v41 = vrot.slane %v348_v19, %v1627_v28 }
  0xcf   : > { %v956_v2 = vadd.f32 %v954_v16, %v930_v53  ;;  %v957_v20 = vadd.f32 %v955_v59, %v931_v39  ;;  %v313_v50 = vadd.f32 %v312_v26, %v310_v40  ;;  %v1059_v54 = vmul.f32 %v1054_v35, %v1039_v34 }
  0xd0   : > { %v350_v53 = vmul.f32 %v349_v38, %v308_v43  ;;  %v1133_v11 = vrot.slane %v1123_v23, %v1633_v31  ;;  %v1159_v12 = vrot.slane %v1149_v0, %v1625_v27  ;;  %v1175_v13 = vrot.slane %v348_v19, %v1647_v49 }
  0xd1   : > { %v986_v10 = vpop.permute.xlu1 %985  ;;  %v982_v4 = vadd.f32 %v980_v62, %v956_v2  ;;  %v983_v22 = vadd.f32 %v981_v5, %v957_v20  ;;  %v352_v39 = vmul.f32 %v351_v46, %v313_v50  ;;  %v1137_v2 = vrot.slane %v1127_v3, %v1633_v31  ;;  %v1118_v62 = vpop.permute.xlu0 %1117 }
  0xd2   : > { %v1007_v24 = vmul.f32 %v1002_v60, %v986_v10  ;;  %v1008_v33 = vmul.f32 %v1006_v1, %v986_v10  ;;  %v1163_v10 = vrot.slane %v1153_v41, %v1625_v27  ;;  %v1179_v14 = vrot.slane %v348_v19, %v1652_v51 }
  0xd3   : > { %v353_v5 = vadd.f32 %v352_v39, %v350_v53  ;;  %v1138_v57 = vmul.f32 %v1133_v11, %v1118_v62  ;;  %v1139_v21 = vmul.f32 %v1137_v2, %v1118_v62 }
  0xd4   : > { %v1009_v17 = vadd.f32 %v1007_v24, %v982_v4  ;;  %v1010_v42 = vadd.f32 %v1008_v33, %v983_v22  ;;  %v1185_v33 = vrot.slane %v1175_v13, %v1647_v49  ;;  %v1189_v40 = vrot.slane %v1179_v14, %v1647_v49 }
  0xd5   : > { %v1202_v22 = vrot.slane %v353_v5, %v1629_v29  ;;  %v1206_v24 = vrot.slane %v353_v5, %v1631_v30  ;;  %v1228_v26 = vrot.slane %v353_v5, %v1633_v31  ;;  %v1232_v35 = vrot.slane %v353_v5, %v1639_v37 }
  0xd6   : > { %v1013_v36 = vpop.permute.xlu1 %1012  ;;  %v1254_v37 = vrot.slane %v353_v5, %v1625_v27  ;;  %v1258_v50 = vrot.slane %v353_v5, %v1627_v28  ;;  %v1280_v46 = vrot.slane %v353_v5, %v1647_v49 }
  0xd7   : > { %v1033_v7 = vmul.f32 %v1028_v56, %v1013_v36  ;;  %v1034_v8 = vmul.f32 %v1032_v44, %v1013_v36  ;;  %v1238_v30 = vrot.slane %v1228_v26, %v1633_v31 }
  0xd8   : > { %v1264_v23 = vrot.slane %v1254_v37, %v1625_v27  ;;  %v1290_v3 = vrot.slane %v1280_v46, %v1647_v49 }
  0xd9   : > { %v1035_v47 = vadd.f32 %v1033_v7, %v1009_v17  ;;  %v1036_v52 = vadd.f32 %v1034_v8, %v1010_v42  ;;  %v1196_v17 = vpop.permute.xlu0 %1195  ;;  %v1242_v42 = vrot.slane %v1232_v35, %v1633_v31  ;;  %v1268_v31 = vrot.slane %v1258_v50, %v1625_v27 }
  0xdb   : > { %v1065_v15 = vpop.permute.xlu1 %1064  ;;  %v1061_v16 = vadd.f32 %v1059_v54, %v1035_v47  ;;  %v1062_v59 = vadd.f32 %v1060_v48, %v1036_v52  ;;  %v1284_v47 = vrot.slane %v353_v5, %v1652_v51 }
  0xdc   : > { %v1085_v60 = vmul.f32 %v1080_v25, %v1065_v15  ;;  %v1086_v1 = vmul.f32 %v1084_v63, %v1065_v15  ;;  %v1212_v25 = vrot.slane %v1202_v22, %v1629_v29  ;;  %v1216_v63 = vrot.slane %v1206_v24, %v1629_v29 }
  0xde   : > { %v1087_v6 = vadd.f32 %v1085_v60, %v1061_v16  ;;  %v1088_v9 = vadd.f32 %v1086_v1, %v1062_v59  ;;  %v1217_v54 = vmul.f32 %v1212_v25, %v1196_v17  ;;  %v1218_v48 = vmul.f32 %v1216_v63, %v1196_v17  ;;  %v1275_v16 = vpop.permute.xlu0 %1274 }
  0xdf   : > { %v1295_v59 = vmul.f32 %v1290_v3, %v1275_v16 }
  0xe0   : > { %v1091_v20 = vpop.permute.xlu1 %1090 }
  0xe1   : > { %v1112_v45 = vmul.f32 %v1107_v55, %v1091_v20  ;;  %v1113_v43 = vmul.f32 %v1111_v58, %v1091_v20  ;;  %v1294_v55 = vrot.slane %v1284_v47, %v1647_v49 }
  0xe3   : > { %v1114_v56 = vadd.f32 %v1112_v45, %v1087_v6  ;;  %v1115_v44 = vadd.f32 %v1113_v43, %v1088_v9  ;;  %v1296_v60 = vmul.f32 %v1294_v55, %v1275_v16 }
  0xe5   : > { %v1144_v4 = vpop.permute.xlu1 %1143  ;;  %v1140_v32 = vadd.f32 %v1138_v57, %v1114_v56  ;;  %v1141_v36 = vadd.f32 %v1139_v21, %v1115_v44 }
  0xe6   : > { %v1164_v19 = vmul.f32 %v1159_v12, %v1144_v4  ;;  %v1165_v34 = vmul.f32 %v1163_v10, %v1144_v4 }
  0xe8   : > { %v1166_v7 = vadd.f32 %v1164_v19, %v1140_v32  ;;  %v1167_v8 = vadd.f32 %v1165_v34, %v1141_v36 }
  0xea   : > { %v1170_v38 = vpop.permute.xlu1 %1169 }
  0xeb   : > { %v1190_v61 = vmul.f32 %v1185_v33, %v1170_v38  ;;  %v1191_v18 = vmul.f32 %v1189_v40, %v1170_v38 }
  0xed   : > { %v1192_v52 = vadd.f32 %v1190_v61, %v1166_v7  ;;  %v1193_v29 = vadd.f32 %v1191_v18, %v1167_v8 }
  0xef   : > { %v1223_v15 = vpop.permute.xlu1 %1222  ;;  %v1219_v58 = vadd.f32 %v1217_v54, %v1192_v52  ;;  %v1220_v28 = vadd.f32 %v1218_v48, %v1193_v29 }
  0xf0   : > { %v1243_v53 = vmul.f32 %v1238_v30, %v1223_v15  ;;  %v1244_v39 = vmul.f32 %v1242_v42, %v1223_v15 }
  0xf2   : > { %v1245_v1 = vadd.f32 %v1243_v53, %v1219_v58  ;;  %v1246_v0 = vadd.f32 %v1244_v39, %v1220_v28 }
  0xf4   : > { %v1249_v51 = vpop.permute.xlu1 %1248 }
  0xf5   : > { %v1269_v41 = vmul.f32 %v1264_v23, %v1249_v51  ;;  %v1270_v11 = vmul.f32 %v1268_v31, %v1249_v51 }
  0xf7   : > { %v1271_v2 = vadd.f32 %v1269_v41, %v1245_v1  ;;  %v1272_v20 = vadd.f32 %v1270_v11, %v1246_v0 }
  0xf9   : > { %v1297_v27 = vadd.f32 %v1295_v59, %v1271_v2  ;;  %v1298_v49 = vadd.f32 %v1296_v60, %v1272_v20 }
  0xfb   : > { %1299 = vst [vmem:[%s145_s21] sm:$0xff] %v1297_v27  ;;  %1300 = vst [vmem:[%s145_s21 + $0x8] sm:$0xff] %v1298_v49 }
  0xfc PF: > { %s12_s9 = sadd.s32 1, %s1470_s9  }
  0xfd   : > { %p9_p4 = scmp.ge.s32.totalorder %s12_s9, 4  }
  0xff   :  { %11 = sbr.rel (!%p9_p4) target bundleno = 1 (0x1), region = 58 }

// kernel: kan_conv_forward.5
= control target key start
LH: loop header
LB: loop body
LE: loop exit
PB: predicated region body
PF: predicated region fallthrough
CT: control target
= control target key end

     0   :  { %s1524_s9 = smov 0   ;;  %s2013_s0 = inlined_call_operand.vmem [shape: f32[4,2048], index: 0, kind: input, shape index: {}]   ;;  %s2014_s1 = inlined_call_operand.vmem [shape: f32[8,36], index: 1, kind: input, shape index: {}]   ;;  %s2015_s2 = inlined_call_operand.vmem [shape: f32[8,2048], index: 2, kind: output, shape index: {}]  }
   0x1 LB: > { %s1357_s10 = sadd.s32 4294967295, %s1470_s9   ;;  %p1361_p0 = scmp.ge.s32.totalorder %s1470_s9, 1  ;;  %s1470_s9 = sphi %s1524_s9, %s12_s9  }
   0x2   : > { %p113_p1 = scmp.lt.s32.totalorder %s1470_s9, 9 }
   0x4   : > { %p114_p2 = pnand %p1361_p0, %p113_p1 }
   0x5   : > { %v1535_v0 = vld [vmem:[%s2014_s1] sm:$0xff] (!%p114_p2)  ;;  %v1472_v1 = vmov (!%p114_p2), 2   ;;  %v1473_v2 = vmov (!%p114_p2), 0   ;;  %v1474_v3 = vmov (!%p114_p2), 3   ;;  %v1475_v4 = vmov (!%p114_p2), 1   ;;  %s1362_s13 = sshll.u32 (!%p114_p2), %s1357_s10, 1 }
   0x6   : > { %117 = sbr.rel (%p114_p2) target bundleno = 252 (0xfc), region = 28  ;;  %1426 = vset.pattern.permute.xlu1 (!%p114_p2), %v1472_v1  ;;  %1424 = vset.pattern.permute.xlu0 (!%p114_p2), %v1473_v2  ;;  %v1476_v5 = vmov (!%p114_p2), 4   ;;  %v1477_v6 = vmov (!%p114_p2), 5   ;;  %v1478_v7 = vmov (!%p114_p2), 6   ;;  %v1479_v8 = vmov (!%p114_p2), 8   ;;  %p136_p3 = scmp.lt.s32.totalorder (!%p114_p2), %s1362_s13, 15 }
   0x7   : > { %408 = vperm.xlu1 (!%p114_p2), %1426, %v1535_v0   ;;  %357 = vperm.xlu0 (!%p114_p2), %1424, %v1535_v0   ;;  %v1480_v9 = vmov (!%p114_p2), 7   ;;  %v1481_v10 = vmov (!%p114_p2), 11   ;;  %v1482_v11 = vmov (!%p114_p2), 9   ;;  %v1483_v12 = vmov (!%p114_p2), 14  }
   0x8   : > { %v1484_v13 = vmov (!%p114_p2), 10   ;;  %v1485_v14 = vmov (!%p114_p2), 17   ;;  %v1486_v15 = vmov (!%p114_p2), 12   ;;  %v1487_v16 = vmov (!%p114_p2), 20  }
   0x9   : > { %v1488_v17 = vmov (!%p114_p2), 13   ;;  %v1489_v18 = vmov (!%p114_p2), 23   ;;  %v1490_v19 = vmov (!%p114_p2), 15   ;;  %v1491_v20 = vmov (!%p114_p2), 26  }
   0xa   : > { %v1492_v21 = vmov (!%p114_p2), 16   ;;  %v1493_v22 = vmov (!%p114_p2), 29   ;;  %v1494_v23 = vmov (!%p114_p2), 18   ;;  %v1495_v24 = vmov (!%p114_p2), 32  }
   0xb   : > { %1427 = vset.pattern.permute.xlu1 (!%p114_p2), %v1474_v3  ;;  %1425 = vset.pattern.permute.xlu0 (!%p114_p2), %v1475_v4  ;;  %v1496_v25 = vmov (!%p114_p2), 19   ;;  %v1497_v26 = vmov (!%p114_p2), 35   ;;  %v1498_v27 = vmov (!%p114_p2), 21   ;;  %v1499_v28 = vmov (!%p114_p2), 22  }
   0xc   : > { %434 = vperm.xlu1 (!%p114_p2), %1427, %v1535_v0   ;;  %382 = vperm.xlu0 (!%p114_p2), %1425, %v1535_v0   ;;  %v1500_v29 = vmov (!%p114_p2), 24   ;;  %v1501_v30 = vmov (!%p114_p2), 25   ;;  %v1502_v31 = vmov (!%p114_p2), 27   ;;  %v1503_v34 = vmov (!%p114_p2), 28  }
   0xd   : > { %s2017_s13 = smov (!%p136_p3, %s1362_s13), 15  ;;  %v1504_v35 = vmov 30   ;;  %v1505_v42 = vmov 31   ;;  %v1506_v43 = vmov 0.0   ;;  %v1507_v58 = vmov 33  }
   0xe   : > { %s1363_s14 = sshll.u32 %s2017_s13, 2  ;;  %s1365_s18 = sshll.u32 %s2017_s13, 3 }
   0xf   : > { %s139_s17 = scalar_lea.vmem %s2013_s0, %s1363_s14  ;;  %s145_s21 = scalar_lea.vmem %s2015_s2, %s1365_s18 }
  0x10   : > { %1428 = vset.pattern.permute.xlu1 %v1476_v5  ;;  %1429 = vset.pattern.permute.xlu0 %v1477_v6  ;;  %v1575_v32 = vld [vmem:[%s139_s17] sm:$0xff] }
  0x11   : > { %460 = vperm.xlu1 %1428, %v1535_v0   ;;  %487 = vperm.xlu0 %1429, %v1535_v0   ;;  %v1366_v33 = vmul.f32 -1.442695, %v1575_v32  ;;  %vm155_vm0 = vcmp.ge.f32.partialorder %v1575_v32, -2.2  ;;  %vm156_vm1 = vcmp.lt.f32.partialorder %v1575_v32, -1.8 }
  0x12   : > { %vm159_vm2 = vcmp.ge.f32.partialorder %v1575_v32, -1.8  ;;  %vm160_vm3 = vcmp.lt.f32.partialorder %v1575_v32, -1.4  ;;  %vm163_vm4 = vcmp.ge.f32.partialorder %v1575_v32, -1.4  ;;  %vm157_vm8 = vmand %vm155_vm0, %vm156_vm1 }
  0x13   : > { %1460 = vpow2.f32 %v1366_v33  ;;  %vm164_vm5 = vcmp.lt.f32.partialorder %v1575_v32, -1.0  ;;  %vm167_vm6 = vcmp.ge.f32.partialorder %v1575_v32, -1.0  ;;  %vm168_vm7 = vcmp.lt.f32.partialorder %v1575_v32, -0.6  ;;  %vm161_vm9 = vmand %vm159_vm2, %vm160_vm3 }
  0x14   : > { %v1367_v36 = vadd.f32 2.2, %v1575_v32  ;;  %v202_v37 = vsub.f32 -1.4, %v1575_v32  ;;  %v1592_v38 = vadd.f32 1.8, %v1575_v32  ;;  %vm165_vm10 = vmand %vm163_vm4, %vm164_vm5 }
  0x15   : > { %1430 = vset.pattern.permute.xlu1 %v1478_v7  ;;  %1432 = vset.pattern.permute.xlu0 %v1479_v8  ;;  %v209_v39 = vsub.f32 -1.0, %v1575_v32  ;;  %v1596_v40 = vadd.f32 1.4, %v1575_v32  ;;  %v216_v41 = vsub.f32 -0.6, %v1575_v32  ;;  %vm169_vm11 = vmand %vm167_vm6, %vm168_vm7  ;;  %v158_v44 = vsel %vm157_vm8, 1.0, %v1506_v43 }
  0x16   : > { %513 = vperm.xlu1 %1430, %v1535_v0   ;;  %565 = vperm.xlu0 %1432, %v1535_v0   ;;  %v200_v45 = vmul.f32 2.5, %v1367_v36  ;;  %v203_v46 = vmul.f32 2.5, %v202_v37  ;;  %v207_v47 = vmul.f32 2.5, %v1592_v38  ;;  %v162_v48 = vsel %vm161_vm9, 1.0, %v1506_v43 }
  0x17   : > { %v210_v49 = vmul.f32 2.5, %v209_v39  ;;  %v214_v50 = vmul.f32 2.5, %v1596_v40  ;;  %v217_v51 = vmul.f32 2.5, %v216_v41  ;;  %v166_v53 = vsel %vm165_vm10, 1.0, %v1506_v43 }
  0x18   : > { %v170_v54 = vsel %vm169_vm11, 1.0, %v1506_v43  ;;  %v201_v55 = vmul.f32 %v200_v45, %v158_v44  ;;  %v204_v56 = vmul.f32 %v203_v46, %v162_v48  ;;  %v208_v57 = vmul.f32 %v207_v47, %v162_v48 }
  0x19   : > { %v211_v60 = vmul.f32 %v210_v49, %v166_v53  ;;  %v215_v61 = vmul.f32 %v214_v50, %v166_v53  ;;  %v218_v62 = vmul.f32 %v217_v51, %v170_v54  ;;  %v269_v63 = vmul.f32 1.25, %v1367_v36 }
  0x1a   : > { %1431 = vset.pattern.permute.xlu1 %v1480_v9  ;;  %1435 = vset.pattern.permute.xlu0 %v1481_v10  ;;  %v271_v1 = vmul.f32 1.25, %v209_v39  ;;  %v274_v2 = vmul.f32 1.25, %v1592_v38  ;;  %v276_v3 = vmul.f32 1.25, %v216_v41  ;;  %v205_v4 = vadd.f32 %v204_v56, %v201_v55 }
  0x1b   : > { %539 = vperm.xlu1 %1431, %v1535_v0   ;;  %644 = vperm.xlu0 %1435, %v1535_v0   ;;  %v212_v5 = vadd.f32 %v211_v60, %v208_v57  ;;  %v219_v6 = vadd.f32 %v218_v62, %v215_v61  ;;  %v1508_v7 = vmov 34   ;;  %v361_v8 = vlaneseq }
  0x1c   : > { %vm171_vm12 = vcmp.ge.f32.partialorder %v1575_v32, -0.6  ;;  %vm172_vm13 = vcmp.lt.f32.partialorder %v1575_v32, -0.2  ;;  %v1612_v9 = vadd.f32 1.0, %v1575_v32  ;;  %vm184_vm6 = vcmp.lt.f32.partialorder %v1575_v32, 1.0 }
  0x1d   : > { %v1461_v52 = vpop.eup %1460  ;;  %v223_v10 = vsub.f32 -0.2, %v1575_v32  ;;  %vm173_vm14 = vmand %vm171_vm12, %vm172_vm13  ;;  %vm175_vm15 = vcmp.ge.f32.partialorder %v1575_v32, -0.2  ;;  %vm176_vm0 = vcmp.lt.f32.partialorder %v1575_v32, 0.2 }
  0x1e   : > { %v151_v59 = vadd.f32 1.0, %v1461_v52  ;;  %vm177_vm1 = vmand %vm175_vm15, %vm176_vm0  ;;  %v284_v47 = vmul.f32 1.25, %v1612_v9  ;;  %vm179_vm2 = vcmp.ge.f32.partialorder %v1575_v32, 0.2  ;;  %vm180_vm3 = vcmp.lt.f32.partialorder %v1575_v32, 0.6 }
  0x1f   : > { %1433 = vset.pattern.permute.xlu1 %v1482_v11  ;;  %1438 = vset.pattern.permute.xlu0 %v1483_v12  ;;  %v270_v11 = vmul.f32 %v269_v63, %v205_v4  ;;  %v272_v12 = vmul.f32 %v271_v1, %v212_v5  ;;  %v1652_v50 = vsel %vm177_vm1, 1.0, %v1506_v43  ;;  %vm181_vm4 = vmand %vm179_vm2, %vm180_vm3  ;;  %vm183_vm5 = vcmp.ge.f32.partialorder %v1575_v32, 0.6 }
  0x20   : > { %592 = vperm.xlu1 %1433, %v1535_v0   ;;  %723 = vperm.xlu0 %1438, %v1535_v0   ;;  %1462 = vrcp.f32 %v151_v59  ;;  %vm185_vm7 = vmand %vm183_vm5, %vm184_vm6  ;;  %vm187_vm8 = vcmp.ge.f32.partialorder %v1575_v32, 1.0  ;;  %vm188_vm9 = vcmp.lt.f32.partialorder %v1575_v32, 1.4  ;;  %vm191_vm11 = vcmp.ge.f32.partialorder %v1575_v32, 1.4 }
  0x21   : > { %vm189_vm10 = vmand %vm187_vm8, %vm188_vm9  ;;  %vm192_vm12 = vcmp.lt.f32.partialorder %v1575_v32, 1.8  ;;  %vm196_vm15 = vcmp.lt.f32.partialorder %v1575_v32, 2.2 }
  0x22   : > { %vm193_vm13 = vmand %vm191_vm11, %vm192_vm12 }
  0x24   : > { %1434 = vset.pattern.permute.xlu1 %v1484_v13  ;;  %1441 = vset.pattern.permute.xlu0 %v1485_v14  ;;  %v275_v13 = vmul.f32 %v274_v2, %v212_v5  ;;  %v277_v14 = vmul.f32 %v276_v3, %v219_v6 }
  0x25   : > { %618 = vperm.xlu1 %1434, %v1535_v0   ;;  %802 = vperm.xlu0 %1441, %v1535_v0  }
  0x29   : > { %1436 = vset.pattern.permute.xlu1 %v1486_v15  ;;  %1444 = vset.pattern.permute.xlu0 %v1487_v16  ;;  %v362_v15 = vshrl.u32 %v361_v8, 7  ;;  %v221_v16 = vmul.f32 2.5, %v1612_v9  ;;  %v1679_v8 = vsub.f32 0.6, %v1575_v32 }
  0x2a   : > { %670 = vperm.xlu1 %1436, %v1535_v0   ;;  %880 = vperm.xlu0 %1444, %v1535_v0  }
  0x2b   : > { %v1640_v39 = vsub.s32 1, %v362_v15  ;;  %v1649_v49 = vsub.s32 7, %v362_v15 }
  0x2e   : > { %1437 = vset.pattern.permute.xlu1 %v1488_v17  ;;  %1447 = vset.pattern.permute.xlu0 %v1489_v18  ;;  %v224_v17 = vmul.f32 2.5, %v223_v10  ;;  %v174_v18 = vsel %vm173_vm14, 1.0, %v1506_v43  ;;  %vm195_vm14 = vcmp.ge.f32.partialorder %v1575_v32, 1.8 }
  0x2f   : > { %697 = vperm.xlu1 %1437, %v1535_v0   ;;  %959 = vperm.xlu0 %1447, %v1535_v0   ;;  %vm197_vm0 = vmand %vm195_vm14, %vm196_vm15 }
  0x33   : > { %1439 = vset.pattern.permute.xlu1 %v1490_v19  ;;  %1450 = vset.pattern.permute.xlu0 %v1491_v20  ;;  %v273_v19 = vadd.f32 %v272_v12, %v270_v11  ;;  %v278_v20 = vadd.f32 %v277_v14, %v275_v13 }
  0x34   : > { %749 = vperm.xlu1 %1439, %v1535_v0   ;;  %1038 = vperm.xlu0 %1450, %v1535_v0  }
  0x38   : > { %1440 = vset.pattern.permute.xlu1 %v1492_v21  ;;  %1453 = vset.pattern.permute.xlu0 %v1493_v22  ;;  %v314_v21 = vmul.f32 0.8333333, %v1367_v36  ;;  %v1617_v22 = vsub.s32 2, %v362_v15  ;;  %v319_v36 = vmul.f32 0.8333333, %v1592_v38 }
  0x39   : > { %775 = vperm.xlu1 %1440, %v1535_v0   ;;  %1117 = vperm.xlu0 %1453, %v1535_v0  }
  0x3a   : > { %v315_v33 = vmul.f32 %v314_v21, %v273_v19  ;;  %v1656_v53 = vmul.f32 %v319_v36, %v278_v20 }
  0x3d   : > { %1442 = vset.pattern.permute.xlu1 %v1494_v23  ;;  %1456 = vset.pattern.permute.xlu0 %v1495_v24  ;;  %v1463_v23 = vpop.eup %1462  ;;  %v222_v24 = vmul.f32 %v221_v16, %v170_v54  ;;  %v321_v54 = vmul.f32 0.8333333, %v223_v10 }
  0x3e   : > { %828 = vperm.xlu1 %1442, %v1535_v0   ;;  %1195 = vperm.xlu0 %1456, %v1535_v0   ;;  %v154_v37 = vmul.f32 %v1463_v23, %v1575_v32 }
  0x40   : > { %v388_v55 = vrot.slane %v154_v37, %v1640_v39  ;;  %v414_v1 = vrot.slane %v154_v37, %v1617_v22  ;;  %v444_v11 = vrot.slane %v154_v37, %v1649_v49 }
  0x42   : > { %1443 = vset.pattern.permute.xlu1 %v1496_v25  ;;  %1459 = vset.pattern.permute.xlu0 %v1497_v26  ;;  %v225_v25 = vmul.f32 %v224_v17, %v174_v18  ;;  %v1622_v26 = vadd.f32 0.6, %v1575_v32  ;;  %v398_v12 = vrot.slane %v388_v55, %v1640_v39 }
  0x43   : > { %854 = vperm.xlu1 %1443, %v1535_v0   ;;  %1274 = vperm.xlu0 %1459, %v1535_v0  }
  0x44   : > { %v226_v44 = vadd.f32 %v225_v25, %v222_v24  ;;  %v228_v45 = vmul.f32 2.5, %v1622_v26 }
  0x46   : > { %v229_v60 = vmul.f32 %v228_v45, %v174_v18  ;;  %v1665_v62 = vmul.f32 %v284_v47, %v226_v44  ;;  %v424_v18 = vrot.slane %v414_v1, %v1617_v22 }
  0x47   : > { %1445 = vset.pattern.permute.xlu1 %v1498_v27  ;;  %v1625_v27 = vsub.f32 0.2, %v1575_v32 }
  0x48   : > { %907 = vperm.xlu1 %1445, %v1535_v0  }
  0x49   : > { %v231_v46 = vmul.f32 2.5, %v1625_v27  ;;  %v286_v57 = vmul.f32 1.25, %v1625_v27 }
  0x4b   : > { %v232_v61 = vmul.f32 %v231_v46, %v1652_v50 }
  0x4c   : > { %1446 = vset.pattern.permute.xlu1 %v1499_v28  ;;  %v1627_v28 = vsub.s32 6, %v362_v15 }
  0x4d   : > { %933 = vperm.xlu1 %1446, %v1535_v0  }
  0x4e   : > { %v418_v2 = vrot.slane %v154_v37, %v1627_v28 }
  0x50   : > { %v428_v19 = vrot.slane %v418_v2, %v1617_v22 }
  0x51   : > { %1448 = vset.pattern.permute.xlu1 %v1500_v29  ;;  %v1629_v29 = vsub.s32 0, %v362_v15 }
  0x52   : > { %985 = vperm.xlu1 %1448, %v1535_v0  }
  0x53   : > { %v364_v48 = vrot.slane %v154_v37, %v1629_v29 }
  0x55   : > { %v374_v4 = vrot.slane %v364_v48, %v1629_v29 }
  0x56   : > { %1449 = vset.pattern.permute.xlu1 %v1501_v30  ;;  %v1631_v30 = vsub.s32 4, %v362_v15 }
  0x57   : > { %1012 = vperm.xlu1 %1449, %v1535_v0  }
  0x58   : > { %v368_v38 = vrot.slane %v154_v37, %v1631_v30 }
  0x5a   : > { %v378_v5 = vrot.slane %v368_v38, %v1629_v29 }
  0x5b   : > { %1451 = vset.pattern.permute.xlu1 %v1502_v31  ;;  %v1633_v31 = vsub.s32 3, %v362_v15 }
  0x5c   : > { %1064 = vperm.xlu1 %1451, %v1535_v0  }
  0x5d   : > { %v454_v36 = vrot.slane %v444_v11, %v1633_v31 }
  0x60   : > { %1452 = vset.pattern.permute.xlu1 %v1503_v34 }
  0x61   : > { %1090 = vperm.xlu1 %1452, %v1535_v0  }
  0x65   : > { %1454 = vset.pattern.permute.xlu1 %v1504_v35  ;;  %v279_v35 = vmul.f32 1.25, %v1596_v40 }
  0x66   : > { %1143 = vperm.xlu1 %1454, %v1535_v0  }
  0x67   : > { %v280_v52 = vmul.f32 %v279_v35, %v219_v6 }
  0x6a   : > { %1455 = vset.pattern.permute.xlu1 %v1505_v42  ;;  %v281_v42 = vmul.f32 1.25, %v223_v10  ;;  %v440_v10 = vrot.slane %v154_v37, %v1633_v31 }
  0x6b   : > { %1169 = vperm.xlu1 %1455, %v1535_v0  }
  0x6c   : > { %v282_v59 = vmul.f32 %v281_v42, %v226_v44  ;;  %v450_v35 = vrot.slane %v440_v10, %v1633_v31  ;;  %v238_v10 = vmul.f32 2.5, %v1679_v8 }
  0x6e   : > { %v1691_v17 = vadd.f32 %v282_v59, %v280_v52 }
  0x6f   : > { %1457 = vset.pattern.permute.xlu1 %v1507_v58  ;;  %v1662_v58 = vmul.f32 0.8333333, %v1596_v40 }
  0x70   : > { %1222 = vperm.xlu1 %1457, %v1535_v0   ;;  %v322_v45 = vmul.f32 %v321_v54, %v1691_v17 }
  0x74   : > { %1458 = vset.pattern.permute.xlu1 %v1508_v7  ;;  %v1676_v7 = vadd.f32 0.2, %v1575_v32 }
  0x75   : > { %1248 = vperm.xlu1 %1458, %v1535_v0   ;;  %v316_v0 = vmul.f32 0.8333333, %v216_v41  ;;  %v1642_v41 = vsub.s32 5, %v362_v15 }
  0x77   : > { %v317_v34 = vmul.f32 %v316_v0, %v278_v20  ;;  %v392_v56 = vrot.slane %v154_v37, %v1642_v41 }
  0x79   : > { %v1654_v51 = vadd.f32 %v317_v34, %v315_v33  ;;  %v402_v13 = vrot.slane %v392_v56, %v1640_v39  ;;  %v1700_v34 = vadd.f32 %v232_v61, %v229_v60 }
  0x7b   : > { %v467_v40 = vrot.slane %v1654_v51, %v1629_v29  ;;  %v471_v6 = vrot.slane %v1654_v51, %v1631_v30  ;;  %v493_v14 = vrot.slane %v1654_v51, %v1640_v39  ;;  %v497_v15 = vrot.slane %v1654_v51, %v1642_v41 }
  0x7c   : > { %v519_v16 = vrot.slane %v1654_v51, %v1617_v22  ;;  %v523_v25 = vrot.slane %v1654_v51, %v1627_v28  ;;  %v545_v33 = vrot.slane %v1654_v51, %v1633_v31  ;;  %v549_v56 = vrot.slane %v1654_v51, %v1649_v49 }
  0x7d   : > { %v477_v24 = vrot.slane %v467_v40, %v1629_v29  ;;  %v481_v44 = vrot.slane %v471_v6, %v1629_v29  ;;  %v503_v52 = vrot.slane %v493_v14, %v1640_v39  ;;  %v507_v55 = vrot.slane %v497_v15, %v1640_v39 }
  0x7e   : > { %v287_v59 = vmul.f32 %v286_v57, %v1700_v34  ;;  %v1719_v40 = vadd.f32 %v322_v45, %v1656_v53  ;;  %v235_v6 = vmul.f32 2.5, %v1676_v7  ;;  %v1725_v14 = vsel %vm181_vm4, 1.0, %v1506_v43 }
  0x7f   : > { %v326_v53 = vmul.f32 0.8333333, %v1625_v27  ;;  %v325_v45 = vmul.f32 %v1662_v58, %v1691_v17  ;;  %v1760_v58 = vsub.f32 1.0, %v1575_v32 }
  0x86   : > { %v409_v63 = vpop.permute.xlu1 %408  ;;  %v358_v3 = vpop.permute.xlu0 %357 }
  0x87   : > { %v379_v20 = vmul.f32 %v374_v4, %v358_v3  ;;  %v380_v21 = vmul.f32 %v378_v5, %v358_v3  ;;  %v429_v46 = vmul.f32 %v424_v18, %v409_v63  ;;  %v430_v47 = vmul.f32 %v428_v19, %v409_v63 }
  0x88   : > { %v529_v5 = vrot.slane %v519_v16, %v1617_v22  ;;  %v1728_v16 = vadd.f32 %v287_v59, %v1665_v62  ;;  %v289_v62 = vmul.f32 1.25, %v1622_v26 }
  0x8b   : > { %v435_v0 = vpop.permute.xlu1 %434  ;;  %v383_v23 = vpop.permute.xlu0 %382 }
  0x8c   : > { %v403_v37 = vmul.f32 %v398_v12, %v383_v23  ;;  %v404_v42 = vmul.f32 %v402_v13, %v383_v23  ;;  %v455_v60 = vmul.f32 %v450_v35, %v435_v0  ;;  %v456_v61 = vmul.f32 %v454_v36, %v435_v0 }
  0x8d   : > { %v533_v13 = vrot.slane %v523_v25, %v1617_v22  ;;  %v572_v0 = vrot.slane %v1719_v40, %v1629_v29  ;;  %v576_v23 = vrot.slane %v1719_v40, %v1631_v30  ;;  %v239_v25 = vmul.f32 %v238_v10, %v1725_v14 }
  0x8e   : > { %v405_v48 = vadd.f32 %v403_v37, %v379_v20  ;;  %v406_v38 = vadd.f32 %v404_v42, %v380_v21  ;;  %v555_v20 = vrot.slane %v545_v33, %v1633_v31  ;;  %v559_v21 = vrot.slane %v549_v56, %v1633_v31 }
  0x8f   : > { %v291_v35 = vmul.f32 1.25, %v1679_v8  ;;  %v598_v42 = vrot.slane %v1719_v40, %v1640_v39  ;;  %v1757_v56 = vadd.f32 -0.2, %v1575_v32 }
  0x90   : > { %v431_v54 = vadd.f32 %v429_v46, %v405_v48  ;;  %v432_v1 = vadd.f32 %v430_v47, %v406_v38  ;;  %v461_v2 = vpop.permute.xlu1 %460  ;;  %v488_v3 = vpop.permute.xlu0 %487  ;;  %v582_v46 = vrot.slane %v572_v0, %v1629_v29  ;;  %v586_v47 = vrot.slane %v576_v23, %v1629_v29 }
  0x91   : > { %v482_v63 = vmul.f32 %v477_v24, %v461_v2  ;;  %v483_v4 = vmul.f32 %v481_v44, %v461_v2  ;;  %v508_v11 = vmul.f32 %v503_v52, %v488_v3  ;;  %v509_v12 = vmul.f32 %v507_v55, %v488_v3 }
  0x92   : > { %v457_v51 = vadd.f32 %v455_v60, %v431_v54  ;;  %v458_v57 = vadd.f32 %v456_v61, %v432_v1  ;;  %v236_v24 = vmul.f32 %v235_v6, %v1652_v50  ;;  %v602_v44 = vrot.slane %v1719_v40, %v1642_v41 }
  0x93   : > { %v327_v50 = vmul.f32 %v326_v53, %v1728_v16  ;;  %v624_v52 = vrot.slane %v1719_v40, %v1617_v22  ;;  %v608_v54 = vrot.slane %v598_v42, %v1640_v39  ;;  %v628_v2 = vrot.slane %v1719_v40, %v1627_v28 }
  0x94   : > { %v484_v15 = vadd.f32 %v482_v63, %v457_v51  ;;  %v485_v18 = vadd.f32 %v483_v4, %v458_v57  ;;  %v1754_v55 = vadd.f32 %v239_v25, %v236_v24  ;;  %v612_v1 = vrot.slane %v602_v44, %v1640_v39 }
  0x95   : > { %v514_v19 = vpop.permute.xlu1 %513  ;;  %v566_v38 = vpop.permute.xlu0 %565  ;;  %v1766_v3 = vadd.f32 %v327_v50, %v325_v45  ;;  %v650_v57 = vrot.slane %v1719_v40, %v1633_v31  ;;  %v290_v6 = vmul.f32 %v289_v62, %v1700_v34  ;;  %v634_v53 = vrot.slane %v624_v52, %v1617_v22 }
  0x96   : > { %v510_v27 = vadd.f32 %v508_v11, %v484_v15  ;;  %v511_v36 = vadd.f32 %v509_v12, %v485_v18  ;;  %v534_v37 = vmul.f32 %v529_v5, %v514_v19  ;;  %v535_v33 = vmul.f32 %v533_v13, %v514_v19 }
  0x97   : > { %v587_v5 = vmul.f32 %v582_v46, %v566_v38  ;;  %v588_v51 = vmul.f32 %v586_v47, %v566_v38  ;;  %v292_v10 = vmul.f32 %v291_v35, %v1754_v55  ;;  %v654_v12 = vrot.slane %v1719_v40, %v1649_v49 }
  0x98   : > { %v536_v17 = vadd.f32 %v534_v37, %v510_v27  ;;  %v537_v59 = vadd.f32 %v535_v33, %v511_v36  ;;  %v329_v13 = vmul.f32 0.8333333, %v1612_v9  ;;  %v1780_v15 = vsel %vm185_vm7, 1.0, %v1506_v43 }
  0x99   : > { %v242_v18 = vmul.f32 2.5, %v1757_v56  ;;  %v638_v19 = vrot.slane %v628_v2, %v1617_v22  ;;  %v677_v34 = vrot.slane %v1766_v3, %v1629_v29  ;;  %v660_v9 = vrot.slane %v650_v57, %v1633_v31 }
  0x9a   : > { %v540_v48 = vpop.permute.xlu1 %539  ;;  %v681_v24 = vrot.slane %v1766_v3, %v1631_v30  ;;  %v1791_v25 = vadd.f32 %v292_v10, %v290_v6  ;;  %v331_v62 = vmul.f32 0.8333333, %v1679_v8  ;;  %v664_v35 = vrot.slane %v654_v12, %v1633_v31  ;;  %v645_v42 = vpop.permute.xlu0 %644 }
  0x9b   : > { %v560_v60 = vmul.f32 %v555_v20, %v540_v48  ;;  %v561_v61 = vmul.f32 %v559_v21, %v540_v48  ;;  %v245_v20 = vmul.f32 2.5, %v1760_v58  ;;  %v330_v27 = vmul.f32 %v329_v13, %v1728_v16 }
  0x9c   : > { %v243_v36 = vmul.f32 %v242_v18, %v1725_v14  ;;  %v294_v37 = vmul.f32 1.25, %v1676_v7  ;;  %v687_v44 = vrot.slane %v677_v34, %v1629_v29  ;;  %v703_v45 = vrot.slane %v1766_v3, %v1640_v39 }
  0x9d   : > { %v562_v63 = vadd.f32 %v560_v60, %v536_v17  ;;  %v563_v4 = vadd.f32 %v561_v61, %v537_v59  ;;  %v707_v50 = vrot.slane %v1766_v3, %v1642_v41  ;;  %v246_v8 = vmul.f32 %v245_v20, %v1780_v15 }
  0x9e   : > { %v691_v14 = vrot.slane %v681_v24, %v1629_v29  ;;  %v332_v38 = vmul.f32 %v331_v62, %v1791_v25  ;;  %v665_v59 = vmul.f32 %v660_v9, %v645_v42  ;;  %v666_v60 = vmul.f32 %v664_v35, %v645_v42 }
  0x9f   : > { %v593_v11 = vpop.permute.xlu1 %592  ;;  %v589_v21 = vadd.f32 %v587_v5, %v562_v63  ;;  %v590_v0 = vadd.f32 %v588_v51, %v563_v4  ;;  %v1808_v61 = vadd.f32 %v246_v8, %v243_v36  ;;  %v1815_v2 = vsub.f32 1.4, %v1575_v32  ;;  %v724_v24 = vpop.permute.xlu0 %723 }
  0xa0   : > { %v613_v23 = vmul.f32 %v608_v54, %v593_v11  ;;  %v614_v40 = vmul.f32 %v612_v1, %v593_v11  ;;  %v296_v54 = vmul.f32 1.25, %v1760_v58  ;;  %v1812_v1 = vadd.f32 -0.6, %v1575_v32 }
  0xa1   : > { %v713_v4 = vrot.slane %v703_v45, %v1640_v39  ;;  %v729_v5 = vrot.slane %v1766_v3, %v1617_v22  ;;  %v733_v51 = vrot.slane %v1766_v3, %v1627_v28  ;;  %v717_v57 = vrot.slane %v707_v50, %v1640_v39 }
  0xa2   : > { %v615_v46 = vadd.f32 %v613_v23, %v589_v21  ;;  %v616_v47 = vadd.f32 %v614_v40, %v590_v0  ;;  %v755_v6 = vrot.slane %v1766_v3, %v1633_v31  ;;  %v759_v10 = vrot.slane %v1766_v3, %v1649_v49 }
  0xa3   : > { %v1827_v11 = vadd.f32 %v332_v38, %v330_v27  ;;  %v297_v34 = vmul.f32 %v296_v54, %v1808_v61  ;;  %v249_v20 = vmul.f32 2.5, %v1812_v1  ;;  %v252_v21 = vmul.f32 2.5, %v1815_v2 }
  0xa4   : > { %v619_v33 = vpop.permute.xlu1 %618  ;;  %v739_v3 = vrot.slane %v729_v5, %v1617_v22  ;;  %v743_v0 = vrot.slane %v733_v51, %v1617_v22  ;;  %v334_v23 = vmul.f32 0.8333333, %v1622_v26  ;;  %v1841_v40 = vsel %vm189_vm10, 1.0, %v1506_v43 }
  0xa5   : > { %v639_v48 = vmul.f32 %v634_v53, %v619_v33  ;;  %v640_v16 = vmul.f32 %v638_v19, %v619_v33  ;;  %v295_v19 = vmul.f32 %v294_v37, %v1754_v55  ;;  %v765_v62 = vrot.slane %v755_v6, %v1633_v31 }
  0xa6   : > { %v769_v55 = vrot.slane %v759_v10, %v1633_v31  ;;  %v782_v35 = vrot.slane %v1827_v11, %v1629_v29  ;;  %v336_v27 = vmul.f32 0.8333333, %v1760_v58  ;;  %v786_v26 = vrot.slane %v1827_v11, %v1631_v30 }
  0xa7   : > { %v641_v52 = vadd.f32 %v639_v48, %v615_v46  ;;  %v642_v17 = vadd.f32 %v640_v16, %v616_v47  ;;  %v250_v45 = vmul.f32 %v249_v20, %v1780_v15  ;;  %v253_v50 = vmul.f32 %v252_v21, %v1841_v40 }
  0xa8   : > { %v744_v47 = vmul.f32 %v739_v3, %v724_v24  ;;  %v745_v48 = vmul.f32 %v743_v0, %v724_v24  ;;  %v808_v16 = vrot.slane %v1827_v11, %v1640_v39  ;;  %v335_v58 = vmul.f32 %v334_v23, %v1791_v25 }
  0xa9   : > { %v671_v63 = vpop.permute.xlu1 %670  ;;  %v667_v12 = vadd.f32 %v665_v59, %v641_v52  ;;  %v668_v13 = vadd.f32 %v666_v60, %v642_v17  ;;  %v792_v38 = vrot.slane %v782_v35, %v1629_v29  ;;  %v812_v52 = vrot.slane %v1827_v11, %v1642_v41 }
  0xaa   : > { %v692_v18 = vmul.f32 %v687_v44, %v671_v63  ;;  %v693_v53 = vmul.f32 %v691_v14, %v671_v63  ;;  %v298_v44 = vadd.f32 %v297_v34, %v295_v19  ;;  %v834_v15 = vrot.slane %v1827_v11, %v1617_v22  ;;  %v803_v19 = vpop.permute.xlu0 %802 }
  0xab   : > { %v299_v17 = vmul.f32 1.25, %v1757_v56  ;;  %v796_v59 = vrot.slane %v786_v26, %v1629_v29  ;;  %v1862_v54 = vadd.f32 %v253_v50, %v250_v45  ;;  %v301_v63 = vmul.f32 1.25, %v1815_v2 }
  0xac   : > { %v694_v36 = vadd.f32 %v692_v18, %v667_v12  ;;  %v695_v37 = vadd.f32 %v693_v53, %v668_v13  ;;  %v337_v60 = vmul.f32 %v336_v27, %v298_v44  ;;  %v838_v6 = vrot.slane %v1827_v11, %v1627_v28 }
  0xad   : > { %v860_v10 = vrot.slane %v1827_v11, %v1633_v31  ;;  %v864_v12 = vrot.slane %v1827_v11, %v1649_v49  ;;  %v822_v13 = vrot.slane %v812_v52, %v1640_v39  ;;  %v300_v18 = vmul.f32 %v299_v17, %v1808_v61 }
  0xae   : > { %v698_v9 = vpop.permute.xlu1 %697  ;;  %v1876_v34 = vadd.f32 %v337_v60, %v335_v58  ;;  %v302_v20 = vmul.f32 %v301_v63, %v1862_v54  ;;  %v1880_v21 = vadd.f32 -1.0, %v1575_v32  ;;  %v1883_v3 = vsub.f32 1.8, %v1575_v32 }
  0xaf   : > { %v718_v33 = vmul.f32 %v713_v4, %v698_v9  ;;  %v719_v42 = vmul.f32 %v717_v57, %v698_v9  ;;  %v818_v57 = vrot.slane %v808_v16, %v1640_v39  ;;  %v844_v9 = vrot.slane %v834_v15, %v1617_v22 }
  0xb0   : > { %v848_v24 = vrot.slane %v838_v6, %v1617_v22  ;;  %v256_v26 = vmul.f32 2.5, %v1880_v21  ;;  %v259_v45 = vmul.f32 2.5, %v1883_v3  ;;  %v939_v16 = vrot.slane %v1876_v34, %v1617_v22 }
  0xb1   : > { %v720_v8 = vadd.f32 %v718_v33, %v694_v36  ;;  %v721_v46 = vadd.f32 %v719_v42, %v695_v37  ;;  %v823_v36 = vmul.f32 %v818_v57, %v803_v19  ;;  %v824_v37 = vmul.f32 %v822_v13, %v803_v19 }
  0xb2   : > { %v1893_v33 = vadd.f32 %v302_v20, %v300_v18  ;;  %v341_v42 = vmul.f32 0.8333333, %v1815_v2  ;;  %v917_v2 = vrot.slane %v1876_v34, %v1642_v41  ;;  %v943_v17 = vrot.slane %v1876_v34, %v1627_v28 }
  0xb3   : > { %v750_v14 = vpop.permute.xlu1 %749  ;;  %v746_v4 = vadd.f32 %v744_v47, %v720_v8  ;;  %v747_v25 = vadd.f32 %v745_v48, %v721_v46  ;;  %v887_v8 = vrot.slane %v1876_v34, %v1629_v29  ;;  %v891_v46 = vrot.slane %v1876_v34, %v1631_v30 }
  0xb4   : > { %v770_v5 = vmul.f32 %v765_v62, %v750_v14  ;;  %v771_v51 = vmul.f32 %v769_v55, %v750_v14  ;;  %v870_v62 = vrot.slane %v860_v10, %v1633_v31  ;;  %v339_v55 = vmul.f32 0.8333333, %v1676_v7 }
  0xb5   : > { %v874_v7 = vrot.slane %v864_v12, %v1633_v31  ;;  %v194_v47 = vsel %vm193_vm13, 1.0, %v1506_v43  ;;  %v913_v48 = vrot.slane %v1876_v34, %v1640_v39  ;;  %v257_v60 = vmul.f32 %v256_v26, %v1841_v40 }
  0xb6   : > { %v772_v11 = vadd.f32 %v770_v5, %v746_v4  ;;  %v773_v0 = vadd.f32 %v771_v51, %v747_v25  ;;  %v340_v58 = vmul.f32 %v339_v55, %v298_v44  ;;  %v260_v63 = vmul.f32 %v259_v45, %v194_v47  ;;  %v881_v5 = vpop.permute.xlu0 %880 }
  0xb7   : > { %v897_v4 = vrot.slane %v887_v8, %v1629_v29  ;;  %v901_v25 = vrot.slane %v891_v46, %v1629_v29  ;;  %v923_v51 = vrot.slane %v913_v48, %v1640_v39  ;;  %v927_v57 = vrot.slane %v917_v2, %v1640_v39 }
  0xb8   : > { %v776_v53 = vpop.permute.xlu1 %775  ;;  %v1376_v6 = vadd.f32 -1.4, %v1575_v32  ;;  %v1922_v10 = vsub.f32 2.2, %v1575_v32  ;;  %v261_v19 = vadd.f32 %v260_v63, %v257_v60  ;;  %v304_v20 = vmul.f32 1.25, %v1812_v1 }
  0xb9   : > { %v797_v23 = vmul.f32 %v792_v38, %v776_v53  ;;  %v798_v61 = vmul.f32 %v796_v59, %v776_v53  ;;  %v342_v59 = vmul.f32 %v341_v42, %v1893_v33  ;;  %v953_v32 = vrot.slane %v943_v17, %v1617_v22 }
  0xba   : > { %v305_v26 = vmul.f32 %v304_v20, %v1862_v54  ;;  %v960_v54 = vpop.permute.xlu0 %959 }
  0xbb   : > { %v799_v35 = vadd.f32 %v797_v23, %v772_v11  ;;  %v800_v27 = vadd.f32 %v798_v61, %v773_v0  ;;  %v1924_v53 = vadd.f32 %v342_v59, %v340_v58  ;;  %v306_v11 = vmul.f32 1.25, %v1883_v3 }
  0xbc   : > { %v902_v61 = vmul.f32 %v897_v4, %v881_v5  ;;  %v344_v58 = vmul.f32 0.8333333, %v1757_v56 }
  0xbd   : > { %v829_v50 = vpop.permute.xlu1 %828  ;;  %v825_v14 = vadd.f32 %v823_v36, %v799_v35  ;;  %v826_v38 = vadd.f32 %v824_v37, %v800_v27  ;;  %v949_v35 = vrot.slane %v939_v16, %v1617_v22  ;;  %v965_v27 = vrot.slane %v1876_v34, %v1633_v31 }
  0xbe   : > { %v849_v52 = vmul.f32 %v844_v9, %v829_v50  ;;  %v850_v15 = vmul.f32 %v848_v24, %v829_v50  ;;  %v903_v9 = vmul.f32 %v901_v25, %v881_v5  ;;  %v263_v24 = vmul.f32 2.5, %v1376_v6 }
  0xbf   : > { %v969_v36 = vrot.slane %v1876_v34, %v1649_v49  ;;  %v198_v37 = vsel %vm197_vm0, 1.0, %v1506_v43  ;;  %v992_v42 = vrot.slane %v1924_v53, %v1629_v29  ;;  %v307_v45 = vmul.f32 %v306_v11, %v261_v19 }
  0xc0   : > { %v851_v40 = vadd.f32 %v849_v52, %v825_v14  ;;  %v852_v12 = vadd.f32 %v850_v15, %v826_v38  ;;  %v996_v48 = vrot.slane %v1924_v53, %v1631_v30  ;;  %v264_v2 = vmul.f32 %v263_v24, %v194_v47 }
  0xc1   : > { %v975_v34 = vrot.slane %v965_v27, %v1633_v31  ;;  %v979_v43 = vrot.slane %v969_v36, %v1633_v31  ;;  %v346_v14 = vmul.f32 0.8333333, %v1883_v3  ;;  %v1002_v52 = vrot.slane %v992_v42, %v1629_v29 }
  0xc2   : > { %v855_v44 = vpop.permute.xlu1 %854  ;;  %v1018_v15 = vrot.slane %v1924_v53, %v1640_v39  ;;  %v1022_v17 = vrot.slane %v1924_v53, %v1642_v41  ;;  %v308_v47 = vadd.f32 %v307_v45, %v305_v26  ;;  %v1006_v25 = vrot.slane %v996_v48, %v1629_v29 }
  0xc3   : > { %v875_v13 = vmul.f32 %v870_v62, %v855_v44  ;;  %v876_v18 = vmul.f32 %v874_v7, %v855_v44  ;;  %v266_v62 = vmul.f32 2.5, %v1922_v10  ;;  %v309_v3 = vmul.f32 1.25, %v1880_v21 }
  0xc4   : > { %v311_v44 = vmul.f32 1.25, %v1922_v10  ;;  %v981_v6 = vmul.f32 %v979_v43, %v960_v54  ;;  %v1048_v20 = vrot.slane %v1924_v53, %v1627_v28  ;;  %v1028_v11 = vrot.slane %v1018_v15, %v1640_v39 }
  0xc5   : > { %v877_v0 = vadd.f32 %v875_v13, %v851_v40  ;;  %v878_v23 = vadd.f32 %v876_v18, %v852_v12  ;;  %v267_v16 = vmul.f32 %v266_v62, %v198_v37  ;;  %v345_v40 = vmul.f32 %v344_v58, %v1893_v33 }
  0xc6   : > { %v347_v12 = vmul.f32 %v346_v14, %v308_v47  ;;  %v1044_v18 = vrot.slane %v1924_v53, %v1617_v22  ;;  %v1032_v21 = vrot.slane %v1022_v17, %v1640_v39  ;;  %v1070_v33 = vrot.slane %v1924_v53, %v1633_v31 }
  0xc7   : > { %v908_v55 = vpop.permute.xlu1 %907  ;;  %v904_v50 = vadd.f32 %v902_v61, %v877_v0  ;;  %v905_v7 = vadd.f32 %v903_v9, %v878_v23  ;;  %v268_v56 = vadd.f32 %v267_v16, %v264_v2  ;;  %v310_v0 = vmul.f32 %v309_v3, %v261_v19 }
  0xc8   : > { %v928_v8 = vmul.f32 %v923_v51, %v908_v55  ;;  %v929_v46 = vmul.f32 %v927_v57, %v908_v55  ;;  %v980_v57 = vmul.f32 %v975_v34, %v960_v54  ;;  %v1074_v55 = vrot.slane %v1924_v53, %v1649_v49 }
  0xc9   : > { %v312_v23 = vmul.f32 %v311_v44, %v268_v56  ;;  %v1054_v27 = vrot.slane %v1044_v18, %v1617_v22  ;;  %v1058_v36 = vrot.slane %v1048_v20, %v1617_v22  ;;  %v349_v19 = vmul.f32 0.8333333, %v1812_v1 }
  0xca   : > { %v930_v59 = vadd.f32 %v928_v8, %v904_v50  ;;  %v931_v60 = vadd.f32 %v929_v46, %v905_v7  ;;  %v351_v26 = vmul.f32 0.8333333, %v1922_v10  ;;  %v1080_v46 = vrot.slane %v1070_v33, %v1633_v31 }
  0xcb   : > { %v313_v42 = vadd.f32 %v312_v23, %v310_v0  ;;  %v1084_v53 = vrot.slane %v1074_v55, %v1633_v31  ;;  %v350_v14 = vmul.f32 %v349_v19, %v308_v47 }
  0xcc   : > { %v934_v38 = vpop.permute.xlu1 %933 }
  0xcd   : > { %v954_v63 = vmul.f32 %v949_v35, %v934_v38  ;;  %v955_v4 = vmul.f32 %v953_v32, %v934_v38  ;;  %v348_v35 = vadd.f32 %v347_v12, %v345_v40  ;;  %v1039_v32 = vpop.permute.xlu0 %1038  ;;  %v352_v1 = vmul.f32 %v351_v26, %v313_v42 }
  0xce   : > { %v1059_v43 = vmul.f32 %v1054_v27, %v1039_v32  ;;  %v1060_v58 = vmul.f32 %v1058_v36, %v1039_v32 }
  0xcf   : > { %v956_v5 = vadd.f32 %v954_v63, %v930_v59  ;;  %v957_v51 = vadd.f32 %v955_v4, %v931_v60  ;;  %v1097_v48 = vrot.slane %v348_v35, %v1629_v29  ;;  %v1101_v2 = vrot.slane %v348_v35, %v1631_v30 }
  0xd0   : > { %v1123_v10 = vrot.slane %v348_v35, %v1640_v39  ;;  %v1127_v54 = vrot.slane %v348_v35, %v1642_v41  ;;  %v1149_v17 = vrot.slane %v348_v35, %v1617_v22  ;;  %v353_v56 = vadd.f32 %v352_v1, %v350_v14 }
  0xd1   : > { %v986_v13 = vpop.permute.xlu1 %985  ;;  %v982_v61 = vadd.f32 %v980_v57, %v956_v5  ;;  %v983_v9 = vadd.f32 %v981_v6, %v957_v51  ;;  %v1111_v15 = vrot.slane %v1101_v2, %v1629_v29  ;;  %v1118_v5 = vpop.permute.xlu0 %1117  ;;  %v1175_v18 = vrot.slane %v348_v35, %v1633_v31 }
  0xd2   : > { %v1007_v24 = vmul.f32 %v1002_v52, %v986_v13  ;;  %v1008_v62 = vmul.f32 %v1006_v25, %v986_v13  ;;  %v1107_v52 = vrot.slane %v1097_v48, %v1629_v29  ;;  %v1153_v25 = vrot.slane %v348_v35, %v1627_v28 }
  0xd3   : > { %v1133_v47 = vrot.slane %v1123_v10, %v1640_v39  ;;  %v1137_v3 = vrot.slane %v1127_v54, %v1640_v39  ;;  %v1159_v51 = vrot.slane %v1149_v17, %v1617_v22  ;;  %v1179_v20 = vrot.slane %v348_v35, %v1649_v49 }
  0xd4   : > { %v1009_v45 = vadd.f32 %v1007_v24, %v982_v61  ;;  %v1010_v50 = vadd.f32 %v1008_v62, %v983_v9  ;;  %v1163_v13 = vrot.slane %v1153_v25, %v1617_v22  ;;  %v1202_v24 = vrot.slane %v353_v56, %v1629_v29 }
  0xd5   : > { %v1138_v23 = vmul.f32 %v1133_v47, %v1118_v5  ;;  %v1139_v61 = vmul.f32 %v1137_v3, %v1118_v5  ;;  %v1185_v62 = vrot.slane %v1175_v18, %v1633_v31  ;;  %v1189_v33 = vrot.slane %v1179_v20, %v1633_v31 }
  0xd6   : > { %v1013_v37 = vpop.permute.xlu1 %1012  ;;  %v1228_v27 = vrot.slane %v353_v56, %v1640_v39  ;;  %v1232_v42 = vrot.slane %v353_v56, %v1642_v41  ;;  %v1212_v19 = vrot.slane %v1202_v24, %v1629_v29  ;;  %v1254_v2 = vrot.slane %v353_v56, %v1617_v22 }
  0xd7   : > { %v1033_v7 = vmul.f32 %v1028_v11, %v1013_v37  ;;  %v1034_v8 = vmul.f32 %v1032_v21, %v1013_v37  ;;  %v1206_v11 = vrot.slane %v353_v56, %v1631_v30  ;;  %v1196_v30 = vpop.permute.xlu0 %1195 }
  0xd8   : > { %v1242_v48 = vrot.slane %v1232_v42, %v1640_v39  ;;  %v1264_v10 = vrot.slane %v1254_v2, %v1617_v22 }
  0xd9   : > { %v1035_v16 = vadd.f32 %v1033_v7, %v1009_v45  ;;  %v1036_v34 = vadd.f32 %v1034_v8, %v1010_v50  ;;  %v1216_v55 = vrot.slane %v1206_v11, %v1629_v29  ;;  %v1238_v50 = vrot.slane %v1228_v27, %v1640_v39 }
  0xda   : > { %v1284_v29 = vrot.slane %v353_v56, %v1649_v49 }
  0xdb   : > { %v1065_v38 = vpop.permute.xlu1 %1064  ;;  %v1061_v59 = vadd.f32 %v1059_v43, %v1035_v16  ;;  %v1062_v60 = vadd.f32 %v1060_v58, %v1036_v34  ;;  %v1218_v45 = vmul.f32 %v1216_v55, %v1196_v30  ;;  %v1258_v16 = vrot.slane %v353_v56, %v1627_v28  ;;  %v1275_v28 = vpop.permute.xlu0 %1274 }
  0xdc   : > { %v1085_v63 = vmul.f32 %v1080_v46, %v1065_v38  ;;  %v1086_v4 = vmul.f32 %v1084_v53, %v1065_v38  ;;  %v1280_v34 = vrot.slane %v353_v56, %v1633_v31  ;;  %v1217_v58 = vmul.f32 %v1212_v19, %v1196_v30 }
  0xdd   : > { %v1294_v17 = vrot.slane %v1284_v29, %v1633_v31 }
  0xde   : > { %v1087_v57 = vadd.f32 %v1085_v63, %v1061_v59  ;;  %v1088_v6 = vadd.f32 %v1086_v4, %v1062_v60  ;;  %v1290_v54 = vrot.slane %v1280_v34, %v1633_v31 }
  0xdf   : > { %v1296_v56 = vmul.f32 %v1294_v17, %v1275_v28 }
  0xe0   : > { %v1091_v44 = vpop.permute.xlu1 %1090  ;;  %v1295_v63 = vmul.f32 %v1290_v54, %v1275_v28 }
  0xe1   : > { %v1112_v40 = vmul.f32 %v1107_v52, %v1091_v44  ;;  %v1113_v12 = vmul.f32 %v1111_v15, %v1091_v44  ;;  %v1268_v15 = vrot.slane %v1258_v16, %v1617_v22 }
  0xe3   : > { %v1114_v21 = vadd.f32 %v1112_v40, %v1087_v57  ;;  %v1115_v0 = vadd.f32 %v1113_v12, %v1088_v6 }
  0xe5   : > { %v1144_v9 = vpop.permute.xlu1 %1143  ;;  %v1140_v36 = vadd.f32 %v1138_v23, %v1114_v21  ;;  %v1141_v37 = vadd.f32 %v1139_v61, %v1115_v0 }
  0xe6   : > { %v1164_v35 = vmul.f32 %v1159_v51, %v1144_v9  ;;  %v1165_v32 = vmul.f32 %v1163_v13, %v1144_v9 }
  0xe8   : > { %v1166_v7 = vadd.f32 %v1164_v35, %v1140_v36  ;;  %v1167_v8 = vadd.f32 %v1165_v32, %v1141_v37 }
  0xea   : > { %v1170_v26 = vpop.permute.xlu1 %1169 }
  0xeb   : > { %v1190_v46 = vmul.f32 %v1185_v62, %v1170_v26  ;;  %v1191_v53 = vmul.f32 %v1189_v33, %v1170_v26 }
  0xed   : > { %v1192_v43 = vadd.f32 %v1190_v46, %v1166_v7  ;;  %v1193_v41 = vadd.f32 %v1191_v53, %v1167_v8 }
  0xef   : > { %v1220_v14 = vadd.f32 %v1218_v45, %v1193_v41  ;;  %v1223_v1 = vpop.permute.xlu1 %1222  ;;  %v1219_v39 = vadd.f32 %v1217_v58, %v1192_v43 }
  0xf0   : > { %v1244_v38 = vmul.f32 %v1242_v48, %v1223_v1  ;;  %v1243_v52 = vmul.f32 %v1238_v50, %v1223_v1 }
  0xf2   : > { %v1246_v59 = vadd.f32 %v1244_v38, %v1220_v14  ;;  %v1245_v4 = vadd.f32 %v1243_v52, %v1219_v39 }
  0xf4   : > { %v1249_v60 = vpop.permute.xlu1 %1248 }
  0xf5   : > { %v1269_v49 = vmul.f32 %v1264_v10, %v1249_v60  ;;  %v1270_v25 = vmul.f32 %v1268_v15, %v1249_v60 }
  0xf7   : > { %v1271_v47 = vadd.f32 %v1269_v49, %v1245_v4  ;;  %v1272_v3 = vadd.f32 %v1270_v25, %v1246_v59 }
  0xf9   : > { %v1297_v44 = vadd.f32 %v1295_v63, %v1271_v47  ;;  %v1298_v5 = vadd.f32 %v1296_v56, %v1272_v3 }
  0xfb   : > { %1299 = vst [vmem:[%s145_s21] sm:$0xff] %v1297_v44  ;;  %1300 = vst [vmem:[%s145_s21 + $0x8] sm:$0xff] %v1298_v5 }
  0xfc PF: > { %s12_s9 = sadd.s32 1, %s1470_s9  }
  0xfd   : > { %p9_p4 = scmp.ge.s32.totalorder %s12_s9, 10  }
  0xff   :  { %11 = sbr.rel (!%p9_p4) target bundleno = 1 (0x1), region = 58 }

</bundles_post_ra>
